<compile_context>
chip_gen: v6e
topology: v6e:2x2x1
jax: 0.10.0
libtpu: 0.0.40
codegen_flags: <defaults>
</compile_context>

<pallas_src>
import functools

import jax
import jax.numpy as jnp
from jax.experimental import pallas as pl
from jax.experimental.pallas import tpu as pltpu


def _combined_loss_kernel(x_ref, t_ref, out_ref, *, tau):
    """One grid step = `bk` batch images.  For image i it emits a (3, 128)
    lane-dense partial-sum block:
       row 0: sum of BCE-with-logits(x, t)
       row 1: sum of exp(tau * sigmoid(x)) * mask
       row 2: sum of mask            (mask = 3x3-dilated (t > 0.5))
    """
    bk, h, w = x_ref.shape

    # Edge masks for the zero-padded 3x3 dilation and the output-row selector
    # (hoisted out of the per-image loop: JAX does not CSE broadcasts).
    col = jax.lax.broadcasted_iota(jnp.int32, (h, w), 1)
    row = jax.lax.broadcasted_iota(jnp.int32, (h, w), 0)
    not_first_col = col > 0
    not_last_col = col < (w - 1)
    not_first_row = row > 0
    not_last_row = row < (h - 1)
    row3 = jax.lax.broadcasted_iota(jnp.int32, (3, w), 0)

    for i in range(bk):                      # bk is a small trace-time constant
        x = x_ref[i].astype(jnp.float32)     # (H, W) logits
        t = t_ref[i].astype(jnp.float32)     # (H, W) targets

        # Numerically-stable BCE with logits (PyTorch formula):
        #   bce = max(x, 0) - x*t + log(1 + exp(-|x|))
        e = jnp.exp(-jnp.abs(x))             # reused below for the sigmoid
        d = 1.0 + e                          # in (1, 2]
        bce = jnp.maximum(x, 0.0) - x * t + jnp.log(d)

        # Stable sigmoid: approx EUP reciprocal + one Newton step (~f32 exact).
        r = pl.reciprocal(d, approx=True)
        inv = r * (2.0 - d * r)
        p = jnp.where(x >= 0.0, inv, e * inv)

        # 3x3 OR-dilation of (t > 0.5) with zero padding, separable 3-tap max
        # via XLU rolls (wrap-around columns/rows masked out).
        t01 = jnp.where(t > 0.5, 1.0, 0.0)
        frm_l = jnp.where(not_first_col, pltpu.roll(t01, shift=1, axis=1), 0.0)
        frm_r = jnp.where(not_last_col, pltpu.roll(t01, shift=w - 1, axis=1), 0.0)
        rowmax = jnp.maximum(t01, jnp.maximum(frm_l, frm_r))
        frm_u = jnp.where(not_first_row, pltpu.roll(rowmax, shift=1, axis=0), 0.0)
        frm_d = jnp.where(not_last_row, pltpu.roll(rowmax, shift=h - 1, axis=0), 0.0)
        mask = jnp.maximum(rowmax, jnp.maximum(frm_u, frm_d))   # already 0/1

        ev = jnp.exp(tau * p) * mask

        # Merged reductions: one sublane pass per quantity, then a single
        # combined cross-lane pass over a (3, W) slab.
        bce_r = jnp.sum(bce, axis=0, keepdims=True)    # (1, W)
        s_r = jnp.sum(ev, axis=0, keepdims=True)       # (1, W)
        m_r = jnp.sum(mask, axis=0, keepdims=True)     # (1, W)
        slab = jnp.where(row3 == 0, bce_r, jnp.where(row3 == 1, s_r, m_r))
        sums = jnp.sum(slab, axis=1, keepdims=True)    # (3, 1)

        out_ref[i] = jnp.broadcast_to(sums, (3, 128)).astype(jnp.float32)


def _pick_batch_block(batch, h, w, *, max_bk=8, budget_elems=64 * 1024):
    """Largest divisor of `batch` (<= max_bk) whose packed block stays small."""
    per_image = h * w
    bk = 1
    for d in range(1, min(batch, max_bk) + 1):
        if batch % d == 0 and d * per_image <= budget_elems:
            bk = d
    return bk


def combined_loss(outputs, targets, tau=10.0, epsilon=1e-6, alpha=0.5):
    """JAX/Pallas equivalent of CombinedLoss.forward.

    outputs: (B, 1, H, W) logits.
    targets: (B, H, W) or (B, C, H, W) masks (channel 0 used, as in PyTorch).
    """
    if outputs.ndim != 4 or outputs.shape[1] != 1:
        raise ValueError("outputs must have shape (B, 1, H, W)")
    B, _, H, W = outputs.shape

    x = outputs.reshape(B, H, W)                      # free reshape, no copy
    if targets.ndim == 3:
        t = targets
    elif targets.ndim == 4:
        t = targets[:, 0]                             # first channel
    else:
        raise ValueError("targets must be (B, H, W) or (B, C, H, W)")

    # Keep HBM-side dtypes narrow; the kernel upcasts to f32 inside VMEM.
    if not jnp.issubdtype(x.dtype, jnp.floating):
        x = x.astype(jnp.float32)
    if t.dtype == jnp.bool_:
        t = t.astype(jnp.bfloat16)                    # 0/1 exact, 2-byte DMA

    bk = _pick_batch_block(B, H, W)
    grid = (B // bk,)

    # Derive the VMEM budget from the actual chip instead of hard-coding the
    # full 64 MiB of a v7x TensorCore.
    try:
        vmem_cap = int(pltpu.get_tpu_info().vmem_capacity_bytes)
    except Exception:
        vmem_cap = 64 * 1024 * 1024
    vmem_limit = int(vmem_cap * 3 // 4)

    # TODO(synk): for very large H*W (full-image block + temporaries no longer
    # fit v7x's 64 MiB VMEM), add a second row-tile grid axis with 1-row halos
    # for the dilation.
    kernel = functools.partial(_combined_loss_kernel, tau=float(tau))
    part = pl.pallas_call(
        kernel,
        out_shape=jax.ShapeDtypeStruct((B, 3, 128), jnp.float32),
        grid=grid,
        in_specs=[
            pl.BlockSpec((bk, H, W), lambda b: (b, 0, 0)),   # logits images
            pl.BlockSpec((bk, H, W), lambda b: (b, 0, 0)),   # target images
        ],
        out_specs=pl.BlockSpec((bk, 3, 128), lambda b: (b, 0, 0)),
        compiler_params=pltpu.CompilerParams(
            dimension_semantics=("parallel",),
            vmem_limit_bytes=vmem_limit,
        ),
    )(x, t)

    bce_sum = part[:, 0, 0]                           # (B,)
    s_sum = part[:, 1, 0]                             # (B,)
    m_sum = part[:, 2, 0]                             # (B,)

    # ---- tiny O(B) epilogue in plain JAX ----
    # BCEWithLogitsLoss (mean over all elements).
    loss2 = jnp.sum(bce_sum) / jnp.float32(B * H * W)
    # AtLeastOneMatchLoss.
    smooth_max = jnp.log(s_sum + epsilon) / tau
    smooth_max = jnp.where(m_sum > 0, smooth_max, 0.0)
    loss_b = -jnp.log(smooth_max + epsilon)
    validf = jnp.where(m_sum > 0, 1.0, 0.0)
    nvalid = jnp.sum(validf)
    loss1 = jnp.where(nvalid > 0,
                      jnp.sum(loss_b * validf) / jnp.maximum(nvalid, 1.0),
                      jnp.mean(loss_b))
    return alpha * loss1 + (1.0 - alpha) * loss2


def _combined_loss_ref(outputs, targets, tau=10.0, epsilon=1e-6, alpha=0.5):
    """Pure-JAX mirror of the PyTorch CombinedLoss (for verification)."""
    outputs = outputs.astype(jnp.float32)
    t = targets.astype(jnp.float32)
    if t.ndim == 3:
        t = t[:, None]
    elif t.shape[1] != 1:
        t = t[:, :1]
    p = jax.nn.sigmoid(outputs)[:, 0]
    dil = jax.lax.reduce_window(
        t, -jnp.inf, jax.lax.max, (1, 1, 3, 3), (1, 1, 1, 1),
        [(0, 0), (0, 0), (1, 1), (1, 1)])[:, 0]
    mask = (dil > 0.5).astype(jnp.float32)
    msum = jnp.sum(mask, axis=(1, 2))
    smooth_max = jnp.log(jnp.sum(jnp.exp(tau * p) * mask, axis=(1, 2)) + epsilon) / tau
    smooth_max = jnp.where(msum > 0, smooth_max, 0.0)
    loss = -jnp.log(smooth_max + epsilon)
    valid = msum > 0
    nvalid = jnp.sum(valid.astype(jnp.float32))
    loss1 = jnp.where(nvalid > 0,
                      jnp.sum(jnp.where(valid, loss, 0.0)) / jnp.maximum(nvalid, 1.0),
                      jnp.mean(loss))
    xb = outputs
    tb = jnp.broadcast_to(t, xb.shape)
    bce = jnp.maximum(xb, 0.0) - xb * tb + jnp.log1p(jnp.exp(-jnp.abs(xb)))
    loss2 = jnp.mean(bce)
    return alpha * loss1 + (1.0 - alpha) * loss2


if __name__ == "__main__":
    key = jax.random.PRNGKey(0)
    k1, k2 = jax.random.split(key)
    B, H, W = 8, 128, 128
    logits = 2.0 * jax.random.normal(k1, (B, 1, H, W), dtype=jnp.float32)
    # Binary masks stored narrow (bf16): exact 0/1 values, half the target DMA.
    targets = (jax.random.uniform(k2, (B, 1, H, W)) > 0.7).astype(jnp.bfloat16)

    loss = combined_loss(logits, targets, tau=10.0, epsilon=1e-6, alpha=0.5)
    loss = jax.block_until_ready(loss)

    ref = _combined_loss_ref(logits, targets, tau=10.0, epsilon=1e-6, alpha=0.5)
    assert jnp.allclose(loss, ref, rtol=5e-4, atol=1e-4), (loss, ref)
    print("KERNEL_OK")
</pallas_src>

<mosaic_0001>
module attributes {stable_mosaic.version = 11 : i64} {
  func.func @_combined_loss_kernel(%arg0: i32, %arg1: memref<4x128x128xf32, #tpu.memory_space<vmem>>, %arg2: memref<4x128x128xbf16, #tpu.memory_space<vmem>>, %arg3: memref<4x3x128xf32, #tpu.memory_space<vmem>>) attributes {dimension_semantics = [#tpu.dimension_semantics<parallel>], iteration_bounds = array<i64: 2>, scalar_prefetch = 0 : i64, scratch_operands = 0 : i64, tpu.core_type = #tpu.core_type<tc>, window_params = [{transform_indices = @transform_0, window_bounds = array<i64: 4, 128, 128>}, {transform_indices = @transform_1, window_bounds = array<i64: 4, 128, 128>}, {transform_indices = @transform_2, window_bounds = array<i64: 4, 3, 128>}]} {
    %0 = tpu.iota {dimensions = array<i32: 1>} : vector<128x128xi32>
    %1 = tpu.iota {dimensions = array<i32: 0>} : vector<128x128xi32>
    %c0_i32 = arith.constant 0 : i32
    %2 = vector.broadcast %c0_i32 : i32 to vector<128x128xi32>
    %3 = arith.cmpi sgt, %0, %2 : vector<128x128xi32>
    %c127_i32 = arith.constant 127 : i32
    %4 = vector.broadcast %c127_i32 : i32 to vector<128x128xi32>
    %5 = arith.cmpi slt, %0, %4 : vector<128x128xi32>
    %c0_i32_0 = arith.constant 0 : i32
    %6 = vector.broadcast %c0_i32_0 : i32 to vector<128x128xi32>
    %7 = arith.cmpi sgt, %1, %6 : vector<128x128xi32>
    %c127_i32_1 = arith.constant 127 : i32
    %8 = vector.broadcast %c127_i32_1 : i32 to vector<128x128xi32>
    %9 = arith.cmpi slt, %1, %8 : vector<128x128xi32>
    %10 = tpu.iota {dimensions = array<i32: 0>} : vector<3x128xi32>
    %c0 = arith.constant 0 : index
    %c0_2 = arith.constant 0 : index
    %c0_3 = arith.constant 0 : index
    %11 = vector.load %arg1[%c0, %c0_2, %c0_3] : memref<4x128x128xf32, #tpu.memory_space<vmem>>, vector<1x128x128xf32>
    %12 = vector.shape_cast %11 : vector<1x128x128xf32> to vector<128x128xf32>
    %c0_4 = arith.constant 0 : index
    %c0_5 = arith.constant 0 : index
    %c0_6 = arith.constant 0 : index
    %13 = vector.load %arg2[%c0_4, %c0_5, %c0_6] : memref<4x128x128xbf16, #tpu.memory_space<vmem>>, vector<1x128x128xbf16>
    %14 = vector.shape_cast %13 : vector<1x128x128xbf16> to vector<128x128xbf16>
    %15 = arith.extf %14 : vector<128x128xbf16> to vector<128x128xf32>
    %16 = math.absf %12 : vector<128x128xf32>
    %cst = arith.constant 0.000000e+00 : f32
    %17 = vector.broadcast %cst : f32 to vector<128x128xf32>
    %18 = arith.subf %17, %16 : vector<128x128xf32>
    %19 = math.exp %18 : vector<128x128xf32>
    %cst_7 = arith.constant 1.000000e+00 : f32
    %20 = vector.broadcast %cst_7 : f32 to vector<128x128xf32>
    %21 = arith.addf %20, %19 : vector<128x128xf32>
    %cst_8 = arith.constant 0.000000e+00 : f32
    %22 = vector.broadcast %cst_8 : f32 to vector<128x128xf32>
    %23 = arith.maximumf %12, %22 : vector<128x128xf32>
    %24 = arith.mulf %12, %15 : vector<128x128xf32>
    %25 = arith.subf %23, %24 : vector<128x128xf32>
    %26 = math.log %21 : vector<128x128xf32>
    %27 = arith.addf %25, %26 : vector<128x128xf32>
    %28 = tpu.reciprocal %21 {approx = true} : vector<128x128xf32> -> vector<128x128xf32>
    %29 = arith.mulf %21, %28 : vector<128x128xf32>
    %cst_9 = arith.constant 2.000000e+00 : f32
    %30 = vector.broadcast %cst_9 : f32 to vector<128x128xf32>
    %31 = arith.subf %30, %29 : vector<128x128xf32>
    %32 = arith.mulf %28, %31 : vector<128x128xf32>
    %cst_10 = arith.constant 0.000000e+00 : f32
    %33 = vector.broadcast %cst_10 : f32 to vector<128x128xf32>
    %34 = arith.cmpf oge, %12, %33 : vector<128x128xf32>
    %35 = arith.mulf %19, %32 : vector<128x128xf32>
    %36 = arith.select %34, %32, %35 : vector<128x128xi1>, vector<128x128xf32>
    %cst_11 = arith.constant 5.000000e-01 : f32
    %37 = vector.broadcast %cst_11 : f32 to vector<128x128xf32>
    %38 = arith.cmpf ogt, %15, %37 : vector<128x128xf32>
    %cst_12 = arith.constant 1.000000e+00 : f32
    %cst_13 = arith.constant 0.000000e+00 : f32
    %39 = vector.broadcast %cst_12 : f32 to vector<128x128xf32>
    %40 = vector.broadcast %cst_13 : f32 to vector<128x128xf32>
    %41 = arith.select %38, %39, %40 : vector<128x128xi1>, vector<128x128xf32>
    %c1_i32 = arith.constant 1 : i32
    %42 = tpu.dynamic_rotate %41 by %c1_i32 dim 1 : vector<128x128xf32>, i32 -> vector<128x128xf32>
    %cst_14 = arith.constant 0.000000e+00 : f32
    %43 = vector.broadcast %cst_14 : f32 to vector<128x128xf32>
    %44 = arith.select %3, %42, %43 : vector<128x128xi1>, vector<128x128xf32>
    %c127_i32_15 = arith.constant 127 : i32
    %45 = tpu.dynamic_rotate %41 by %c127_i32_15 dim 1 : vector<128x128xf32>, i32 -> vector<128x128xf32>
    %cst_16 = arith.constant 0.000000e+00 : f32
    %46 = vector.broadcast %cst_16 : f32 to vector<128x128xf32>
    %47 = arith.select %5, %45, %46 : vector<128x128xi1>, vector<128x128xf32>
    %48 = arith.maximumf %44, %47 : vector<128x128xf32>
    %49 = arith.maximumf %41, %48 : vector<128x128xf32>
    %c1_i32_17 = arith.constant 1 : i32
    %50 = tpu.dynamic_rotate %49 by %c1_i32_17 dim 0 : vector<128x128xf32>, i32 -> vector<128x128xf32>
    %cst_18 = arith.constant 0.000000e+00 : f32
    %51 = vector.broadcast %cst_18 : f32 to vector<128x128xf32>
    %52 = arith.select %7, %50, %51 : vector<128x128xi1>, vector<128x128xf32>
    %c127_i32_19 = arith.constant 127 : i32
    %53 = tpu.dynamic_rotate %49 by %c127_i32_19 dim 0 : vector<128x128xf32>, i32 -> vector<128x128xf32>
    %cst_20 = arith.constant 0.000000e+00 : f32
    %54 = vector.broadcast %cst_20 : f32 to vector<128x128xf32>
    %55 = arith.select %9, %53, %54 : vector<128x128xi1>, vector<128x128xf32>
    %56 = arith.maximumf %52, %55 : vector<128x128xf32>
    %57 = arith.maximumf %49, %56 : vector<128x128xf32>
    %cst_21 = arith.constant 1.000000e+01 : f32
    %58 = vector.broadcast %cst_21 : f32 to vector<128x128xf32>
    %59 = arith.mulf %58, %36 : vector<128x128xf32>
    %60 = math.exp %59 : vector<128x128xf32>
    %61 = arith.mulf %60, %57 : vector<128x128xf32>
    %cst_22 = arith.constant dense<0.000000e+00> : vector<128xf32>
    %62 = vector.multi_reduction <add>, %27, %cst_22 [0] : vector<128x128xf32> to vector<128xf32>
    %63 = vector.shape_cast %62 : vector<128xf32> to vector<1x128xf32>
    %cst_23 = arith.constant dense<0.000000e+00> : vector<128xf32>
    %64 = vector.multi_reduction <add>, %61, %cst_23 [0] : vector<128x128xf32> to vector<128xf32>
    %65 = vector.shape_cast %64 : vector<128xf32> to vector<1x128xf32>
    %cst_24 = arith.constant dense<0.000000e+00> : vector<128xf32>
    %66 = vector.multi_reduction <add>, %57, %cst_24 [0] : vector<128x128xf32> to vector<128xf32>
    %67 = vector.shape_cast %66 : vector<128xf32> to vector<1x128xf32>
    %c0_i32_25 = arith.constant 0 : i32
    %68 = vector.broadcast %c0_i32_25 : i32 to vector<3x128xi32>
    %69 = arith.cmpi eq, %10, %68 : vector<3x128xi32>
    %c1_i32_26 = arith.constant 1 : i32
    %70 = vector.broadcast %c1_i32_26 : i32 to vector<3x128xi32>
    %71 = arith.cmpi eq, %10, %70 : vector<3x128xi32>
    %72 = vector.shape_cast %65 : vector<1x128xf32> to vector<1x128xf32>
    %73 = vector.broadcast %72 : vector<1x128xf32> to vector<3x128xf32>
    %74 = vector.shape_cast %67 : vector<1x128xf32> to vector<1x128xf32>
    %75 = vector.broadcast %74 : vector<1x128xf32> to vector<3x128xf32>
    %76 = arith.select %71, %73, %75 : vector<3x128xi1>, vector<3x128xf32>
    %77 = vector.shape_cast %63 : vector<1x128xf32> to vector<1x128xf32>
    %78 = vector.broadcast %77 : vector<1x128xf32> to vector<3x128xf32>
    %79 = arith.select %69, %78, %76 : vector<3x128xi1>, vector<3x128xf32>
    %cst_27 = arith.constant dense<0.000000e+00> : vector<3xf32>
    %80 = vector.multi_reduction <add>, %79, %cst_27 [1] : vector<3x128xf32> to vector<3xf32>
    %81 = vector.shape_cast %80 : vector<3xf32> to vector<3x1xf32>
    %82 = vector.shape_cast %81 : vector<3x1xf32> to vector<3x1xf32>
    %83 = vector.broadcast %82 : vector<3x1xf32> to vector<3x128xf32>
    %c0_28 = arith.constant 0 : index
    %c0_29 = arith.constant 0 : index
    %c0_30 = arith.constant 0 : index
    %84 = vector.load %arg3[%c0_28, %c0_29, %c0_30] : memref<4x3x128xf32, #tpu.memory_space<vmem>>, vector<1x3x128xf32>
    %85 = vector.shape_cast %84 : vector<1x3x128xf32> to vector<3x128xf32>
    %86 = vector.shape_cast %83 : vector<3x128xf32> to vector<1x3x128xf32>
    tpu.vector_store %arg3[%c0_28, %c0_29, %c0_30], %86 {strides = array<i32>} : memref<4x3x128xf32, #tpu.memory_space<vmem>>, vector<1x3x128xf32>,
    %c1 = arith.constant 1 : index
    %c0_31 = arith.constant 0 : index
    %c0_32 = arith.constant 0 : index
    %87 = vector.load %arg1[%c1, %c0_31, %c0_32] : memref<4x128x128xf32, #tpu.memory_space<vmem>>, vector<1x128x128xf32>
    %88 = vector.shape_cast %87 : vector<1x128x128xf32> to vector<128x128xf32>
    %c1_33 = arith.constant 1 : index
    %c0_34 = arith.constant 0 : index
    %c0_35 = arith.constant 0 : index
    %89 = vector.load %arg2[%c1_33, %c0_34, %c0_35] : memref<4x128x128xbf16, #tpu.memory_space<vmem>>, vector<1x128x128xbf16>
    %90 = vector.shape_cast %89 : vector<1x128x128xbf16> to vector<128x128xbf16>
    %91 = arith.extf %90 : vector<128x128xbf16> to vector<128x128xf32>
    %92 = math.absf %88 : vector<128x128xf32>
    %cst_36 = arith.constant 0.000000e+00 : f32
    %93 = vector.broadcast %cst_36 : f32 to vector<128x128xf32>
    %94 = arith.subf %93, %92 : vector<128x128xf32>
    %95 = math.exp %94 : vector<128x128xf32>
    %cst_37 = arith.constant 1.000000e+00 : f32
    %96 = vector.broadcast %cst_37 : f32 to vector<128x128xf32>
    %97 = arith.addf %96, %95 : vector<128x128xf32>
    %cst_38 = arith.constant 0.000000e+00 : f32
    %98 = vector.broadcast %cst_38 : f32 to vector<128x128xf32>
    %99 = arith.maximumf %88, %98 : vector<128x128xf32>
    %100 = arith.mulf %88, %91 : vector<128x128xf32>
    %101 = arith.subf %99, %100 : vector<128x128xf32>
    %102 = math.log %97 : vector<128x128xf32>
    %103 = arith.addf %101, %102 : vector<128x128xf32>
    %104 = tpu.reciprocal %97 {approx = true} : vector<128x128xf32> -> vector<128x128xf32>
    %105 = arith.mulf %97, %104 : vector<128x128xf32>
    %cst_39 = arith.constant 2.000000e+00 : f32
    %106 = vector.broadcast %cst_39 : f32 to vector<128x128xf32>
    %107 = arith.subf %106, %105 : vector<128x128xf32>
    %108 = arith.mulf %104, %107 : vector<128x128xf32>
    %cst_40 = arith.constant 0.000000e+00 : f32
    %109 = vector.broadcast %cst_40 : f32 to vector<128x128xf32>
    %110 = arith.cmpf oge, %88, %109 : vector<128x128xf32>
    %111 = arith.mulf %95, %108 : vector<128x128xf32>
    %112 = arith.select %110, %108, %111 : vector<128x128xi1>, vector<128x128xf32>
    %cst_41 = arith.constant 5.000000e-01 : f32
    %113 = vector.broadcast %cst_41 : f32 to vector<128x128xf32>
    %114 = arith.cmpf ogt, %91, %113 : vector<128x128xf32>
    %cst_42 = arith.constant 1.000000e+00 : f32
    %cst_43 = arith.constant 0.000000e+00 : f32
    %115 = vector.broadcast %cst_42 : f32 to vector<128x128xf32>
    %116 = vector.broadcast %cst_43 : f32 to vector<128x128xf32>
    %117 = arith.select %114, %115, %116 : vector<128x128xi1>, vector<128x128xf32>
    %c1_i32_44 = arith.constant 1 : i32
    %118 = tpu.dynamic_rotate %117 by %c1_i32_44 dim 1 : vector<128x128xf32>, i32 -> vector<128x128xf32>
    %cst_45 = arith.constant 0.000000e+00 : f32
    %119 = vector.broadcast %cst_45 : f32 to vector<128x128xf32>
    %120 = arith.select %3, %118, %119 : vector<128x128xi1>, vector<128x128xf32>
    %c127_i32_46 = arith.constant 127 : i32
    %121 = tpu.dynamic_rotate %117 by %c127_i32_46 dim 1 : vector<128x128xf32>, i32 -> vector<128x128xf32>
    %cst_47 = arith.constant 0.000000e+00 : f32
    %122 = vector.broadcast %cst_47 : f32 to vector<128x128xf32>
    %123 = arith.select %5, %121, %122 : vector<128x128xi1>, vector<128x128xf32>
    %124 = arith.maximumf %120, %123 : vector<128x128xf32>
    %125 = arith.maximumf %117, %124 : vector<128x128xf32>
    %c1_i32_48 = arith.constant 1 : i32
    %126 = tpu.dynamic_rotate %125 by %c1_i32_48 dim 0 : vector<128x128xf32>, i32 -> vector<128x128xf32>
    %cst_49 = arith.constant 0.000000e+00 : f32
    %127 = vector.broadcast %cst_49 : f32 to vector<128x128xf32>
    %128 = arith.select %7, %126, %127 : vector<128x128xi1>, vector<128x128xf32>
    %c127_i32_50 = arith.constant 127 : i32
    %129 = tpu.dynamic_rotate %125 by %c127_i32_50 dim 0 : vector<128x128xf32>, i32 -> vector<128x128xf32>
    %cst_51 = arith.constant 0.000000e+00 : f32
    %130 = vector.broadcast %cst_51 : f32 to vector<128x128xf32>
    %131 = arith.select %9, %129, %130 : vector<128x128xi1>, vector<128x128xf32>
    %132 = arith.maximumf %128, %131 : vector<128x128xf32>
    %133 = arith.maximumf %125, %132 : vector<128x128xf32>
    %cst_52 = arith.constant 1.000000e+01 : f32
    %134 = vector.broadcast %cst_52 : f32 to vector<128x128xf32>
    %135 = arith.mulf %134, %112 : vector<128x128xf32>
    %136 = math.exp %135 : vector<128x128xf32>
    %137 = arith.mulf %136, %133 : vector<128x128xf32>
    %cst_53 = arith.constant dense<0.000000e+00> : vector<128xf32>
    %138 = vector.multi_reduction <add>, %103, %cst_53 [0] : vector<128x128xf32> to vector<128xf32>
    %139 = vector.shape_cast %138 : vector<128xf32> to vector<1x128xf32>
    %cst_54 = arith.constant dense<0.000000e+00> : vector<128xf32>
    %140 = vector.multi_reduction <add>, %137, %cst_54 [0] : vector<128x128xf32> to vector<128xf32>
    %141 = vector.shape_cast %140 : vector<128xf32> to vector<1x128xf32>
    %cst_55 = arith.constant dense<0.000000e+00> : vector<128xf32>
    %142 = vector.multi_reduction <add>, %133, %cst_55 [0] : vector<128x128xf32> to vector<128xf32>
    %143 = vector.shape_cast %142 : vector<128xf32> to vector<1x128xf32>
    %c0_i32_56 = arith.constant 0 : i32
    %144 = vector.broadcast %c0_i32_56 : i32 to vector<3x128xi32>
    %145 = arith.cmpi eq, %10, %144 : vector<3x128xi32>
    %c1_i32_57 = arith.constant 1 : i32
    %146 = vector.broadcast %c1_i32_57 : i32 to vector<3x128xi32>
    %147 = arith.cmpi eq, %10, %146 : vector<3x128xi32>
    %148 = vector.shape_cast %141 : vector<1x128xf32> to vector<1x128xf32>
    %149 = vector.broadcast %148 : vector<1x128xf32> to vector<3x128xf32>
    %150 = vector.shape_cast %143 : vector<1x128xf32> to vector<1x128xf32>
    %151 = vector.broadcast %150 : vector<1x128xf32> to vector<3x128xf32>
    %152 = arith.select %147, %149, %151 : vector<3x128xi1>, vector<3x128xf32>
    %153 = vector.shape_cast %139 : vector<1x128xf32> to vector<1x128xf32>
    %154 = vector.broadcast %153 : vector<1x128xf32> to vector<3x128xf32>
    %155 = arith.select %145, %154, %152 : vector<3x128xi1>, vector<3x128xf32>
    %cst_58 = arith.constant dense<0.000000e+00> : vector<3xf32>
    %156 = vector.multi_reduction <add>, %155, %cst_58 [1] : vector<3x128xf32> to vector<3xf32>
    %157 = vector.shape_cast %156 : vector<3xf32> to vector<3x1xf32>
    %158 = vector.shape_cast %157 : vector<3x1xf32> to vector<3x1xf32>
    %159 = vector.broadcast %158 : vector<3x1xf32> to vector<3x128xf32>
    %c1_59 = arith.constant 1 : index
    %c0_60 = arith.constant 0 : index
    %c0_61 = arith.constant 0 : index
    %160 = vector.load %arg3[%c1_59, %c0_60, %c0_61] : memref<4x3x128xf32, #tpu.memory_space<vmem>>, vector<1x3x128xf32>
    %161 = vector.shape_cast %160 : vector<1x3x128xf32> to vector<3x128xf32>
    %162 = vector.shape_cast %159 : vector<3x128xf32> to vector<1x3x128xf32>
    tpu.vector_store %arg3[%c1_59, %c0_60, %c0_61], %162 {strides = array<i32>} : memref<4x3x128xf32, #tpu.memory_space<vmem>>, vector<1x3x128xf32>,
    %c2 = arith.constant 2 : index
    %c0_62 = arith.constant 0 : index
    %c0_63 = arith.constant 0 : index
    %163 = vector.load %arg1[%c2, %c0_62, %c0_63] : memref<4x128x128xf32, #tpu.memory_space<vmem>>, vector<1x128x128xf32>
    %164 = vector.shape_cast %163 : vector<1x128x128xf32> to vector<128x128xf32>
    %c2_64 = arith.constant 2 : index
    %c0_65 = arith.constant 0 : index
    %c0_66 = arith.constant 0 : index
    %165 = vector.load %arg2[%c2_64, %c0_65, %c0_66] : memref<4x128x128xbf16, #tpu.memory_space<vmem>>, vector<1x128x128xbf16>
    %166 = vector.shape_cast %165 : vector<1x128x128xbf16> to vector<128x128xbf16>
    %167 = arith.extf %166 : vector<128x128xbf16> to vector<128x128xf32>
    %168 = math.absf %164 : vector<128x128xf32>
    %cst_67 = arith.constant 0.000000e+00 : f32
    %169 = vector.broadcast %cst_67 : f32 to vector<128x128xf32>
    %170 = arith.subf %169, %168 : vector<128x128xf32>
    %171 = math.exp %170 : vector<128x128xf32>
    %cst_68 = arith.constant 1.000000e+00 : f32
    %172 = vector.broadcast %cst_68 : f32 to vector<128x128xf32>
    %173 = arith.addf %172, %171 : vector<128x128xf32>
    %cst_69 = arith.constant 0.000000e+00 : f32
    %174 = vector.broadcast %cst_69 : f32 to vector<128x128xf32>
    %175 = arith.maximumf %164, %174 : vector<128x128xf32>
    %176 = arith.mulf %164, %167 : vector<128x128xf32>
    %177 = arith.subf %175, %176 : vector<128x128xf32>
    %178 = math.log %173 : vector<128x128xf32>
    %179 = arith.addf %177, %178 : vector<128x128xf32>
    %180 = tpu.reciprocal %173 {approx = true} : vector<128x128xf32> -> vector<128x128xf32>
    %181 = arith.mulf %173, %180 : vector<128x128xf32>
    %cst_70 = arith.constant 2.000000e+00 : f32
    %182 = vector.broadcast %cst_70 : f32 to vector<128x128xf32>
    %183 = arith.subf %182, %181 : vector<128x128xf32>
    %184 = arith.mulf %180, %183 : vector<128x128xf32>
    %cst_71 = arith.constant 0.000000e+00 : f32
    %185 = vector.broadcast %cst_71 : f32 to vector<128x128xf32>
    %186 = arith.cmpf oge, %164, %185 : vector<128x128xf32>
    %187 = arith.mulf %171, %184 : vector<128x128xf32>
    %188 = arith.select %186, %184, %187 : vector<128x128xi1>, vector<128x128xf32>
    %cst_72 = arith.constant 5.000000e-01 : f32
    %189 = vector.broadcast %cst_72 : f32 to vector<128x128xf32>
    %190 = arith.cmpf ogt, %167, %189 : vector<128x128xf32>
    %cst_73 = arith.constant 1.000000e+00 : f32
    %cst_74 = arith.constant 0.000000e+00 : f32
    %191 = vector.broadcast %cst_73 : f32 to vector<128x128xf32>
    %192 = vector.broadcast %cst_74 : f32 to vector<128x128xf32>
    %193 = arith.select %190, %191, %192 : vector<128x128xi1>, vector<128x128xf32>
    %c1_i32_75 = arith.constant 1 : i32
    %194 = tpu.dynamic_rotate %193 by %c1_i32_75 dim 1 : vector<128x128xf32>, i32 -> vector<128x128xf32>
    %cst_76 = arith.constant 0.000000e+00 : f32
    %195 = vector.broadcast %cst_76 : f32 to vector<128x128xf32>
    %196 = arith.select %3, %194, %195 : vector<128x128xi1>, vector<128x128xf32>
    %c127_i32_77 = arith.constant 127 : i32
    %197 = tpu.dynamic_rotate %193 by %c127_i32_77 dim 1 : vector<128x128xf32>, i32 -> vector<128x128xf32>
    %cst_78 = arith.constant 0.000000e+00 : f32
    %198 = vector.broadcast %cst_78 : f32 to vector<128x128xf32>
    %199 = arith.select %5, %197, %198 : vector<128x128xi1>, vector<128x128xf32>
    %200 = arith.maximumf %196, %199 : vector<128x128xf32>
    %201 = arith.maximumf %193, %200 : vector<128x128xf32>
    %c1_i32_79 = arith.constant 1 : i32
    %202 = tpu.dynamic_rotate %201 by %c1_i32_79 dim 0 : vector<128x128xf32>, i32 -> vector<128x128xf32>
    %cst_80 = arith.constant 0.000000e+00 : f32
    %203 = vector.broadcast %cst_80 : f32 to vector<128x128xf32>
    %204 = arith.select %7, %202, %203 : vector<128x128xi1>, vector<128x128xf32>
    %c127_i32_81 = arith.constant 127 : i32
    %205 = tpu.dynamic_rotate %201 by %c127_i32_81 dim 0 : vector<128x128xf32>, i32 -> vector<128x128xf32>
    %cst_82 = arith.constant 0.000000e+00 : f32
    %206 = vector.broadcast %cst_82 : f32 to vector<128x128xf32>
    %207 = arith.select %9, %205, %206 : vector<128x128xi1>, vector<128x128xf32>
    %208 = arith.maximumf %204, %207 : vector<128x128xf32>
    %209 = arith.maximumf %201, %208 : vector<128x128xf32>
    %cst_83 = arith.constant 1.000000e+01 : f32
    %210 = vector.broadcast %cst_83 : f32 to vector<128x128xf32>
    %211 = arith.mulf %210, %188 : vector<128x128xf32>
    %212 = math.exp %211 : vector<128x128xf32>
    %213 = arith.mulf %212, %209 : vector<128x128xf32>
    %cst_84 = arith.constant dense<0.000000e+00> : vector<128xf32>
    %214 = vector.multi_reduction <add>, %179, %cst_84 [0] : vector<128x128xf32> to vector<128xf32>
    %215 = vector.shape_cast %214 : vector<128xf32> to vector<1x128xf32>
    %cst_85 = arith.constant dense<0.000000e+00> : vector<128xf32>
    %216 = vector.multi_reduction <add>, %213, %cst_85 [0] : vector<128x128xf32> to vector<128xf32>
    %217 = vector.shape_cast %216 : vector<128xf32> to vector<1x128xf32>
    %cst_86 = arith.constant dense<0.000000e+00> : vector<128xf32>
    %218 = vector.multi_reduction <add>, %209, %cst_86 [0] : vector<128x128xf32> to vector<128xf32>
    %219 = vector.shape_cast %218 : vector<128xf32> to vector<1x128xf32>
    %c0_i32_87 = arith.constant 0 : i32
    %220 = vector.broadcast %c0_i32_87 : i32 to vector<3x128xi32>
    %221 = arith.cmpi eq, %10, %220 : vector<3x128xi32>
    %c1_i32_88 = arith.constant 1 : i32
    %222 = vector.broadcast %c1_i32_88 : i32 to vector<3x128xi32>
    %223 = arith.cmpi eq, %10, %222 : vector<3x128xi32>
    %224 = vector.shape_cast %217 : vector<1x128xf32> to vector<1x128xf32>
    %225 = vector.broadcast %224 : vector<1x128xf32> to vector<3x128xf32>
    %226 = vector.shape_cast %219 : vector<1x128xf32> to vector<1x128xf32>
    %227 = vector.broadcast %226 : vector<1x128xf32> to vector<3x128xf32>
    %228 = arith.select %223, %225, %227 : vector<3x128xi1>, vector<3x128xf32>
    %229 = vector.shape_cast %215 : vector<1x128xf32> to vector<1x128xf32>
    %230 = vector.broadcast %229 : vector<1x128xf32> to vector<3x128xf32>
    %231 = arith.select %221, %230, %228 : vector<3x128xi1>, vector<3x128xf32>
    %cst_89 = arith.constant dense<0.000000e+00> : vector<3xf32>
    %232 = vector.multi_reduction <add>, %231, %cst_89 [1] : vector<3x128xf32> to vector<3xf32>
    %233 = vector.shape_cast %232 : vector<3xf32> to vector<3x1xf32>
    %234 = vector.shape_cast %233 : vector<3x1xf32> to vector<3x1xf32>
    %235 = vector.broadcast %234 : vector<3x1xf32> to vector<3x128xf32>
    %c2_90 = arith.constant 2 : index
    %c0_91 = arith.constant 0 : index
    %c0_92 = arith.constant 0 : index
    %236 = vector.load %arg3[%c2_90, %c0_91, %c0_92] : memref<4x3x128xf32, #tpu.memory_space<vmem>>, vector<1x3x128xf32>
    %237 = vector.shape_cast %236 : vector<1x3x128xf32> to vector<3x128xf32>
    %238 = vector.shape_cast %235 : vector<3x128xf32> to vector<1x3x128xf32>
    tpu.vector_store %arg3[%c2_90, %c0_91, %c0_92], %238 {strides = array<i32>} : memref<4x3x128xf32, #tpu.memory_space<vmem>>, vector<1x3x128xf32>,
    %c3 = arith.constant 3 : index
    %c0_93 = arith.constant 0 : index
    %c0_94 = arith.constant 0 : index
    %239 = vector.load %arg1[%c3, %c0_93, %c0_94] : memref<4x128x128xf32, #tpu.memory_space<vmem>>, vector<1x128x128xf32>
    %240 = vector.shape_cast %239 : vector<1x128x128xf32> to vector<128x128xf32>
    %c3_95 = arith.constant 3 : index
    %c0_96 = arith.constant 0 : index
    %c0_97 = arith.constant 0 : index
    %241 = vector.load %arg2[%c3_95, %c0_96, %c0_97] : memref<4x128x128xbf16, #tpu.memory_space<vmem>>, vector<1x128x128xbf16>
    %242 = vector.shape_cast %241 : vector<1x128x128xbf16> to vector<128x128xbf16>
    %243 = arith.extf %242 : vector<128x128xbf16> to vector<128x128xf32>
    %244 = math.absf %240 : vector<128x128xf32>
    %cst_98 = arith.constant 0.000000e+00 : f32
    %245 = vector.broadcast %cst_98 : f32 to vector<128x128xf32>
    %246 = arith.subf %245, %244 : vector<128x128xf32>
    %247 = math.exp %246 : vector<128x128xf32>
    %cst_99 = arith.constant 1.000000e+00 : f32
    %248 = vector.broadcast %cst_99 : f32 to vector<128x128xf32>
    %249 = arith.addf %248, %247 : vector<128x128xf32>
    %cst_100 = arith.constant 0.000000e+00 : f32
    %250 = vector.broadcast %cst_100 : f32 to vector<128x128xf32>
    %251 = arith.maximumf %240, %250 : vector<128x128xf32>
    %252 = arith.mulf %240, %243 : vector<128x128xf32>
    %253 = arith.subf %251, %252 : vector<128x128xf32>
    %254 = math.log %249 : vector<128x128xf32>
    %255 = arith.addf %253, %254 : vector<128x128xf32>
    %256 = tpu.reciprocal %249 {approx = true} : vector<128x128xf32> -> vector<128x128xf32>
    %257 = arith.mulf %249, %256 : vector<128x128xf32>
    %cst_101 = arith.constant 2.000000e+00 : f32
    %258 = vector.broadcast %cst_101 : f32 to vector<128x128xf32>
    %259 = arith.subf %258, %257 : vector<128x128xf32>
    %260 = arith.mulf %256, %259 : vector<128x128xf32>
    %cst_102 = arith.constant 0.000000e+00 : f32
    %261 = vector.broadcast %cst_102 : f32 to vector<128x128xf32>
    %262 = arith.cmpf oge, %240, %261 : vector<128x128xf32>
    %263 = arith.mulf %247, %260 : vector<128x128xf32>
    %264 = arith.select %262, %260, %263 : vector<128x128xi1>, vector<128x128xf32>
    %cst_103 = arith.constant 5.000000e-01 : f32
    %265 = vector.broadcast %cst_103 : f32 to vector<128x128xf32>
    %266 = arith.cmpf ogt, %243, %265 : vector<128x128xf32>
    %cst_104 = arith.constant 1.000000e+00 : f32
    %cst_105 = arith.constant 0.000000e+00 : f32
    %267 = vector.broadcast %cst_104 : f32 to vector<128x128xf32>
    %268 = vector.broadcast %cst_105 : f32 to vector<128x128xf32>
    %269 = arith.select %266, %267, %268 : vector<128x128xi1>, vector<128x128xf32>
    %c1_i32_106 = arith.constant 1 : i32
    %270 = tpu.dynamic_rotate %269 by %c1_i32_106 dim 1 : vector<128x128xf32>, i32 -> vector<128x128xf32>
    %cst_107 = arith.constant 0.000000e+00 : f32
    %271 = vector.broadcast %cst_107 : f32 to vector<128x128xf32>
    %272 = arith.select %3, %270, %271 : vector<128x128xi1>, vector<128x128xf32>
    %c127_i32_108 = arith.constant 127 : i32
    %273 = tpu.dynamic_rotate %269 by %c127_i32_108 dim 1 : vector<128x128xf32>, i32 -> vector<128x128xf32>
    %cst_109 = arith.constant 0.000000e+00 : f32
    %274 = vector.broadcast %cst_109 : f32 to vector<128x128xf32>
    %275 = arith.select %5, %273, %274 : vector<128x128xi1>, vector<128x128xf32>
    %276 = arith.maximumf %272, %275 : vector<128x128xf32>
    %277 = arith.maximumf %269, %276 : vector<128x128xf32>
    %c1_i32_110 = arith.constant 1 : i32
    %278 = tpu.dynamic_rotate %277 by %c1_i32_110 dim 0 : vector<128x128xf32>, i32 -> vector<128x128xf32>
    %cst_111 = arith.constant 0.000000e+00 : f32
    %279 = vector.broadcast %cst_111 : f32 to vector<128x128xf32>
    %280 = arith.select %7, %278, %279 : vector<128x128xi1>, vector<128x128xf32>
    %c127_i32_112 = arith.constant 127 : i32
    %281 = tpu.dynamic_rotate %277 by %c127_i32_112 dim 0 : vector<128x128xf32>, i32 -> vector<128x128xf32>
    %cst_113 = arith.constant 0.000000e+00 : f32
    %282 = vector.broadcast %cst_113 : f32 to vector<128x128xf32>
    %283 = arith.select %9, %281, %282 : vector<128x128xi1>, vector<128x128xf32>
    %284 = arith.maximumf %280, %283 : vector<128x128xf32>
    %285 = arith.maximumf %277, %284 : vector<128x128xf32>
    %cst_114 = arith.constant 1.000000e+01 : f32
    %286 = vector.broadcast %cst_114 : f32 to vector<128x128xf32>
    %287 = arith.mulf %286, %264 : vector<128x128xf32>
    %288 = math.exp %287 : vector<128x128xf32>
    %289 = arith.mulf %288, %285 : vector<128x128xf32>
    %cst_115 = arith.constant dense<0.000000e+00> : vector<128xf32>
    %290 = vector.multi_reduction <add>, %255, %cst_115 [0] : vector<128x128xf32> to vector<128xf32>
    %291 = vector.shape_cast %290 : vector<128xf32> to vector<1x128xf32>
    %cst_116 = arith.constant dense<0.000000e+00> : vector<128xf32>
    %292 = vector.multi_reduction <add>, %289, %cst_116 [0] : vector<128x128xf32> to vector<128xf32>
    %293 = vector.shape_cast %292 : vector<128xf32> to vector<1x128xf32>
    %cst_117 = arith.constant dense<0.000000e+00> : vector<128xf32>
    %294 = vector.multi_reduction <add>, %285, %cst_117 [0] : vector<128x128xf32> to vector<128xf32>
    %295 = vector.shape_cast %294 : vector<128xf32> to vector<1x128xf32>
    %c0_i32_118 = arith.constant 0 : i32
    %296 = vector.broadcast %c0_i32_118 : i32 to vector<3x128xi32>
    %297 = arith.cmpi eq, %10, %296 : vector<3x128xi32>
    %c1_i32_119 = arith.constant 1 : i32
    %298 = vector.broadcast %c1_i32_119 : i32 to vector<3x128xi32>
    %299 = arith.cmpi eq, %10, %298 : vector<3x128xi32>
    %300 = vector.shape_cast %293 : vector<1x128xf32> to vector<1x128xf32>
    %301 = vector.broadcast %300 : vector<1x128xf32> to vector<3x128xf32>
    %302 = vector.shape_cast %295 : vector<1x128xf32> to vector<1x128xf32>
    %303 = vector.broadcast %302 : vector<1x128xf32> to vector<3x128xf32>
    %304 = arith.select %299, %301, %303 : vector<3x128xi1>, vector<3x128xf32>
    %305 = vector.shape_cast %291 : vector<1x128xf32> to vector<1x128xf32>
    %306 = vector.broadcast %305 : vector<1x128xf32> to vector<3x128xf32>
    %307 = arith.select %297, %306, %304 : vector<3x128xi1>, vector<3x128xf32>
    %cst_120 = arith.constant dense<0.000000e+00> : vector<3xf32>
    %308 = vector.multi_reduction <add>, %307, %cst_120 [1] : vector<3x128xf32> to vector<3xf32>
    %309 = vector.shape_cast %308 : vector<3xf32> to vector<3x1xf32>
    %310 = vector.shape_cast %309 : vector<3x1xf32> to vector<3x1xf32>
    %311 = vector.broadcast %310 : vector<3x1xf32> to vector<3x128xf32>
    %c3_121 = arith.constant 3 : index
    %c0_122 = arith.constant 0 : index
    %c0_123 = arith.constant 0 : index
    %312 = vector.load %arg3[%c3_121, %c0_122, %c0_123] : memref<4x3x128xf32, #tpu.memory_space<vmem>>, vector<1x3x128xf32>
    %313 = vector.shape_cast %312 : vector<1x3x128xf32> to vector<3x128xf32>
    %314 = vector.shape_cast %311 : vector<3x128xf32> to vector<1x3x128xf32>
    tpu.vector_store %arg3[%c3_121, %c0_122, %c0_123], %314 {strides = array<i32>} : memref<4x3x128xf32, #tpu.memory_space<vmem>>, vector<1x3x128xf32>,
    return
  }
  func.func @transform_0(%arg0: i32) -> (i32, i32, i32) {
    %c0_i32 = arith.constant 0 : i32
    %c0_i32_0 = arith.constant 0 : i32
    %c0_i32_1 = arith.constant 0 : i32
    return %arg0, %c0_i32, %c0_i32_0 : i32, i32, i32
  }
  func.func @transform_1(%arg0: i32) -> (i32, i32, i32) {
    %c0_i32 = arith.constant 0 : i32
    %c0_i32_0 = arith.constant 0 : i32
    %c0_i32_1 = arith.constant 0 : i32
    return %arg0, %c0_i32, %c0_i32_0 : i32, i32, i32
  }
  func.func @transform_2(%arg0: i32) -> (i32, i32, i32) {
    %c0_i32 = arith.constant 0 : i32
    %c0_i32_0 = arith.constant 0 : i32
    %c0_i32_1 = arith.constant 0 : i32
    return %arg0, %c0_i32, %c0_i32_0 : i32, i32, i32
  }
}

</mosaic_0001>

<bundles_post_ra>
// kernel: tpu_custom_call.1
= control target key start
LH: loop header
LB: loop body
LE: loop exit
PB: predicated region body
PF: predicated region fallthrough
CT: control target
= control target key end

     0   :  { %7 = vsyncpa [#allocation3], 0  ;;  %s8569_s0 = inlined_call_operand.hbm [shape: f32[8,128,128], index: 0, kind: input, shape index: {}]   ;;  %s8570_s1 = inlined_call_operand.hbm [shape: bf16[8,128,128], index: 1, kind: input, shape index: {}]   ;;  %s8571_s2 = inlined_call_operand.vmem [shape: f32[8,3,128], index: 2, kind: output, shape index: {}]  }
   0x1   :  { %9 = vsyncpa [#allocation3 + $0x1], 0 }
   0x2   :  { %10 = vsyncpa [#allocation5], 0 }
   0x3   :  { %12 = vsyncpa [#allocation5 + $0x1], 0  ;;  %s4681_s9 = smov 0   ;;  %s4683_s10 = smov 0  }
   0x4   :  { %s4685_s11 = smov 0   ;;  %s4687_s12 = smov 0  }
   0x5 LB: > { %s3394_s13 = sadd.s32 4294967295, %s4655_s12   ;;  %s4701_s14 = sadd.s32 1, %s4655_s12   ;;  %s4655_s12 = sphi %s4687_s12, %s9144_s12   ;;  %s4651_s11 = sphi %s4685_s11, %s9143_s11   ;;  %s4647_s10 = sphi %s4683_s10, %s9142_s10   ;;  %s4643_s9 = sphi %s4681_s9, %s9141_s9  }
   0x6   : > { %s22_s15 = ssub.s32 %s4655_s12, %s4701_s14  ;;  %s25_s16 = sadd.s32 1, %s4651_s11 }
   0x7   : > { %p23_p0 = scmp.eq.s32.totalorder %s22_s15, 0  ;;  %p32_p1 = scmp.ne.s32.totalorder %s4651_s11, %s4647_s10 }
   0x8   : > { %p33_p2 = scmp.eq.s32.totalorder %s4655_s12, 0  ;;  %p38_p3 = scmp.ne.s32.totalorder %s4647_s10, %s4643_s9 }
   0x9   : > { %s4711_s17 = scalar_select %p23_p0, %s4651_s11, %s25_s16  }
   0xa   : > { %p34_p4 = por %p33_p2, %p32_p1  ;;  %p39_p5 = scmp.eq.s32.totalorder %s3394_s13, 0 }
   0xb   : > { %p3686_p6 = scmp.lt.s32.totalorder %s4655_s12, 2  ;;  %s4721_s19 = sand.u32 1, %s4651_s11  }
   0xc   : > { %p4716_p7 = por %p39_p5, %p38_p3  ;;  %s3398_s20 = sshll.u32 %s4721_s19, 9 }
   0xd   : > { %s3513_s21 = sshll.u32 %s4655_s12, 13  ;;  %s118_s25 = scalar_lea.vmem [#allocation2], %s3398_s20 }
   0xe   : > { %s8721_s18 = scalar_select %p4716_p7, 1, 0 }
   0xf   : > { %s4728_s24 = scalar_lea.hbm %s8569_s0, %s3513_s21  ;;  %s126_s26 = sshll.u32 %s118_s25, 4  ;;  %s4730_s26 = int_to_ptr.vmem [resolvable:$true] %s126_s26 }
  0x10   : > { %p4732_p8 = pnand %p3686_p6, %p34_p4  ;;  %s115_s28 = scalar_lea.sflag [#allocation3], %s4721_s19 }
  0x11   : > { %s4561_s29 = scalar_lea.hbm %s4728_s24, 8192  ;;  %s4566_s4 = scalar_lea.hbm %s8569_s0, 16384 }
  0x12   : > { %p4562_p10 = scmp.ne.s32.totalorder %s4728_s24, %s4561_s29  ;;  %p4563_p11 = pneg %p4732_p8 }
  0x13   : > { %p4567_p0 = scmp.lt.s32.totalorder %s4728_s24, %s8569_s0  ;;  %p4568_p1 = scmp.lt.s32.totalorder %s4566_s4, %s4561_s29 }
  0x14   : > { %p4564_p12 = pnand %p4563_p11, %p4562_p10 }
  0x15   : > { %p4569_p2 = por %p4568_p1, %p4567_p0 }
  0x16   : > { %p4565_p13 = pneg %p4564_p12 }
  0x18   : > { %p4570_p3 = pnand %p4569_p2, %p4565_p13 }
  0x1a   : > { %4573 = shalt.err (!%p4570_p3)
}
  0x1b   : > { %s4574_s7 = scalar_lea.vmem %s4730_s26, 8192  ;;  %s4657_s8 = smov [#allocation2]  }
  0x1c   : > { %p4575_p4 = scmp.ne.s32.totalorder %s4730_s26, %s4574_s7  ;;  %s4579_s9 = sshll.u32 %s4657_s8, 4  ;;  %s4580_s9 = int_to_ptr.vmem [resolvable:$false] %s4579_s9 }
  0x1d   : > { %s4581_s15 = scalar_lea.vmem %s4580_s9, 16384  ;;  %p4582_p10 = scmp.lt.s32.totalorder %s4730_s26, %s4580_s9 }
  0x1e   : > { %p4577_p5 = pnand %p4575_p4, %p4563_p11  ;;  %p4583_p12 = scmp.lt.s32.totalorder %s4581_s15, %s4574_s7 }
  0x20   : > { %p4578_p6 = pneg %p4577_p5  ;;  %p4584_p9 = por %p4583_p12, %p4582_p10 }
  0x22   : > { %p4585_p0 = pnand %p4584_p9, %p4578_p6 }
  0x24   : > { %4588 = shalt.err (!%p4585_p0)
}
  0x25   : > { %s4658_s16 = smov 128   ;;  %s4659_s20 = smov 8  }
  0x26   : > { %3682 = dma.hbm_to_vmem [thread:$0]  (!%p4732_p8), %s4728_s24, 8192, %s4730_s26, %s115_s28, %s4658_s16, %s4658_s16, %s4659_s20  }
  0x27   : > { %p156_p13 = scmp.lt.s32.totalorder %s4655_s12, 3  ;;  %s3402_s21 = sshll.u32 %s4721_s19, 8 }
  0x28   : > { %s3515_s22 = sshll.u32 %s4655_s12, 12  ;;  %p8723_p9 = scmp.ge.s32.totalorder %s4655_s12, 1 }
  0x29   : > { %s4776_s30 = scalar_lea.hbm %s8570_s1, %s3515_s22  ;;  %s140_s3 = scalar_lea.vmem [#allocation4], %s3402_s21 }
  0x2a   : > { %p4769_p1 = pnand %p8723_p9, %p156_p13  ;;  %s148_s4 = sshll.u32 %s140_s3, 4  ;;  %s4778_s4 = int_to_ptr.vmem [resolvable:$true] %s148_s4 }
  0x2b   : > { %s137_s24 = scalar_lea.sflag [#allocation5], %s4721_s19  ;;  %s4589_s26 = scalar_lea.hbm %s4776_s30, 4096 }
  0x2c   : > { %p4590_p2 = scmp.ne.s32.totalorder %s4776_s30, %s4589_s26  ;;  %s4594_s6 = scalar_lea.hbm %s8570_s1, 8192 }
  0x2d   : > { %p4595_p5 = scmp.lt.s32.totalorder %s4776_s30, %s8570_s1  ;;  %p4596_p6 = scmp.lt.s32.totalorder %s4594_s6, %s4589_s26 }
  0x2e   : > { %p4592_p3 = pnand %p4590_p2, %p4563_p11 }
  0x2f   : > { %p4597_p10 = por %p4596_p6, %p4595_p5 }
  0x30   : > { %p4593_p4 = pneg %p4592_p3 }
  0x32   : > { %p4598_p12 = pnand %p4597_p10, %p4593_p4 }
  0x34   : > { %4601 = shalt.err (!%p4598_p12)
}
  0x35   : > { %s4602_s9 = scalar_lea.vmem %s4778_s4, 4096  ;;  %s4660_s15 = smov [#allocation4]  }
  0x36   : > { %p4603_p0 = scmp.ne.s32.totalorder %s4778_s4, %s4602_s9  ;;  %s4607_s16 = sshll.u32 %s4660_s15, 4  ;;  %s4608_s16 = int_to_ptr.vmem [resolvable:$false] %s4607_s16 }
  0x37   : > { %s4609_s20 = scalar_lea.vmem %s4608_s16, 8192  ;;  %p4610_p2 = scmp.lt.s32.totalorder %s4778_s4, %s4608_s16 }
  0x38   : > { %p4605_p13 = pnand %p4603_p0, %p4563_p11  ;;  %p4611_p3 = scmp.lt.s32.totalorder %s4609_s20, %s4602_s9 }
  0x3a   : > { %p4606_p9 = pneg %p4605_p13  ;;  %p4612_p7 = por %p4611_p3, %p4610_p2 }
  0x3c   : > { %p4613_p5 = pnand %p4612_p7, %p4606_p9 }
  0x3e   : > { %4616 = shalt.err (!%p4613_p5)
}
  0x3f   : > { %s4661_s21 = smov 64   ;;  %s4662_s22 = smov 4  }
  0x40   : > { %3685 = dma.hbm_to_vmem [thread:$0]  (!%p4732_p8), %s4776_s30, 4096, %s4778_s4, %s137_s24, %s4661_s21, %s4661_s21, %s4662_s22  }
  0x41   : > { %160 = sbr.rel (%p4769_p1) target bundleno = 923 (0x39b), region = 28 }
  0x46   : > { %s162_s25 = sand.u32 1, %s4647_s10   ;;  %p8725_p7 = scmp.ne.s32.totalorder %s8721_s18, 0 }
  0x47   : > { %s3407_s29 = sshll.u32 %s162_s25, 9  ;;  %s163_s3 = scalar_lea.sflag [#allocation3], %s162_s25 }
  0x48   : > { %s4808_s26 = scalar_lea.vmem [#allocation2], %s3407_s29 }
  0x49   : > { %4634 = dma.done.wait (%p8725_p7), %s163_s3, 8192  }
  0x4a   : > { %4636 = vsyncadd (%p8725_p7), %s163_s3, 4294959104  ;;  %s3408_s28 = sshll.u32 %s162_s25, 8  ;;  %s172_s27 = scalar_lea.sflag [#allocation5], %s162_s25 }
  0x4b   : > { %s4814_s19 = scalar_lea.vmem [#allocation4], %s3408_s28 }
  0x4c   : > { %4638 = dma.done.wait (%p8725_p7), %s172_s27, 4096  }
  0x4d   : > { %4640 = vsyncadd (%p8725_p7), %s172_s27, 4294963200  ;;  %v4821_v0 = vld [vmem:[%s4814_s19 + $0x10] sm:$0xff]   ;;  %v4824_v1 = vld [vmem:[%s4808_s26 + $0x20] sm:$0xff]  ;;  %v8579_v11 = vmov 0.0   ;;  %s4664_s18 = smov 1   ;;  %s4665_s23 = smov 127  }
  0x4e   : > { %v4827_v2 = vld [vmem:[%s4808_s26 + $0x28] sm:$0xff]  ;;  %v8584_v3 = vunpack.c.l.bf16 %v4821_v0  ;;  %v8583_v4 = vunpack.c.h.bf16 %v4821_v0  ;;  %v314_v5 = vand.u32 2147483647, %v4824_v1  ;;  %v4834_v7 = vld [vmem:[%s4814_s19] sm:$0xff]   ;;  %v4870_v24 = vld [vmem:[%s4814_s19 + $0x18] sm:$0xff]   ;;  %vm554_vm12 = vcmp.ge.f32.partialorder %v4824_v1, 0.0 }
  0x4f   : > { %v315_v6 = vand.u32 2147483647, %v4827_v2  ;;  %v4841_v10 = vld [vmem:[%s4808_s26] sm:$0xff]  ;;  %v4850_v14 = vld [vmem:[%s4808_s26 + $0x8] sm:$0xff]  ;;  %v3518_v18 = vunpack.c.l.bf16 %v4834_v7  ;;  %v3519_v19 = vunpack.c.h.bf16 %v4834_v7  ;;  %v4876_v27 = vld [vmem:[%s4808_s26 + $0x30] sm:$0xff]  ;;  %v8582_v32 = vunpack.c.l.bf16 %v4870_v24  ;;  %s3409_s30 = sshll.u32 %s3394_s13, 2 }
  0x50   : > { %vm602_vm0 = vcmp.gt.f32.partialorder %v8584_v3, 0.5  ;;  %vm603_vm1 = vcmp.gt.f32.partialorder %v8583_v4, 0.5  ;;  %v330_v8 = vsub.f32 0.0, %v314_v5  ;;  %v310_v20 = vand.u32 2147483647, %v4841_v10  ;;  %v4883_v30 = vld [vmem:[%s4808_s26 + $0x38] sm:$0xff] }
  0x51   : > { %v331_v9 = vsub.f32 0.0, %v315_v6  ;;  %v4844_v12 = vsel %vm602_vm0, 1.0, %v8579_v11  ;;  %v4847_v13 = vsel %vm603_vm1, 1.0, %v8579_v11  ;;  %vm598_vm2 = vcmp.gt.f32.partialorder %v3518_v18, 0.5  ;;  %v4899_v38 = vld [vmem:[%s4814_s19 + $0x8] sm:$0xff]   ;;  %v4905_v41 = vld [vmem:[%s4808_s26 + $0x10] sm:$0xff] }
  0x52   : > { %8726 = vst [vmem:[#allocation8_spill] sm:$0xff] %v4844_v12  ;;  %8727 = vst [vmem:[#allocation9_spill] sm:$0xff] %v4847_v13  ;;  %v4854_v15 = vpack.i.bf16 %v4847_v13, %v4844_v12  ;;  %v350_v16 = vmul.f32 1.442695, %v330_v8  ;;  %v311_v21 = vand.u32 2147483647, %v4850_v14  ;;  %v8581_v33 = vunpack.c.h.bf16 %v4870_v24 }
  0x53   : > { %v352_v17 = vmul.f32 1.442695, %v331_v9  ;;  %vm599_vm3 = vcmp.gt.f32.partialorder %v3519_v19, 0.5  ;;  %v4867_v22 = vsel %vm598_vm2, 1.0, %v8579_v11  ;;  %v326_v23 = vsub.f32 0.0, %v310_v20  ;;  %v4912_v44 = vld [vmem:[%s4808_s26 + $0x18] sm:$0xff] }
  0x54   : > { %8728 = vst [vmem:[#allocation10_spill] sm:$0xff] %v4854_v15  ;;  %3737 = vrot.lane.b32.xlu1 %v4854_v15, %s4664_s18  ;;  %4046 = vpow2.f32 %v350_v16  ;;  %8729 = vst [vmem:[#allocation11_spill] sm:$0xff] %v4867_v22  ;;  %v4873_v25 = vsel %vm599_vm3, 1.0, %v8579_v11  ;;  %v327_v26 = vsub.f32 0.0, %v311_v21  ;;  %v316_v34 = vand.u32 2147483647, %v4876_v27 }
  0x55   : > { %4048 = vpow2.f32 %v352_v17  ;;  %8730 = vst [vmem:[#allocation12_spill] sm:$0xff] %v4873_v25  ;;  %v4880_v28 = vpack.i.bf16 %v4873_v25, %v4867_v22  ;;  %v342_v29 = vmul.f32 1.442695, %v326_v23  ;;  %vm604_vm4 = vcmp.gt.f32.partialorder %v8582_v32, 0.5  ;;  %v4938_v56 = vld [vmem:[%s4814_s19 + $0x28] sm:$0xff]   ;;  %v4948_v59 = vld [vmem:[%s4808_s26 + $0x50] sm:$0xff] }
  0x56   : > { %v344_v31 = vmul.f32 1.442695, %v327_v26  ;;  %v317_v35 = vand.u32 2147483647, %v4883_v30  ;;  %vm605_vm5 = vcmp.gt.f32.partialorder %v8581_v33, 0.5  ;;  %v4896_v36 = vsel %vm604_vm4, 1.0, %v8579_v11 }
  0x57   : > { %8731 = vst [vmem:[#allocation13_spill] sm:$0xff] %v4880_v28  ;;  %3727 = vrot.lane.b32.xlu0 %v4880_v28, %s4664_s18  ;;  %4050 = vpow2.f32 %v342_v29  ;;  %8732 = vst [vmem:[#allocation14_spill] sm:$0xff] %v4896_v36  ;;  %v332_v37 = vsub.f32 0.0, %v316_v34  ;;  %v4902_v39 = vsel %vm605_vm5, 1.0, %v8579_v11  ;;  %v8578_v46 = vunpack.c.l.bf16 %v4899_v38  ;;  %v4969_v16 = vld [vmem:[%s4808_s26 + $0x58] sm:$0xff]  ;;  %p204_p8 = scmp.lt.s32.totalorder %s3409_s30, 7 }
  0x58   : > { %4052 = vpow2.f32 %v344_v31  ;;  %8733 = vst [vmem:[#allocation15_spill] sm:$0xff] %v4902_v39  ;;  %v333_v40 = vsub.f32 0.0, %v317_v35  ;;  %v4909_v42 = vpack.i.bf16 %v4902_v39, %v4896_v36  ;;  %v8577_v47 = vunpack.c.h.bf16 %v4899_v38  ;;  %8737 = vst [vmem:[#allocation19_spill] sm:$0xff] %v4969_v16  ;;  %v4988_v31 = vld [vmem:[%s4814_s19 + $0x20] sm:$0xff]  }
  0x59   : > { %v354_v43 = vmul.f32 1.442695, %v332_v37  ;;  %v312_v48 = vand.u32 2147483647, %v4905_v41  ;;  %vm600_vm6 = vcmp.gt.f32.partialorder %v8578_v46, 0.5  ;;  %v8574_v62 = vunpack.c.l.bf16 %v4938_v56  ;;  %v4993_v35 = vld [vmem:[%s4808_s26 + $0x40] sm:$0xff] }
  0x5a   : > { %8734 = vst [vmem:[#allocation16_spill] sm:$0xff] %v4909_v42  ;;  %v356_v45 = vmul.f32 1.442695, %v333_v40  ;;  %3742 = vrot.lane.b32.xlu1 %v4909_v42, %s4664_s18  ;;  %v313_v49 = vand.u32 2147483647, %v4912_v44  ;;  %vm601_vm7 = vcmp.gt.f32.partialorder %v8577_v47, 0.5  ;;  %v8573_v63 = vunpack.c.h.bf16 %v4938_v56 }
  0x5b   : > { %4054 = vpow2.f32 %v354_v43  ;;  %v4927_v51 = vsel %vm600_vm6, 1.0, %v8579_v11  ;;  %v328_v52 = vsub.f32 0.0, %v312_v48  ;;  %v4935_v55 = vsel %vm601_vm7, 1.0, %v8579_v11  ;;  %v4996_v37 = vld [vmem:[%s4808_s26 + $0x48] sm:$0xff]  ;;  %s9146_s30 = smov (!%p204_p8, %s3409_s30), 7 }
  0x5c   : > { %4056 = vpow2.f32 %v356_v45  ;;  %8735 = vst [vmem:[#allocation17_spill] sm:$0xff] %v4927_v51  ;;  %8736 = vst [vmem:[#allocation18_spill] sm:$0xff] %v4935_v55  ;;  %v4945_v58 = vpack.i.bf16 %v4935_v55, %v4927_v51  ;;  %v329_v61 = vsub.f32 0.0, %v313_v49  ;;  %v320_v6 = vand.u32 2147483647, %v4948_v59  ;;  %s3410_s4 = sshll.u32 %s9146_s30, 2 }
  0x5d   : > { %v346_v60 = vmul.f32 1.442695, %v328_v52  ;;  %vm608_vm8 = vcmp.gt.f32.partialorder %v8574_v62, 0.5  ;;  %vm609_vm9 = vcmp.gt.f32.partialorder %v8573_v63, 0.5  ;;  %v321_v29 = vand.u32 2147483647, %v4969_v16  ;;  %s207_s6 = scalar_lea.vmem %s8571_s2, %s3410_s4 }
  0x5e   : > { %3732 = vrot.lane.b32.xlu0 %v4945_v58, %s4664_s18  ;;  %v4975_v20 = vsel %vm608_vm8, 1.0, %v8579_v11  ;;  %v4978_v21 = vsel %vm609_vm9, 1.0, %v8579_v11  ;;  %v348_v23 = vmul.f32 1.442695, %v329_v61  ;;  %v336_v34 = vsub.f32 0.0, %v320_v6 }
  0x5f   : > { %8738 = vst [vmem:[#allocation20_spill] sm:$0xff] %v4975_v20  ;;  %8739 = vst [vmem:[#allocation21_spill] sm:$0xff] %v4978_v21  ;;  %v4983_v26 = vpack.i.bf16 %v4978_v21, %v4975_v20  ;;  %v390_v40 = vmax.f32 %v4841_v10, 0.0  ;;  %v406_v45 = vmul.f32 %v3518_v18, %v4841_v10  ;;  %v8575_v48 = vunpack.c.l.bf16 %v4988_v31 }
  0x60   : > { %v8576_v49 = vunpack.c.h.bf16 %v4988_v31  ;;  %v318_v61 = vand.u32 2147483647, %v4993_v35  ;;  %v319_v6 = vand.u32 2147483647, %v4996_v37  ;;  %v362_v63 = vmul.f32 1.442695, %v336_v34 }
  0x61   : > { %v4922_v50 = vpop.eup %4046  ;;  %8740 = vst [vmem:[#allocation22_spill] sm:$0xff] %v4983_v26  ;;  %3752 = vrot.lane.b32.xlu1 %v4983_v26, %s4664_s18  ;;  %vm606_vm10 = vcmp.gt.f32.partialorder %v8575_v48, 0.5  ;;  %v391_v47 = vmax.f32 %v4850_v14, 0.0  ;;  %v407_v46 = vmul.f32 %v3519_v19, %v4850_v14  ;;  %v394_v4 = vmax.f32 %v4824_v1, 0.0 }
  0x62   : > { %v4929_v53 = vpop.eup %4048  ;;  %v4932_v54 = vadd.f32 1.0, %v4922_v50  ;;  %vm607_vm11 = vcmp.gt.f32.partialorder %v8576_v49, 0.5  ;;  %v334_v62 = vsub.f32 0.0, %v318_v61  ;;  %v335_v49 = vsub.f32 0.0, %v319_v6 }
  0x63   : > { %v4941_v57 = vadd.f32 1.0, %v4929_v53  ;;  %v422_v7 = vsub.f32 %v390_v40, %v406_v45  ;;  %v8744_v20 = vunpack.c.l.bf16 %v4821_v0  ;;  %v8745_v40 = vunpack.c.h.bf16 %v4821_v0 }
  0x64   : > { %v4954_v5 = vpop.eup %4050  ;;  %4058 = vrcp.f32 %v4932_v54  ;;  %v358_v33 = vmul.f32 1.442695, %v334_v62  ;;  %v360_v19 = vmul.f32 1.442695, %v335_v49  ;;  %v397_v13 = vmax.f32 %v4883_v30, 0.0 }
  0x65   : > { %v4958_v8 = vpop.eup %4052  ;;  %4060 = vrcp.f32 %v4941_v57  ;;  %v4962_v9 = vadd.f32 1.0, %v4954_v5  ;;  %v410_v21 = vmul.f32 %v8744_v20, %v4824_v1  ;;  %v411_v45 = vmul.f32 %v8745_v40, %v4827_v2  ;;  %v5074_v40 = vld [vmem:[%s4814_s19 + $0x38] sm:$0xff]  }
  0x66   : > { %v4972_v17 = vadd.f32 1.0, %v4958_v8  ;;  %4062 = vpow2.f32 %v346_v60  ;;  %v337_v60 = vsub.f32 0.0, %v321_v29  ;;  %v5023_v29 = vsel %vm607_vm11, 1.0, %v8579_v11  ;;  %8748 = vst [vmem:[#allocation26_spill] sm:$0xff] %v5074_v40 }
  0x67   : > { %4064 = vlog2.f32 %v4962_v9  ;;  %8742 = vst [vmem:[#allocation24_spill] sm:$0xff] %v5023_v29  ;;  %v8746_v0 = vunpack.c.l.bf16 %v4870_v24  ;;  %vm555_vm13 = vcmp.ge.f32.partialorder %v4827_v2, 0.0  ;;  %v400_v25 = vmax.f32 %v4948_v59, 0.0 }
  0x68   : > { %4066 = vlog2.f32 %v4972_v17  ;;  %v4999_v43 = vpop.eup %4054  ;;  %v401_v22 = vmax.f32 %v4969_v16, 0.0  ;;  %v8604_v26 = vunpack.c.h.bf16 %v5074_v40  ;;  %vm550_vm0 = vcmp.ge.f32.partialorder %v4841_v10, 0.0 }
  0x69   : > { %4068 = vpow2.f32 %v348_v23  ;;  %v5006_v52 = vpop.eup %4056  ;;  %v5017_v18 = vadd.f32 1.0, %v4999_v43  ;;  %v5020_v23 = vsel %vm606_vm10, 1.0, %v8579_v11  ;;  %v364_v11 = vmul.f32 1.442695, %v337_v60 }
  0x6a   : > { %4070 = vlog2.f32 %v4932_v54  ;;  %8741 = vst [vmem:[#allocation23_spill] sm:$0xff] %v5020_v23  ;;  %v5027_v34 = vadd.f32 1.0, %v5006_v52  ;;  %v5031_v48 = vpack.i.bf16 %v5023_v29, %v5020_v23  ;;  %v423_v23 = vsub.f32 %v391_v47, %v407_v46 }
  0x6b   : > { %4072 = vlog2.f32 %v4941_v57  ;;  %v396_v46 = vmax.f32 %v4876_v27, 0.0  ;;  %vm613_vm15 = vcmp.gt.f32.partialorder %v8604_v26, 0.5  ;;  %vm551_vm1 = vcmp.ge.f32.partialorder %v4850_v14, 0.0 }
  0x6c   : > { %4074 = vrcp.f32 %v4962_v9  ;;  %8743 = vst [vmem:[#allocation25_spill] sm:$0xff] %v5031_v48  ;;  %3747 = vrot.lane.b32.xlu0 %v5031_v48, %s4664_s18  ;;  %vm556_vm2 = vcmp.ge.f32.partialorder %v4876_v27, 0.0  ;;  %vm557_vm3 = vcmp.ge.f32.partialorder %v4883_v30, 0.0  ;;  %vm552_vm4 = vcmp.ge.f32.partialorder %v4905_v41, 0.0 }
  0x6d   : > { %4076 = vrcp.f32 %v4972_v17  ;;  %vm553_vm7 = vcmp.ge.f32.partialorder %v4912_v44, 0.0  ;;  %vm560_vm8 = vcmp.ge.f32.partialorder %v4948_v59, 0.0 }
  0x6e   : > { %4078 = vpow2.f32 %v362_v63  ;;  %v395_v63 = vmax.f32 %v4827_v2, 0.0 }
  0x6f   : > { %4080 = vrcp.f32 %v5017_v18 }
  0x70   : > { %4082 = vrcp.f32 %v5027_v34  ;;  %v5103_v51 = vsub.f32 %v395_v63, %v411_v45 }
  0x71   : > { %v4059_v61 = vpop.eup %4058  ;;  %4084 = vpow2.f32 %v364_v11 }
  0x72   : > { %v4061_v32 = vpop.eup %4060  ;;  %v506_v3 = vmul.f32 %v4059_v61, %v4932_v54  ;;  %4086 = vpow2.f32 %v358_v33 }
  0x73   : > { %v5042_v6 = vpop.eup %4062  ;;  %v507_v12 = vmul.f32 %v4061_v32, %v4941_v57  ;;  %v412_v57 = vmul.f32 %v8746_v0, %v4876_v27  ;;  %v8749_v0 = vunpack.c.l.bf16 %v4899_v38 }
  0x74   : > { %v4065_v60 = vpop.eup %4064  ;;  %v5048_v29 = vadd.f32 1.0, %v5042_v6  ;;  %v522_v11 = vsub.f32 2.0, %v506_v3 }
  0x75   : > { %v4067_v62 = vpop.eup %4066  ;;  %v439_v54 = vmul.f32 0.6931472, %v4065_v60  ;;  %v8747_v60 = vunpack.c.h.bf16 %v4870_v24  ;;  %v5108_v28 = vsub.f32 %v396_v46, %v412_v57  ;;  %v8754_v57 = vunpack.c.l.bf16 %v5074_v40 }
  0x76   : > { %v441_v49 = vmul.f32 0.6931472, %v4067_v62  ;;  %4088 = vlog2.f32 %v5048_v29  ;;  %v5060_v20 = vpop.eup %4068  ;;  %v538_v39 = vmul.f32 %v4059_v61, %v522_v11 }
  0x77   : > { %v470_v47 = vadd.f32 %v439_v54, %v422_v7  ;;  %4090 = vpow2.f32 %v360_v19  ;;  %v413_v62 = vmul.f32 %v8747_v60, %v4883_v30  ;;  %v4071_v3 = vpop.eup %4070  ;;  %v523_v7 = vsub.f32 2.0, %v507_v12 }
  0x78   : > { %v471_v33 = vadd.f32 %v441_v49, %v423_v23  ;;  %4092 = vlog2.f32 %v5017_v18  ;;  %v392_v54 = vmax.f32 %v4905_v41, 0.0  ;;  %v393_v19 = vmax.f32 %v4912_v44, 0.0  ;;  %v4073_v23 = vpop.eup %4072 }
  0x79   : > { %4094 = vrcp.f32 %v5048_v29  ;;  %v5080_v24 = vadd.f32 1.0, %v5060_v20  ;;  %v408_v12 = vmul.f32 %v8749_v0, %v4905_v41  ;;  %v8750_v60 = vunpack.c.h.bf16 %v4899_v38 }
  0x7a   : > { %v5077_v49 = vadd.f32 %v471_v33, %v470_v47  ;;  %4096 = vlog2.f32 %v5027_v34  ;;  %v5091_v47 = vpop.eup %4074  ;;  %v8751_v33 = vunpack.c.l.bf16 %v4938_v56  ;;  %v8752_v0 = vunpack.c.h.bf16 %v4938_v56 }
  0x7b   : > { %v409_v36 = vmul.f32 %v8750_v60, %v4912_v44  ;;  %4098 = vlog2.f32 %v5080_v24  ;;  %v5101_v11 = vpop.eup %4076  ;;  %v426_v60 = vsub.f32 %v394_v4, %v410_v21  ;;  %v539_v48 = vmul.f32 %v4061_v32, %v523_v7  ;;  %v5286_v44 = vld [vmem:[%s4814_s19 + $0x40] sm:$0xff]  }
  0x7c   : > { %v416_v55 = vmul.f32 %v8751_v33, %v4948_v59  ;;  %v417_v38 = vmul.f32 %v8752_v0, %v4969_v16  ;;  %v5106_v15 = vpop.eup %4078  ;;  %v447_v42 = vmul.f32 0.6931472, %v4071_v3  ;;  %v5110_v33 = vsub.f32 %v397_v13, %v413_v62 }
  0x7d   : > { %v424_v56 = vsub.f32 %v392_v54, %v408_v12  ;;  %v5112_v0 = vpop.eup %4080  ;;  %v570_v61 = vmul.f32 %v4922_v50, %v538_v39  ;;  %v5115_v16 = vsub.f32 %v393_v19, %v409_v36  ;;  %v398_v4 = vmax.f32 %v4993_v35, 0.0  ;;  %v5132_v36 = vld [vmem:[%s4808_s26 + $0x70] sm:$0xff] }
  0x7e   : > { %v8753_v32 = vunpack.c.l.bf16 %v4988_v31  ;;  %v5121_v63 = vpop.eup %4082  ;;  %v502_v45 = vmul.f32 %v5091_v47, %v4962_v9  ;;  %v5125_v13 = vsub.f32 %v400_v25, %v416_v55  ;;  %v5127_v46 = vsub.f32 %v401_v22, %v417_v38  ;;  %8755 = vst [vmem:[#allocation27_spill] sm:$0xff] %v5132_v36 }
  0x7f   : > { %vm612_vm14 = vcmp.gt.f32.partialorder %v8754_v57, 0.5  ;;  %v5134_v50 = vpop.eup %4084  ;;  %v571_v62 = vmul.f32 %v4929_v53, %v539_v48  ;;  %v503_v3 = vmul.f32 %v5101_v11, %v4972_v17  ;;  %v449_v22 = vmul.f32 0.6931472, %v4073_v23 }
  0x80   : > { %v414_v21 = vmul.f32 %v8753_v32, %v4993_v35  ;;  %v5142_v25 = vpop.eup %4086  ;;  %v5144_v55 = vadd.f32 %v447_v42, %v426_v60  ;;  %4100 = vrcp.f32 %v5080_v24  ;;  %v8756_v9 = vunpack.c.h.bf16 %v4988_v31 }
  0x81   : > { %v586_v17 = vsel %vm554_vm12, %v538_v39, %v570_v61  ;;  %v8757_v12 = vmov 0.0   ;;  %v324_v23 = vand.u32 2147483647, %v5132_v36  ;;  %v518_v60 = vsub.f32 2.0, %v502_v45  ;;  %v5177_v45 = vld [vmem:[%s4808_s26 + $0x78] sm:$0xff] }
  0x82   : > { %v415_v54 = vmul.f32 %v8756_v9, %v4996_v37  ;;  %v5152_v19 = vsub.f32 %v398_v4, %v414_v21  ;;  %v5155_v38 = vsel %vm612_vm14, 1.0, %v8757_v12  ;;  %v5161_v57 = vadd.f32 1.0, %v5106_v15  ;;  %8761 = vst [vmem:[#allocation31_spill] sm:$0xff] %v5177_v45 }
  0x83   : > { %v4089_v53 = vpop.eup %4088  ;;  %8758 = vst [vmem:[#allocation28_spill] sm:$0xff] %v5155_v38  ;;  %v5164_v31 = vsel %vm613_vm15, 1.0, %v8757_v12  ;;  %v587_v39 = vsel %vm555_vm13, %v539_v48, %v571_v62  ;;  %v519_v61 = vsub.f32 2.0, %v503_v3  ;;  %v5170_v4 = vadd.f32 1.0, %v5134_v50 }
  0x84   : > { %v5158_v42 = vpop.eup %4090  ;;  %v443_v32 = vmul.f32 0.6931472, %v4089_v53  ;;  %8760 = vst [vmem:[#allocation30_spill] sm:$0xff] %v5164_v31  ;;  %v5174_v21 = vpack.i.bf16 %v5164_v31, %v5155_v38  ;;  %v892_v53 = vmul.f32 10.0, %v586_v17  ;;  %4102 = vlog2.f32 %v5161_v57 }
  0x85   : > { %8759 = vst [vmem:[#allocation29_spill] sm:$0xff] %v5158_v42  ;;  %v4093_v1 = vpop.eup %4092  ;;  %v5182_v2 = vadd.f32 1.0, %v5142_v25  ;;  %v508_v48 = vmul.f32 %v5112_v0, %v5017_v18  ;;  %v509_v62 = vmul.f32 %v5121_v63, %v5027_v34  ;;  %4104 = vlog2.f32 %v5170_v4 }
  0x86   : > { %v4095_v9 = vpop.eup %4094  ;;  %v472_v26 = vadd.f32 %v443_v32, %v424_v56  ;;  %v5190_v3 = vadd.f32 1.0, %v5158_v42  ;;  %3762 = vrot.lane.b32.xlu1 %v5174_v21, %s4664_s18  ;;  %v534_v17 = vmul.f32 %v5091_v47, %v518_v60  ;;  %v325_v18 = vand.u32 2147483647, %v5177_v45 }
  0x87   : > { %v4097_v56 = vpop.eup %4096  ;;  %4106 = vlog2.f32 %v5182_v2  ;;  %v535_v34 = vmul.f32 %v5101_v11, %v519_v61  ;;  %v451_v38 = vmul.f32 0.6931472, %v4093_v1  ;;  %v504_v31 = vmul.f32 %v4095_v9, %v5048_v29  ;;  %v5207_v1 = vld [vmem:[%s4814_s19 + $0x30] sm:$0xff]  }
  0x88   : > { %v953_v32 = vadd.f32 %v5077_v49, %v472_v26  ;;  %v4099_v7 = vpop.eup %4098  ;;  %4108 = vlog2.f32 %v5190_v3  ;;  %v893_v40 = vmul.f32 10.0, %v587_v39  ;;  %v340_v47 = vsub.f32 0.0, %v324_v23 }
  0x89   : > { %v445_v36 = vmul.f32 0.6931472, %v4099_v7  ;;  %4110 = vrcp.f32 %v5161_v57  ;;  %v475_v26 = vadd.f32 %v449_v22, %v5103_v51  ;;  %v453_v49 = vmul.f32 0.6931472, %v4097_v56 }
  0x8a   : > { %v524_v60 = vsub.f32 2.0, %v508_v48  ;;  %v525_v42 = vsub.f32 2.0, %v509_v62  ;;  %v566_v45 = vmul.f32 %v4954_v5, %v534_v17  ;;  %4112 = vrcp.f32 %v5170_v4  ;;  %3772 = vrot.lane.b32.xlu1 %v4945_v58, %s4665_s23 }
  0x8b   : > { %v473_v11 = vadd.f32 %v445_v36, %v5115_v16  ;;  %v341_v29 = vsub.f32 0.0, %v325_v18  ;;  %v5209_v39 = vmul.f32 1.442695, %v892_v53  ;;  %v567_v7 = vmul.f32 %v4958_v8, %v535_v34  ;;  %v5221_v53 = vld [vmem:[%s4808_s26 + $0x60] sm:$0xff] }
  0x8c   : > { %v520_v51 = vsub.f32 2.0, %v504_v31  ;;  %v8762_v22 = vmax.f32 %v4996_v37, 0.0  ;;  %v5216_v23 = vmul.f32 1.442695, %v893_v40  ;;  %v476_v16 = vadd.f32 %v451_v38, %v5108_v28 }
  0x8d   : > { %v954_v36 = vadd.f32 %v953_v32, %v473_v11  ;;  %v370_v61 = vmul.f32 1.442695, %v340_v47  ;;  %v4101_v8 = vpop.eup %4100  ;;  %v477_v48 = vadd.f32 %v453_v49, %v5110_v33  ;;  %v540_v62 = vmul.f32 %v5112_v0, %v524_v60  ;;  %v5236_v33 = vld [vmem:[%s4808_s26 + $0x68] sm:$0xff] }
  0x8e   : > { %v431_v5 = vsub.f32 %v8762_v22, %v415_v54  ;;  %v541_v31 = vmul.f32 %v5121_v63, %v525_v42  ;;  %v3542_v54 = vunpack.c.l.bf16 %v5207_v1  ;;  %v582_v40 = vsel %vm550_vm0, %v534_v17, %v566_v45 }
  0x8f   : > { %v955_v28 = vadd.f32 %v954_v36, %v5144_v55  ;;  %v372_v38 = vmul.f32 1.442695, %v341_v29  ;;  %v8615_v56 = vunpack.c.h.bf16 %v5207_v1  ;;  %v583_v32 = vsel %vm551_vm1, %v535_v34, %v567_v7 }
  0x90   : > { %v536_v18 = vmul.f32 %v4095_v9, %v520_v51  ;;  %vm610_vm5 = vcmp.gt.f32.partialorder %v3542_v54, 0.5  ;;  %v322_v0 = vand.u32 2147483647, %v5221_v53  ;;  %v505_v63 = vmul.f32 %v4101_v8, %v5080_v24 }
  0x91   : > { %v956_v10 = vadd.f32 %v955_v28, %v475_v26  ;;  %4114 = vpow2.f32 %v370_v61  ;;  %vm611_vm6 = vcmp.gt.f32.partialorder %v8615_v56, 0.5  ;;  %v4103_v55 = vpop.eup %4102  ;;  %v572_v42 = vmul.f32 %v4999_v43, %v540_v62 }
  0x92   : > { %v573_v14 = vmul.f32 %v5006_v52, %v541_v31  ;;  %v5245_v45 = vsel %vm610_vm5, 1.0, %v8757_v12  ;;  %v5248_v9 = vsel %vm611_vm6, 1.0, %v8757_v12  ;;  %v4105_v17 = vpop.eup %4104  ;;  %4116 = vpow2.f32 %v372_v38 }
  0x93   : > { %8763 = vst [vmem:[#allocation32_spill] sm:$0xff] %v5245_v45  ;;  %8764 = vst [vmem:[#allocation33_spill] sm:$0xff] %v5248_v9  ;;  %v957_v34 = vadd.f32 %v956_v10, %v476_v16  ;;  %v5252_v24 = vpack.i.bf16 %v5248_v9, %v5245_v45  ;;  %v323_v47 = vand.u32 2147483647, %v5236_v33  ;;  %v888_v49 = vmul.f32 10.0, %v582_v40  ;;  %v5581_v45 = vld [vmem:[%s4814_s19 + $0xb8] sm:$0xff]  }
  0x94   : > { %v4107_v26 = vpop.eup %4106  ;;  %v568_v43 = vmul.f32 %v5042_v6, %v536_v18  ;;  %4118 = vrcp.f32 %v5182_v2  ;;  %v338_v52 = vsub.f32 0.0, %v322_v0  ;;  %v521_v11 = vsub.f32 2.0, %v505_v63  ;;  %8804 = vst [vmem:[#allocation43_spill] sm:$0xff] %v5581_v45 }
  0x95   : > { %v4109_v60 = vpop.eup %4108  ;;  %v459_v29 = vmul.f32 0.6931472, %v4103_v55  ;;  %v455_v7 = vmul.f32 0.6931472, %v4107_v26  ;;  %v958_v51 = vadd.f32 %v957_v34, %v477_v48  ;;  %3757 = vrot.lane.b32.xlu0 %v5252_v24, %s4664_s18  ;;  %v889_v16 = vmul.f32 10.0, %v583_v32 }
  0x96   : > { %v4111_v22 = vpop.eup %4110  ;;  %v457_v36 = vmul.f32 0.6931472, %v4109_v60  ;;  %v339_v61 = vsub.f32 0.0, %v323_v47  ;;  %v366_v28 = vmul.f32 1.442695, %v338_v52  ;;  %v588_v40 = vsel %vm556_vm2, %v540_v62, %v572_v42 }
  0x97   : > { %v589_v6 = vsel %vm557_vm3, %v541_v31, %v573_v14  ;;  %v478_v38 = vadd.f32 %v455_v7, %v5152_v19  ;;  %4120 = vrcp.f32 %v5190_v3  ;;  %v4113_v0 = vpop.eup %4112  ;;  %v584_v48 = vsel %vm552_vm4, %v536_v18, %v568_v43  ;;  %v5295_v7 = vld [vmem:[%s4808_s26 + $0x88] sm:$0xff] }
  0x98   : > { %v461_v63 = vmul.f32 0.6931472, %v4105_v17  ;;  %v479_v10 = vadd.f32 %v457_v36, %v431_v5  ;;  %4122 = vpow2.f32 %v366_v28  ;;  %v537_v32 = vmul.f32 %v4101_v8, %v521_v11  ;;  %v8766_v28 = vld [vmem:[#allocation13_spill] sm:$0xff] }
  0x99   : > { %v480_v55 = vadd.f32 %v459_v29, %v5125_v13  ;;  %v512_v27 = vmul.f32 %v4111_v22, %v5161_v57  ;;  %v959_v62 = vadd.f32 %v958_v51, %v478_v38  ;;  %4124 = vpow2.f32 %v5209_v39  ;;  %v5292_v29 = vld [vmem:[%s4808_s26 + $0x80] sm:$0xff]  ;;  %3767 = vrot.lane.b32.xlu0 %v8766_v28, %s4665_s23 }
  0x9a   : > { %v894_v30 = vmul.f32 10.0, %v588_v40  ;;  %v368_v31 = vmul.f32 1.442695, %v339_v61  ;;  %v904_v19 = vmul.f32 1.442695, %v888_v49  ;;  %v895_v42 = vmul.f32 10.0, %v589_v6 }
  0x9b   : > { %v513_v14 = vmul.f32 %v4113_v0, %v5170_v4  ;;  %v960_v34 = vadd.f32 %v959_v62, %v479_v10  ;;  %4126 = vpow2.f32 %v5216_v23  ;;  %v906_v41 = vmul.f32 1.442695, %v889_v16 }
  0x9c   : > { %v890_v5 = vmul.f32 10.0, %v584_v48  ;;  %v569_v8 = vmul.f32 %v5060_v20, %v537_v32  ;;  %v481_v13 = vadd.f32 %v461_v63, %v5127_v46  ;;  %v528_v18 = vsub.f32 2.0, %v512_v27  ;;  %v8768_v48 = vld [vmem:[#allocation19_spill] sm:$0xff] }
  0x9d   : > { %v961_v57 = vadd.f32 %v960_v34, %v480_v55  ;;  %v916_v39 = vmul.f32 1.442695, %v894_v30  ;;  %4128 = vpow2.f32 %v368_v31  ;;  %v918_v4 = vmul.f32 1.442695, %v895_v42  ;;  %v8769_v55 = vld [vmem:[#allocation16_spill] sm:$0xff]  ;;  %v8771_v30 = vld [vmem:[#allocation10_spill] sm:$0xff] }
  0x9e   : > { %v5274_v17 = vpop.eup %4114  ;;  %4130 = vpow2.f32 %v904_v19  ;;  %v529_v47 = vsub.f32 2.0, %v513_v14  ;;  %v908_v20 = vmul.f32 1.442695, %v890_v5  ;;  %v585_v46 = vsel %vm553_vm7, %v537_v32, %v569_v8  ;;  %3782 = vrot.lane.b32.xlu1 %v8769_v55, %s4665_s23  ;;  %3777 = vrot.lane.b32.xlu0 %v8771_v30, %s4665_s23  ;;  %v5345_v34 = vld [vmem:[%s4814_s19 + $0x48] sm:$0xff]   ;;  %v5412_v42 = vld [vmem:[%s4814_s19 + $0x78] sm:$0xff]  }
  0x9f   : > { %v5277_v23 = vpop.eup %4116  ;;  %4132 = vpow2.f32 %v906_v41  ;;  %v544_v49 = vmul.f32 %v4111_v22, %v528_v18  ;;  %v5280_v43 = vadd.f32 1.0, %v5274_v17  ;;  %v5282_v52 = vadd.f32 %v961_v57, %v481_v13  ;;  %v5353_v13 = vld [vmem:[%s4808_s26 + $0x90] sm:$0xff] }
  0xa0   : > { %4134 = vpow2.f32 %v916_v39  ;;  %v545_v60 = vmul.f32 %v4113_v0, %v529_v47  ;;  %v5289_v11 = vadd.f32 1.0, %v5277_v23  ;;  %v891_v22 = vmul.f32 10.0, %v585_v46  ;;  %v8777_v39 = vld [vmem:[#allocation22_spill] sm:$0xff] }
  0xa1   : > { %v4119_v26 = vpop.eup %4118  ;;  %4136 = vpow2.f32 %v918_v4  ;;  %v576_v61 = vmul.f32 %v5106_v15, %v544_v49  ;;  %v3550_v40 = vunpack.c.l.bf16 %v5286_v44  ;;  %v1074_v38 = vand.u32 2147483647, %v5292_v29  ;;  %v5361_v4 = vld [vmem:[%s4808_s26 + $0x98] sm:$0xff] }
  0xa2   : > { %8765 = vst [vmem:[#allocation34_spill] sm:$0xff] %v5289_v11  ;;  %4138 = vpow2.f32 %v908_v20  ;;  %v510_v16 = vmul.f32 %v4119_v26, %v5182_v2  ;;  %v3551_v2 = vunpack.c.h.bf16 %v5286_v44  ;;  %v1075_v58 = vand.u32 2147483647, %v5295_v7  ;;  %3792 = vrot.lane.b32.xlu1 %v8777_v39, %s4665_s23  ;;  %v8778_v20 = vld [vmem:[#allocation25_spill] sm:$0xff] }
  0xa3   : > { %4140 = vrcp.f32 %v5280_v43  ;;  %vm561_vm9 = vcmp.ge.f32.partialorder %v8768_v48, 0.0  ;;  %v577_v15 = vmul.f32 %v5134_v50, %v545_v60  ;;  %v402_v32 = vmax.f32 %v5221_v53, 0.0  ;;  %3787 = vrot.lane.b32.xlu0 %v8778_v20, %s4665_s23 }
  0xa4   : > { %v4121_v51 = vpop.eup %4120  ;;  %4142 = vrcp.f32 %v5289_v11  ;;  %v526_v10 = vsub.f32 2.0, %v510_v16  ;;  %v910_v62 = vmul.f32 1.442695, %v891_v22  ;;  %v1090_v50 = vsub.f32 0.0, %v1074_v38 }
  0xa5   : > { %v5300_v36 = vpop.eup %4122  ;;  %v511_v63 = vmul.f32 %v4121_v51, %v5190_v3  ;;  %v1091_v31 = vsub.f32 0.0, %v1075_v58  ;;  %v592_v3 = vsel %vm560_vm8, %v544_v49, %v576_v61  ;;  %v418_v19 = vmul.f32 %v3542_v54, %v5221_v53 }
  0xa6   : > { %v5308_v6 = vadd.f32 1.0, %v5300_v36  ;;  %v5313_v0 = vpop.eup %4124  ;;  %vm5334_vm10 = vcmp.gt.f32.partialorder %v3550_v40, 0.5  ;;  %vm5340_vm11 = vcmp.gt.f32.partialorder %v3551_v2, 0.5  ;;  %v593_v41 = vsel %vm561_vm9, %v545_v60, %v577_v15  ;;  %3802 = vrot.lane.b32.xlu1 %v5174_v21, %s4665_s23 }
  0xa7   : > { %8767 = vst [vmem:[#allocation13_spill] sm:$0xff] %v5313_v0  ;;  %v527_v54 = vsub.f32 2.0, %v511_v63  ;;  %vm558_vm12 = vcmp.ge.f32.partialorder %v4993_v35, 0.0  ;;  %v1106_v5 = vmul.f32 1.442695, %v1090_v50  ;;  %v542_v57 = vmul.f32 %v4119_v26, %v526_v10  ;;  %3797 = vrot.lane.b32.xlu0 %v5252_v24, %s4665_s23  ;;  %v8786_v24 = vld [vmem:[#allocation29_spill] sm:$0xff] }
  0xa8   : > { %4144 = vlog2.f32 %v5308_v6  ;;  %v5323_v27 = vpop.eup %4126  ;;  %v1108_v8 = vmul.f32 1.442695, %v1091_v31  ;;  %v5370_v46 = vsel %vm5334_vm10, 1.0, %v8757_v12  ;;  %v5375_v26 = vsel %vm5340_vm11, 1.0, %v8757_v12 }
  0xa9   : > { %8770 = vst [vmem:[#allocation19_spill] sm:$0xff] %v5323_v27  ;;  %4146 = vrcp.f32 %v5308_v6  ;;  %8779 = vst [vmem:[#allocation10_spill] sm:$0xff] %v5370_v46  ;;  %v8618_v49 = vunpack.c.l.bf16 %v5345_v34  ;;  %v8616_v22 = vunpack.c.h.bf16 %v5345_v34  ;;  %v1076_v16 = vand.u32 2147483647, %v5353_v13 }
  0xaa   : > { %v5347_v59 = vpop.eup %4128  ;;  %8780 = vst [vmem:[#allocation22_spill] sm:$0xff] %v5375_v26  ;;  %4148 = vpow2.f32 %v1106_v5  ;;  %v898_v28 = vmul.f32 10.0, %v592_v3  ;;  %v543_v38 = vmul.f32 %v4121_v51, %v527_v54  ;;  %v1077_v58 = vand.u32 2147483647, %v5361_v4 }
  0xab   : > { %v5355_v18 = vpop.eup %4130  ;;  %v5379_v60 = vadd.f32 1.0, %v5347_v59  ;;  %4150 = vpow2.f32 %v1108_v8  ;;  %vm1364_vm13 = vcmp.gt.f32.partialorder %v8618_v49, 0.5  ;;  %v899_v15 = vmul.f32 10.0, %v593_v41  ;;  %v8787_v41 = vld [vmem:[#allocation27_spill] sm:$0xff] }
  0xac   : > { %8776 = vst [vmem:[#allocation16_spill] sm:$0xff] %v5355_v18  ;;  %v5363_v47 = vpop.eup %4132  ;;  %v3806_v63 = vpack.i.bf16 %v5375_v26, %v5370_v46  ;;  %vm1365_vm14 = vcmp.gt.f32.partialorder %v8616_v22, 0.5  ;;  %v1092_v10 = vsub.f32 0.0, %v1076_v16  ;;  %v5401_v55 = vsel %vm1364_vm13, 1.0, %v8757_v12 }
  0xad   : > { %v5383_v61 = vpop.eup %4134  ;;  %8784 = vst [vmem:[#allocation37_spill] sm:$0xff] %v5401_v55  ;;  %v5404_v30 = vsel %vm1365_vm14, 1.0, %v8757_v12  ;;  %v1093_v50 = vsub.f32 0.0, %v1077_v58  ;;  %vm559_vm15 = vcmp.ge.f32.partialorder %v4996_v37, 0.0  ;;  %v574_v31 = vmul.f32 %v5142_v25, %v542_v57  ;;  %v8788_v58 = vld [vmem:[#allocation31_spill] sm:$0xff] }
  0xae   : > { %8781 = vst [vmem:[#allocation25_spill] sm:$0xff] %v5383_v61  ;;  %v5388_v48 = vpop.eup %4136  ;;  %8785 = vst [vmem:[#allocation38_spill] sm:$0xff] %v5404_v30  ;;  %4152 = vrcp.f32 %v5379_v60  ;;  %v1110_v3 = vmul.f32 1.442695, %v1092_v10  ;;  %v575_v14 = vmul.f32 %v8786_v24, %v543_v38  ;;  %v404_v54 = vmax.f32 %v8787_v41, 0.0  ;;  %3807 = vrot.lane.b32.xlu1 %v3806_v63, %s4664_s18  ;;  %3847 = vrot.lane.b32.xlu0 %v3806_v63, %s4665_s23  ;;  %v5432_v24 = vld [vmem:[%s4808_s26 + $0xf8] sm:$0xff] }
  0xaf   : > { %8782 = vst [vmem:[#allocation35_spill] sm:$0xff] %v5388_v48  ;;  %v5396_v51 = vpop.eup %4138  ;;  %4154 = vpow2.f32 %v910_v62  ;;  %v1112_v5 = vmul.f32 1.442695, %v1093_v50  ;;  %v924_v39 = vmul.f32 1.442695, %v898_v28  ;;  %v434_v20 = vsub.f32 %v402_v32, %v418_v19  ;;  %v5429_v28 = vld [vmem:[%s4808_s26 + $0xf0] sm:$0xff] }
  0xb0   : > { %8783 = vst [vmem:[#allocation36_spill] sm:$0xff] %v5396_v51  ;;  %v5406_v21 = vpop.eup %4140  ;;  %v5423_v25 = vpack.i.bf16 %v5404_v30, %v5401_v55  ;;  %4156 = vpow2.f32 %v1110_v3  ;;  %v926_v16 = vmul.f32 1.442695, %v899_v15  ;;  %v8614_v50 = vunpack.c.l.bf16 %v5412_v42  ;;  %v5521_v30 = vld [vmem:[%s4814_s19 + $0x50] sm:$0xff]   ;;  %v5584_v48 = vld [vmem:[%s4808_s26 + $0x100] sm:$0xff] }
  0xb1   : > { %v5416_v8 = vpop.eup %4142  ;;  %4158 = vpow2.f32 %v1112_v5  ;;  %v590_v32 = vsel %vm558_vm12, %v542_v57, %v574_v31  ;;  %v8617_v3 = vunpack.c.h.bf16 %v5412_v42  ;;  %v591_v15 = vsel %vm559_vm15, %v543_v38, %v575_v14 }
  0xb2   : > { %4160 = vlog2.f32 %v5280_v43  ;;  %v516_v63 = vmul.f32 %v5406_v21, %v5280_v43  ;;  %v517_v5 = vmul.f32 %v5416_v8, %v5289_v11  ;;  %vm1376_vm0 = vcmp.gt.f32.partialorder %v8614_v50, 0.5  ;;  %3812 = vrot.lane.b32.xlu1 %v5423_v25, %s4664_s18  ;;  %v8789_v43 = vld [vmem:[#allocation26_spill] sm:$0xff] }
  0xb3   : > { %4162 = vpow2.f32 %v924_v39  ;;  %v1088_v57 = vand.u32 2147483647, %v5429_v28  ;;  %v1089_v31 = vand.u32 2147483647, %v5432_v24  ;;  %v8790_v38 = vunpack.c.l.bf16 %v8789_v43 }
  0xb4   : > { %4164 = vpow2.f32 %v926_v16  ;;  %vm1377_vm1 = vcmp.gt.f32.partialorder %v8617_v3, 0.5  ;;  %v5468_v16 = vsel %vm1376_vm0, 1.0, %v8757_v12  ;;  %v533_v22 = vsub.f32 2.0, %v517_v5 }
  0xb5   : > { %v4145_v62 = vpop.eup %4144  ;;  %v420_v14 = vmul.f32 %v8790_v38, %v8787_v41  ;;  %8793 = vst [vmem:[#allocation27_spill] sm:$0xff] %v5468_v16  ;;  %v532_v38 = vsub.f32 2.0, %v516_v63  ;;  %v1170_v63 = vmul.f32 %v3550_v40, %v5292_v29  ;;  %v1171_v5 = vmul.f32 %v3551_v2, %v5295_v7 }
  0xb6   : > { %v463_v19 = vmul.f32 0.6931472, %v4145_v62  ;;  %v5450_v37 = vpop.eup %4146  ;;  %v8791_v62 = vunpack.c.h.bf16 %v8789_v43  ;;  %v1154_v43 = vmax.f32 %v5292_v29, 0.0  ;;  %vm564_vm2 = vcmp.ge.f32.partialorder %v8787_v41, 0.0 }
  0xb7   : > { %v5462_v39 = vpop.eup %4148  ;;  %vm565_vm3 = vcmp.ge.f32.partialorder %v8788_v58, 0.0  ;;  %v548_v44 = vmul.f32 %v5406_v21, %v532_v38  ;;  %vm562_vm4 = vcmp.ge.f32.partialorder %v5221_v53, 0.0  ;;  %vm563_vm9 = vcmp.ge.f32.partialorder %v5236_v33, 0.0 }
  0xb8   : > { %v482_v35 = vadd.f32 %v463_v19, %v434_v20  ;;  %v5458_v50 = vmul.f32 %v8791_v62, %v8788_v58  ;;  %v896_v20 = vmul.f32 10.0, %v590_v32  ;;  %v897_v19 = vmul.f32 10.0, %v591_v15  ;;  %v5470_v56 = vpop.eup %4150 }
  0xb9   : > { %v1155_v62 = vmax.f32 %v5295_v7, 0.0  ;;  %v5475_v3 = vadd.f32 1.0, %v5462_v39  ;;  %v5478_v32 = vsel %vm1377_vm1, 1.0, %v8757_v12  ;;  %v1104_v15 = vsub.f32 0.0, %v1088_v57 }
  0xba   : > { %v5465_v10 = vadd.f32 %v5282_v52, %v482_v35  ;;  %8794 = vst [vmem:[#allocation31_spill] sm:$0xff] %v5478_v32  ;;  %v1105_v52 = vsub.f32 0.0, %v1089_v31  ;;  %v5481_v35 = vadd.f32 1.0, %v5470_v56  ;;  %v5491_v49 = vpack.i.bf16 %v5478_v32, %v5468_v16 }
  0xbb   : > { %v514_v57 = vmul.f32 %v5450_v37, %v5308_v6  ;;  %4166 = vlog2.f32 %v5475_v3  ;;  %v4153_v40 = vpop.eup %4152  ;;  %v1134_v31 = vmul.f32 1.442695, %v1104_v15  ;;  %v549_v6 = vmul.f32 %v5416_v8, %v533_v22 }
  0xbc   : > { %8792 = vst [vmem:[#allocation29_spill] sm:$0xff] %v5465_v10  ;;  %v5493_v10 = vsub.f32 %v404_v54, %v420_v14  ;;  %4168 = vlog2.f32 %v5481_v35  ;;  %3882 = vrot.lane.b32.xlu0 %v5491_v49, %s4665_s23  ;;  %v5505_v54 = vpop.eup %4154  ;;  %v5507_v14 = vmul.f32 1.442695, %v896_v20  ;;  %v1136_v11 = vmul.f32 1.442695, %v1105_v52  ;;  %v5529_v52 = vld [vmem:[%s4808_s26 + $0xa0] sm:$0xff] }
  0xbd   : > { %8795 = vst [vmem:[#allocation26_spill] sm:$0xff] %v5505_v54  ;;  %4170 = vlog2.f32 %v5379_v60  ;;  %v5511_v21 = vpop.eup %4156  ;;  %v5513_v38 = vmul.f32 1.442695, %v897_v19  ;;  %v5515_v2 = vsub.f32 %v1154_v43, %v1170_v63  ;;  %v5517_v15 = vsub.f32 %v1155_v62, %v1171_v5  ;;  %v5532_v19 = vld [vmem:[%s4808_s26 + $0xa8] sm:$0xff] }
  0xbe   : > { %4172 = vrcp.f32 %v5475_v3  ;;  %v5523_v20 = vpop.eup %4158  ;;  %v515_v55 = vmul.f32 %v4153_v40, %v5379_v60  ;;  %v530_v22 = vsub.f32 2.0, %v514_v57  ;;  %v580_v62 = vmul.f32 %v5274_v17, %v548_v44 }
  0xbf   : > { %4174 = vrcp.f32 %v5481_v35  ;;  %v5534_v43 = vpop.eup %4160  ;;  %v5538_v63 = vadd.f32 1.0, %v5511_v21  ;;  %v581_v60 = vmul.f32 %v5277_v23, %v549_v6  ;;  %v5548_v17 = vadd.f32 1.0, %v5523_v20 }
  0xc0   : > { %4176 = vpow2.f32 %v1134_v31  ;;  %v5545_v32 = vpop.eup %4162  ;;  %v1078_v5 = vand.u32 2147483647, %v5529_v52  ;;  %v1079_v23 = vand.u32 2147483647, %v5532_v19  ;;  %v546_v57 = vmul.f32 %v5450_v37, %v530_v22 }
  0xc1   : > { %4178 = vpow2.f32 %v1136_v11  ;;  %8796 = vst [vmem:[#allocation39_spill] sm:$0xff] %v5545_v32  ;;  %v5553_v31 = vpop.eup %4164  ;;  %v531_v11 = vsub.f32 2.0, %v515_v55  ;;  %v8798_v8 = vunpack.c.l.bf16 %v5521_v30  ;;  %v8799_v16 = vunpack.c.h.bf16 %v5521_v30 }
  0xc2   : > { %4180 = vlog2.f32 %v5538_v63  ;;  %8797 = vst [vmem:[#allocation40_spill] sm:$0xff] %v5553_v31  ;;  %v1094_v18 = vsub.f32 0.0, %v1078_v5  ;;  %v5568_v31 = vld [vmem:[%s4814_s19 + $0x80] sm:$0xff]   ;;  %v8802_v55 = vunpack.c.l.bf16 %v5345_v34  ;;  %v8803_v22 = vunpack.c.h.bf16 %v5345_v34  ;;  %v5592_v34 = vld [vmem:[%s4808_s26 + $0x178] sm:$0xff] }
  0xc3   : > { %vm1366_vm5 = vcmp.gt.f32.partialorder %v8798_v8, 0.5  ;;  %vm1367_vm6 = vcmp.gt.f32.partialorder %v8799_v16, 0.5  ;;  %4182 = vlog2.f32 %v5548_v17  ;;  %v1095_v9 = vsub.f32 0.0, %v1079_v23 }
  0xc4   : > { %v5562_v46 = vsel %vm1366_vm5, 1.0, %v8757_v12  ;;  %v5565_v26 = vsel %vm1367_vm6, 1.0, %v8757_v12  ;;  %v1172_v37 = vmul.f32 %v8802_v55, %v5353_v13  ;;  %v1173_v16 = vmul.f32 %v8803_v22, %v5361_v4 }
  0xc5   : > { %8800 = vst [vmem:[#allocation41_spill] sm:$0xff] %v5562_v46  ;;  %8801 = vst [vmem:[#allocation42_spill] sm:$0xff] %v5565_v26  ;;  %v5578_v8 = vpack.i.bf16 %v5565_v26, %v5562_v46  ;;  %v596_v5 = vsel %vm564_vm2, %v548_v44, %v580_v62  ;;  %v597_v32 = vsel %vm565_vm3, %v549_v6, %v581_v60  ;;  %4184 = vrcp.f32 %v5538_v63 }
  0xc6   : > { %v1114_v55 = vmul.f32 1.442695, %v1094_v18  ;;  %v547_v22 = vmul.f32 %v4153_v40, %v531_v11  ;;  %4186 = vrcp.f32 %v5548_v17  ;;  %v1116_v26 = vmul.f32 1.442695, %v1095_v9 }
  0xc7   : > { %3817 = vrot.lane.b32.xlu1 %v5578_v8, %s4664_s18  ;;  %v8630_v23 = vunpack.c.l.bf16 %v5568_v31  ;;  %v578_v41 = vmul.f32 %v5300_v36, %v546_v57  ;;  %v8631_v44 = vunpack.c.h.bf16 %v5581_v45  ;;  %v1834_v6 = vand.u32 2147483647, %v5584_v48 }
  0xc8   : > { %v4167_v46 = vpop.eup %4166  ;;  %4188 = vpow2.f32 %v1114_v55  ;;  %v1849_v9 = vand.u32 2147483647, %v5592_v34  ;;  %v902_v0 = vmul.f32 10.0, %v596_v5  ;;  %v579_v5 = vmul.f32 %v5347_v59, %v547_v22 }
  0xc9   : > { %v4169_v18 = vpop.eup %4168  ;;  %v1203_v62 = vmul.f32 0.6931472, %v4167_v46  ;;  %4190 = vpow2.f32 %v1116_v26  ;;  %vm2122_vm7 = vcmp.gt.f32.partialorder %v8630_v23, 0.5  ;;  %vm2137_vm8 = vcmp.gt.f32.partialorder %v8631_v44, 0.5 }
  0xca   : > { %v4171_v40 = vpop.eup %4170  ;;  %v1205_v60 = vmul.f32 0.6931472, %v4169_v18  ;;  %v5607_v36 = vsel %vm2122_vm7, 1.0, %v8757_v12  ;;  %v1850_v11 = vsub.f32 0.0, %v1834_v6  ;;  %v5613_v26 = vsel %vm2137_vm8, 1.0, %v8757_v12 }
  0xcb   : > { %8805 = vst [vmem:[#allocation44_spill] sm:$0xff] %v5607_v36  ;;  %v5609_v55 = vpop.eup %4172  ;;  %v1234_v46 = vadd.f32 %v1203_v62, %v5515_v2  ;;  %8806 = vst [vmem:[#allocation45_spill] sm:$0xff] %v5613_v26  ;;  %v1865_v23 = vsub.f32 0.0, %v1849_v9  ;;  %v594_v18 = vsel %vm562_vm4, %v546_v57, %v578_v41  ;;  %v5622_v45 = vpack.i.bf16 %v5613_v26, %v5607_v36 }
  0xcc   : > { %v5615_v54 = vpop.eup %4174  ;;  %v1235_v44 = vadd.f32 %v1205_v60, %v5517_v15  ;;  %v1866_v6 = vmul.f32 1.442695, %v1850_v11  ;;  %4192 = vpow2.f32 %v5507_v14  ;;  %v903_v2 = vmul.f32 10.0, %v597_v32 }
  0xcd   : > { %v5624_v27 = vpop.eup %4176  ;;  %v8807_v57 = vmax.f32 %v5353_v13, 0.0  ;;  %v1896_v41 = vmul.f32 1.442695, %v1865_v23  ;;  %3887 = vrot.lane.b32.xlu0 %v5622_v45, %s4664_s18  ;;  %v932_v14 = vmul.f32 1.442695, %v902_v0  ;;  %v8808_v32 = vunpack.c.h.bf16 %v5207_v1 }
  0xce   : > { %v5629_v62 = vpop.eup %4178  ;;  %v1714_v53 = vadd.f32 %v1235_v44, %v1234_v46  ;;  %4194 = vpow2.f32 %v1866_v6  ;;  %v900_v60 = vmul.f32 10.0, %v594_v18  ;;  %v467_v44 = vmul.f32 0.6931472, %v5534_v43 }
  0xcf   : > { %v1188_v15 = vsub.f32 %v8807_v57, %v1172_v37  ;;  %v4181_v9 = vpop.eup %4180  ;;  %4196 = vpow2.f32 %v5513_v38  ;;  %v419_v59 = vmul.f32 %v8808_v32, %v5236_v33  ;;  %v8809_v11 = vmax.f32 %v5361_v4, 0.0 }
  0xd0   : > { %v1207_v46 = vmul.f32 0.6931472, %v4181_v9  ;;  %v5643_v23 = vadd.f32 1.0, %v5624_v27  ;;  %v4183_v6 = vpop.eup %4182  ;;  %v934_v57 = vmul.f32 1.442695, %v903_v2  ;;  %v595_v0 = vsel %vm563_vm9, %v547_v22, %v579_v5  ;;  %v5655_v9 = vld [vmem:[%s4814_s19 + $0x58] sm:$0xff]  }
  0xd1   : > { %v1189_v37 = vsub.f32 %v8809_v11, %v1173_v16  ;;  %v1266_v1 = vmul.f32 %v5609_v55, %v5475_v3  ;;  %v5650_v38 = vadd.f32 1.0, %v5629_v62  ;;  %v1267_v43 = vmul.f32 %v5615_v54, %v5481_v35  ;;  %3892 = vrot.lane.b32.xlu0 %v5622_v45, %s4665_s23 }
  0xd2   : > { %v1209_v18 = vmul.f32 0.6931472, %v4183_v6  ;;  %v1236_v16 = vadd.f32 %v1207_v46, %v1188_v15  ;;  %4198 = vpow2.f32 %v1896_v41  ;;  %v4185_v32 = vpop.eup %4184  ;;  %v8811_v2 = vmax.f32 %v8788_v58, 0.0 }
  0xd3   : > { %8810 = vst [vmem:[#allocation46_spill] sm:$0xff] %v5650_v38  ;;  %4200 = vpow2.f32 %v932_v14  ;;  %v8813_v3 = vmax.f32 %v5236_v33, 0.0  ;;  %v928_v5 = vmul.f32 1.442695, %v900_v60  ;;  %v4187_v36 = vpop.eup %4186  ;;  %v5665_v26 = vadd.f32 %v467_v44, %v5493_v10 }
  0xd4   : > { %v5660_v11 = vsub.f32 %v8811_v2, %v5458_v50  ;;  %v901_v35 = vmul.f32 10.0, %v595_v0  ;;  %v1237_v15 = vadd.f32 %v1209_v18, %v1189_v37  ;;  %4202 = vrcp.f32 %v5643_v23  ;;  %v5681_v37 = vld [vmem:[%s4808_s26 + $0xb0] sm:$0xff] }
  0xd5   : > { %v435_v22 = vsub.f32 %v8813_v3, %v419_v59  ;;  %8814 = vst [vmem:[#allocation48_spill] sm:$0xff] %v5665_v26  ;;  %v5668_v41 = vpop.eup %4188  ;;  %v1282_v46 = vsub.f32 2.0, %v1266_v1  ;;  %v1715_v58 = vadd.f32 %v1714_v53, %v1236_v16  ;;  %4204 = vrcp.f32 %v5650_v38 }
  0xd6   : > { %8812 = vst [vmem:[#allocation47_spill] sm:$0xff] %v5660_v11  ;;  %v8636_v50 = vunpack.c.l.bf16 %v5655_v9  ;;  %v5672_v33 = vpop.eup %4190  ;;  %4206 = vpow2.f32 %v934_v57  ;;  %v465_v14 = vmul.f32 0.6931472, %v4171_v40  ;;  %v1283_v10 = vsub.f32 2.0, %v1267_v43  ;;  %v5692_v40 = vld [vmem:[%s4808_s26 + $0xb8] sm:$0xff] }
  0xd7   : > { %v8635_v59 = vunpack.c.h.bf16 %v5655_v9  ;;  %4208 = vpow2.f32 %v928_v5  ;;  %vm1314_vm10 = vcmp.ge.f32.partialorder %v5292_v29, 0.0  ;;  %v1268_v60 = vmul.f32 %v4185_v32, %v5538_v63 }
  0xd8   : > { %v1269_v44 = vmul.f32 %v4187_v36, %v5548_v17  ;;  %v5678_v53 = vadd.f32 %v1715_v58, %v1237_v15  ;;  %v930_v6 = vmul.f32 1.442695, %v901_v35  ;;  %vm1315_vm11 = vcmp.ge.f32.partialorder %v5295_v7, 0.0 }
  0xd9   : > { %v5685_v57 = vadd.f32 1.0, %v5668_v41  ;;  %vm1368_vm12 = vcmp.gt.f32.partialorder %v8636_v50, 0.5  ;;  %vm1369_vm13 = vcmp.gt.f32.partialorder %v8635_v59, 0.5  ;;  %v1298_v63 = vmul.f32 %v5609_v55, %v1282_v46  ;;  %v5704_v43 = vpop.eup %4192 }
  0xda   : > { %v5696_v17 = vadd.f32 1.0, %v5672_v33  ;;  %v5699_v0 = vsel %vm1368_vm12, 1.0, %v8757_v12  ;;  %v5702_v1 = vsel %vm1369_vm13, 1.0, %v8757_v12  ;;  %8817 = vst [vmem:[#allocation51_spill] sm:$0xff] %v5704_v43  ;;  %v1299_v18 = vmul.f32 %v5615_v54, %v1283_v10 }
  0xdb   : > { %8815 = vst [vmem:[#allocation49_spill] sm:$0xff] %v5699_v0  ;;  %8816 = vst [vmem:[#allocation50_spill] sm:$0xff] %v5702_v1  ;;  %4210 = vlog2.f32 %v5685_v57  ;;  %v5710_v16 = vpack.i.bf16 %v5702_v1, %v5699_v0  ;;  %v1080_v55 = vand.u32 2147483647, %v5681_v37  ;;  %v5713_v2 = vpop.eup %4194  ;;  %v1284_v3 = vsub.f32 2.0, %v1268_v60 }
  0xdc   : > { %v1285_v5 = vsub.f32 2.0, %v1269_v44  ;;  %4212 = vlog2.f32 %v5696_v17  ;;  %v1081_v35 = vand.u32 2147483647, %v5692_v40  ;;  %v5717_v15 = vpop.eup %4196  ;;  %v5719_v46 = vadd.f32 %v465_v14, %v435_v22 }
  0xdd   : > { %8818 = vst [vmem:[#allocation52_spill] sm:$0xff] %v5717_v15  ;;  %vm1316_vm14 = vcmp.ge.f32.partialorder %v5353_v13, 0.0  ;;  %vm1317_vm15 = vcmp.ge.f32.partialorder %v5361_v4, 0.0  ;;  %4214 = vrcp.f32 %v5685_v57  ;;  %3822 = vrot.lane.b32.xlu1 %v5710_v16, %s4664_s18  ;;  %v1158_v54 = vmax.f32 %v5529_v52, 0.0 }
  0xde   : > { %8819 = vst [vmem:[#allocation53_spill] sm:$0xff] %v5719_v46  ;;  %4216 = vrcp.f32 %v5696_v17  ;;  %v5729_v58 = vadd.f32 1.0, %v5713_v2  ;;  %v1096_v10 = vsub.f32 0.0, %v1080_v55  ;;  %v1330_v22 = vmul.f32 %v5462_v39, %v1298_v63 }
  0xdf   : > { %4218 = vpow2.f32 %v930_v6  ;;  %v1159_v14 = vmax.f32 %v5532_v19, 0.0  ;;  %v1097_v60 = vsub.f32 0.0, %v1081_v35  ;;  %v5733_v44 = vpop.eup %4198  ;;  %v1331_v59 = vmul.f32 %v5470_v56, %v1299_v18 }
  0xe0   : > { %v1300_v50 = vmul.f32 %v4185_v32, %v1284_v3  ;;  %v1301_v11 = vmul.f32 %v4187_v36, %v1285_v5  ;;  %v8820_v26 = vunpack.c.l.bf16 %v5521_v30  ;;  %v5739_v1 = vpop.eup %4200  ;;  %4220 = vlog2.f32 %v5643_v23 }
  0xe1   : > { %8821 = vst [vmem:[#allocation54_spill] sm:$0xff] %v5739_v1  ;;  %v8822_v39 = vunpack.c.h.bf16 %v5521_v30  ;;  %v5746_v55 = vadd.f32 1.0, %v5733_v44  ;;  %v1118_v35 = vmul.f32 1.442695, %v1096_v10  ;;  %v4203_v56 = vpop.eup %4202  ;;  %4222 = vrcp.f32 %v5729_v58 }
  0xe2   : > { %v1174_v46 = vmul.f32 %v8820_v26, %v5529_v52  ;;  %v1120_v32 = vmul.f32 1.442695, %v1097_v60  ;;  %v4205_v3 = vpop.eup %4204  ;;  %v1346_v5 = vsel %vm1314_vm10, %v1298_v63, %v1330_v22  ;;  %v8824_v30 = vunpack.c.l.bf16 %v5412_v42  ;;  %v5765_v26 = vld [vmem:[%s4814_s19 + $0x60] sm:$0xff]  }
  0xe3   : > { %v1175_v6 = vmul.f32 %v8822_v39, %v5532_v19  ;;  %8823 = vst [vmem:[#allocation55_spill] sm:$0xff] %v5746_v55  ;;  %v8825_v10 = vunpack.c.h.bf16 %v5412_v42  ;;  %4224 = vrcp.f32 %v5746_v55  ;;  %v5767_v36 = vpop.eup %4206  ;;  %v1347_v29 = vsel %vm1315_vm11, %v1299_v18, %v1331_v59  ;;  %v5774_v60 = vld [vmem:[%s4808_s26 + $0xc0] sm:$0xff] }
  0xe4   : > { %v5756_v39 = vmul.f32 %v8824_v30, %v5429_v28  ;;  %8826 = vst [vmem:[#allocation56_spill] sm:$0xff] %v5767_v36  ;;  %v1332_v63 = vmul.f32 %v5511_v21, %v1300_v50  ;;  %v1333_v22 = vmul.f32 %v5523_v20, %v1301_v11  ;;  %4226 = vpow2.f32 %v1118_v35  ;;  %v5777_v30 = vld [vmem:[%s4808_s26 + $0xc8] sm:$0xff]  ;;  %v5779_v42 = vpop.eup %4208 }
  0xe5   : > { %v5761_v1 = vmul.f32 %v8825_v10, %v5432_v24  ;;  %8827 = vst [vmem:[#allocation57_spill] sm:$0xff] %v5779_v42  ;;  %v1280_v10 = vmul.f32 %v4203_v56, %v5643_v23  ;;  %v1190_v0 = vsub.f32 %v1158_v54, %v1174_v46  ;;  %v1191_v15 = vsub.f32 %v1159_v14, %v1175_v6 }
  0xe6   : > { %4228 = vpow2.f32 %v1120_v32  ;;  %v1281_v36 = vmul.f32 %v4205_v3, %v5650_v38  ;;  %v8640_v7 = vunpack.c.l.bf16 %v5765_v26  ;;  %v8639_v21 = vunpack.c.h.bf16 %v5765_v26 }
  0xe7   : > { %v1650_v59 = vmul.f32 10.0, %v1346_v5  ;;  %v1651_v20 = vmul.f32 10.0, %v1347_v29  ;;  %v1082_v18 = vand.u32 2147483647, %v5774_v60  ;;  %v1083_v35 = vand.u32 2147483647, %v5777_v30 }
  0xe8   : > { %v4211_v43 = vpop.eup %4210  ;;  %v1348_v42 = vsel %vm1316_vm14, %v1300_v50, %v1332_v63  ;;  %v1349_v23 = vsel %vm1317_vm15, %v1301_v11, %v1333_v22  ;;  %vm1370_vm0 = vcmp.gt.f32.partialorder %v8640_v7, 0.5  ;;  %vm1371_vm1 = vcmp.gt.f32.partialorder %v8639_v21, 0.5 }
  0xe9   : > { %v4213_v46 = vpop.eup %4212  ;;  %v1296_v54 = vsub.f32 2.0, %v1280_v10  ;;  %v1211_v14 = vmul.f32 0.6931472, %v4211_v43  ;;  %v5798_v6 = vsel %vm1370_vm0, 1.0, %v8757_v12  ;;  %v5801_v13 = vsel %vm1371_vm1, 1.0, %v8757_v12 }
  0xea   : > { %8828 = vst [vmem:[#allocation58_spill] sm:$0xff] %v5798_v6  ;;  %8829 = vst [vmem:[#allocation59_spill] sm:$0xff] %v5801_v13  ;;  %v4215_v4 = vpop.eup %4214  ;;  %v1297_v11 = vsub.f32 2.0, %v1281_v36  ;;  %vm1328_vm2 = vcmp.ge.f32.partialorder %v5429_v28, 0.0  ;;  %v1213_v45 = vmul.f32 0.6931472, %v4213_v46  ;;  %v5806_v50 = vpack.i.bf16 %v5801_v13, %v5798_v6 }
  0xeb   : > { %v1098_v32 = vsub.f32 0.0, %v1082_v18  ;;  %v4217_v5 = vpop.eup %4216  ;;  %v1666_v29 = vmul.f32 1.442695, %v1650_v59  ;;  %vm1329_vm3 = vcmp.ge.f32.partialorder %v5432_v24, 0.0  ;;  %v1238_v43 = vadd.f32 %v1211_v14, %v1190_v0 }
  0xec   : > { %v1270_v63 = vmul.f32 %v4215_v4, %v5685_v57  ;;  %v1099_v22 = vsub.f32 0.0, %v1083_v35  ;;  %v5810_v10 = vpop.eup %4218  ;;  %v1668_v21 = vmul.f32 1.442695, %v1651_v20  ;;  %v1652_v36 = vmul.f32 10.0, %v1348_v42  ;;  %3827 = vrot.lane.b32.xlu1 %v5806_v50, %s4664_s18 }
  0xed   : > { %8830 = vst [vmem:[#allocation60_spill] sm:$0xff] %v5810_v10  ;;  %v1239_v7 = vadd.f32 %v1213_v45, %v1191_v15  ;;  %v1122_v38 = vmul.f32 1.442695, %v1098_v32  ;;  %v1653_v46 = vmul.f32 10.0, %v1349_v23  ;;  %v1312_v6 = vmul.f32 %v4203_v56, %v1296_v54  ;;  %v4221_v59 = vpop.eup %4220 }
  0xee   : > { %v1717_v18 = vadd.f32 %v5678_v53, %v1238_v43  ;;  %4230 = vlog2.f32 %v5729_v58  ;;  %v1313_v0 = vmul.f32 %v4205_v3, %v1297_v11  ;;  %v1271_v57 = vmul.f32 %v4217_v5, %v5696_v17  ;;  %v4223_v14 = vpop.eup %4222 }
  0xef   : > { %4232 = vpow2.f32 %v1122_v38  ;;  %v1124_v35 = vmul.f32 1.442695, %v1099_v22  ;;  %v8831_v15 = vmax.f32 %v5429_v28, 0.0  ;;  %v1286_v20 = vsub.f32 2.0, %v1270_v63 }
  0xf0   : > { %4234 = vpow2.f32 %v1666_v29  ;;  %v5822_v23 = vadd.f32 %v1717_v18, %v1239_v7  ;;  %v5824_v56 = vpop.eup %4224  ;;  %vm1318_vm4 = vcmp.ge.f32.partialorder %v5529_v52, 0.0  ;;  %v1914_v53 = vmax.f32 %v5584_v48, 0.0 }
  0xf1   : > { %v5820_v42 = vsub.f32 %v8831_v15, %v5756_v39  ;;  %v8832_v38 = vunpack.c.l.bf16 %v5568_v31  ;;  %4236 = vpow2.f32 %v1124_v35  ;;  %v5831_v3 = vpop.eup %4226  ;;  %v1670_v54 = vmul.f32 1.442695, %v1652_v36  ;;  %v5867_v15 = vld [vmem:[%s4808_s26 + $0x108] sm:$0xff] }
  0xf2   : > { %4238 = vpow2.f32 %v1668_v21  ;;  %v1344_v39 = vmul.f32 %v5624_v27, %v1312_v6  ;;  %v1160_v7 = vmax.f32 %v5681_v37, 0.0  ;;  %v1672_v45 = vmul.f32 1.442695, %v1653_v46 }
  0xf3   : > { %v1930_v17 = vmul.f32 %v8832_v38, %v5584_v48  ;;  %v5835_v11 = vpop.eup %4228  ;;  %v1345_v32 = vmul.f32 %v5629_v62, %v1313_v0  ;;  %v1287_v29 = vsub.f32 2.0, %v1271_v57  ;;  %v5839_v43 = vadd.f32 1.0, %v5831_v3 }
  0xf4   : > { %v1302_v63 = vmul.f32 %v4215_v4, %v1286_v20  ;;  %vm1319_vm5 = vcmp.ge.f32.partialorder %v5532_v19, 0.0  ;;  %v2026_v21 = vmul.f32 %v4223_v14, %v5729_v58  ;;  %v5844_v27 = vadd.f32 1.0, %v5835_v11 }
  0xf5   : > { %v8833_v22 = vunpack.c.l.bf16 %v5655_v9  ;;  %v5849_v46 = vmul.f32 0.6931472, %v4221_v59  ;;  %v5851_v62 = vsub.f32 %v1914_v53, %v1930_v17  ;;  %v1161_v18 = vmax.f32 %v5692_v40, 0.0  ;;  %v5864_v59 = vld [vmem:[%s4814_s19 + $0x88] sm:$0xff]  }
  0xf6   : > { %4240 = vlog2.f32 %v5839_v43  ;;  %v1360_v4 = vsel %vm1328_vm2, %v1312_v6, %v1344_v39  ;;  %v2041_v58 = vmul.f32 %v5824_v56, %v5746_v55  ;;  %v8834_v57 = vunpack.c.h.bf16 %v5655_v9  ;;  %v5876_v9 = vld [vmem:[%s4808_s26 + $0x110] sm:$0xff] }
  0xf7   : > { %v1176_v36 = vmul.f32 %v8833_v22, %v5681_v37  ;;  %4242 = vlog2.f32 %v5844_v27  ;;  %v1361_v20 = vsel %vm1329_vm3, %v1313_v0, %v1345_v32  ;;  %v1303_v53 = vmul.f32 %v4217_v5, %v1287_v29 }
  0xf8   : > { %v1177_v35 = vmul.f32 %v8834_v57, %v5692_v40  ;;  %4244 = vpow2.f32 %v1670_v54  ;;  %v8644_v28 = vunpack.c.h.bf16 %v5568_v31  ;;  %v1334_v6 = vmul.f32 %v5668_v41, %v1302_v63 }
  0xf9   : > { %4246 = vpow2.f32 %v1672_v45  ;;  %v2042_v38 = vsub.f32 2.0, %v2026_v21  ;;  %v5873_v17 = vsub.f32 %v1160_v7, %v1176_v36  ;;  %v1664_v39 = vmul.f32 10.0, %v1360_v4 }
  0xfa   : > { %v8643_v22 = vunpack.c.l.bf16 %v5864_v59  ;;  %vm2123_vm6 = vcmp.gt.f32.partialorder %v8644_v28, 0.5  ;;  %v1835_v54 = vand.u32 2147483647, %v5867_v15  ;;  %v1665_v0 = vmul.f32 10.0, %v1361_v20 }
  0xfb   : > { %v2057_v5 = vsub.f32 2.0, %v2041_v58  ;;  %v5882_v32 = vsub.f32 %v1161_v18, %v1177_v35  ;;  %v5885_v45 = vsel %vm2123_vm6, 1.0, %v8757_v12  ;;  %v4231_v41 = vpop.eup %4230  ;;  %v1335_v7 = vmul.f32 %v5672_v33, %v1303_v53 }
  0xfc   : > { %8835 = vst [vmem:[#allocation61_spill] sm:$0xff] %v5885_v45  ;;  %vm2074_vm7 = vcmp.ge.f32.partialorder %v5584_v48, 0.0  ;;  %vm2124_vm8 = vcmp.gt.f32.partialorder %v8643_v22, 0.5  ;;  %v1836_v21 = vand.u32 2147483647, %v5876_v9  ;;  %v5893_v36 = vpop.eup %4232  ;;  %v1350_v18 = vsel %vm1318_vm4, %v1302_v63, %v1334_v6  ;;  %v5909_v63 = vld [vmem:[%s4814_s19 + $0x68] sm:$0xff]  }
  0xfd   : > { %v2058_v4 = vmul.f32 %v4223_v14, %v2042_v38  ;;  %v5898_v58 = vsel %vm2124_vm8, 1.0, %v8757_v12  ;;  %v1851_v33 = vsub.f32 0.0, %v1835_v54  ;;  %v5900_v57 = vpop.eup %4234  ;;  %v1694_v35 = vmul.f32 1.442695, %v1664_v39  ;;  %v5919_v54 = vld [vmem:[%s4808_s26 + $0xd0] sm:$0xff] }
  0xfe   : > { %8836 = vst [vmem:[#allocation62_spill] sm:$0xff] %v5898_v58  ;;  %8837 = vst [vmem:[#allocation63_spill] sm:$0xff] %v5900_v57  ;;  %vm2089_vm9 = vcmp.ge.f32.partialorder %v5592_v34, 0.0  ;;  %4248 = vrcp.f32 %v5839_v43  ;;  %v5906_v20 = vpack.i.bf16 %v5898_v58, %v5885_v45  ;;  %v1852_v52 = vsub.f32 0.0, %v1836_v21  ;;  %v5911_v14 = vpop.eup %4236 }
  0xff   : > { %v1696_v6 = vmul.f32 1.442695, %v1665_v0  ;;  %v2073_v38 = vmul.f32 %v5824_v56, %v2057_v5  ;;  %4250 = vrcp.f32 %v5844_v27  ;;  %v5916_v39 = vadd.f32 1.0, %v5893_v36  ;;  %v5921_v22 = vpop.eup %4238  ;;  %v5931_v56 = vld [vmem:[%s4808_s26 + $0xd8] sm:$0xff] }
 0x100   : > { %8838 = vst [vmem:[#allocation64_spill] sm:$0xff] %v5921_v22  ;;  %v1351_v28 = vsel %vm1319_vm5, %v1303_v53, %v1335_v7  ;;  %v1654_v21 = vmul.f32 10.0, %v1350_v18  ;;  %v1963_v29 = vmul.f32 0.6931472, %v4231_v41  ;;  %v5926_v55 = vadd.f32 1.0, %v5911_v14  ;;  %3897 = vrot.lane.b32.xlu0 %v5906_v20, %s4664_s18 }
 0x101   : > { %v2090_v0 = vmul.f32 %v5713_v2, %v2058_v4  ;;  %4252 = vlog2.f32 %v5916_v39  ;;  %v1868_v5 = vmul.f32 1.442695, %v1851_v33  ;;  %v8648_v13 = vunpack.c.l.bf16 %v5909_v63 }
 0x102   : > { %4254 = vlog2.f32 %v5926_v55  ;;  %v1870_v19 = vmul.f32 1.442695, %v1852_v52  ;;  %v8650_v53 = vunpack.c.h.bf16 %v5909_v63  ;;  %v1084_v41 = vand.u32 2147483647, %v5919_v54 }
 0x103   : > { %v4241_v7 = vpop.eup %4240  ;;  %v2105_v18 = vmul.f32 %v5733_v44, %v2073_v38  ;;  %4256 = vrcp.f32 %v5916_v39  ;;  %vm1372_vm10 = vcmp.gt.f32.partialorder %v8648_v13, 0.5  ;;  %v1085_v2 = vand.u32 2147483647, %v5931_v56 }
 0x104   : > { %v4243_v33 = vpop.eup %4242  ;;  %v1215_v22 = vmul.f32 0.6931472, %v4241_v7  ;;  %4258 = vrcp.f32 %v5926_v55  ;;  %vm1373_vm11 = vcmp.gt.f32.partialorder %v8650_v53, 0.5  ;;  %v5948_v52 = vsel %vm1372_vm10, 1.0, %v8757_v12  ;;  %3902 = vrot.lane.b32.xlu0 %v5906_v20, %s4665_s23 }
 0x105   : > { %8839 = vst [vmem:[#allocation65_spill] sm:$0xff] %v5948_v52  ;;  %v5950_v57 = vpop.eup %4244  ;;  %v1217_v44 = vmul.f32 0.6931472, %v4243_v33  ;;  %4260 = vpow2.f32 %v1868_v5  ;;  %v5953_v58 = vsel %vm1373_vm11, 1.0, %v8757_v12  ;;  %v1100_v13 = vsub.f32 0.0, %v1084_v41 }
 0x106   : > { %8840 = vst [vmem:[#allocation66_spill] sm:$0xff] %v5950_v57  ;;  %8841 = vst [vmem:[#allocation67_spill] sm:$0xff] %v5953_v58  ;;  %v5955_v45 = vpop.eup %4246  ;;  %v1655_v10 = vmul.f32 10.0, %v1351_v28  ;;  %v1240_v7 = vadd.f32 %v1215_v22, %v5873_v17  ;;  %4262 = vpow2.f32 %v1870_v19  ;;  %v5960_v53 = vpack.i.bf16 %v5953_v58, %v5948_v52 }
 0x107   : > { %8842 = vst [vmem:[#allocation68_spill] sm:$0xff] %v5955_v45  ;;  %v2106_v57 = vsel %vm2074_vm7, %v2058_v4, %v2090_v0  ;;  %v1241_v5 = vadd.f32 %v1217_v44, %v5882_v32  ;;  %v1101_v33 = vsub.f32 0.0, %v1085_v2  ;;  %v1126_v61 = vmul.f32 1.442695, %v1100_v13 }
 0x108   : > { %v1719_v41 = vadd.f32 %v5822_v23, %v1240_v7  ;;  %v1163_v45 = vmax.f32 %v5777_v30, 0.0  ;;  %v8843_v28 = vunpack.c.l.bf16 %v5765_v26  ;;  %v8844_v22 = vunpack.c.h.bf16 %v5765_v26  ;;  %3832 = vrot.lane.b32.xlu1 %v5960_v53, %s4664_s18  ;;  %v5978_v23 = vld [vmem:[%s4814_s19 + $0x70] sm:$0xff]  }
 0x109   : > { %v1674_v48 = vmul.f32 1.442695, %v1654_v21  ;;  %v2121_v32 = vsel %vm2089_vm9, %v2073_v38, %v2105_v18  ;;  %4264 = vpow2.f32 %v1126_v61  ;;  %v1128_v13 = vmul.f32 1.442695, %v1101_v33 }
 0x10a   : > { %v1178_v17 = vmul.f32 %v8843_v28, %v5774_v60  ;;  %v1179_v19 = vmul.f32 %v8844_v22, %v5777_v30  ;;  %v8845_v4 = vmax.f32 %v5432_v24, 0.0  ;;  %4266 = vpow2.f32 %v1694_v35 }
 0x10b   : > { %v2410_v2 = vmul.f32 10.0, %v2106_v57  ;;  %v1720_v26 = vadd.f32 %v1719_v41, %v1241_v5  ;;  %v4249_v44 = vpop.eup %4248  ;;  %v5987_v7 = vadd.f32 %v5849_v46, %v5820_v42  ;;  %v1676_v21 = vmul.f32 1.442695, %v1655_v10 }
 0x10c   : > { %v5983_v0 = vsub.f32 %v8845_v4, %v5761_v1  ;;  %4268 = vpow2.f32 %v1128_v13  ;;  %v4251_v61 = vpop.eup %4250  ;;  %v2425_v34 = vmul.f32 10.0, %v2121_v32  ;;  %v8652_v38 = vunpack.c.l.bf16 %v5978_v23  ;;  %v6026_v32 = vld [vmem:[%s4808_s26 + $0xe8] sm:$0xff] }
 0x10d   : > { %8847 = vst [vmem:[#allocation70_spill] sm:$0xff] %v5987_v7  ;;  %4270 = vpow2.f32 %v1696_v6  ;;  %v8651_v24 = vunpack.c.h.bf16 %v5978_v23  ;;  %v5992_v1 = vadd.f32 %v1963_v29, %v5851_v62  ;;  %v8848_v57 = vmax.f32 %v5774_v60, 0.0  ;;  %v6004_v62 = vld [vmem:[%s4808_s26 + $0xe0] sm:$0xff] }
 0x10e   : > { %8846 = vst [vmem:[#allocation69_spill] sm:$0xff] %v5983_v0  ;;  %4272 = vpow2.f32 %v1674_v48  ;;  %v1195_v18 = vsub.f32 %v1163_v45, %v1179_v19  ;;  %v4253_v10 = vpop.eup %4252  ;;  %v2426_v42 = vmul.f32 1.442695, %v2410_v2  ;;  %v1272_v46 = vmul.f32 %v4249_v44, %v5839_v43 }
 0x10f   : > { %v1194_v35 = vsub.f32 %v8848_v57, %v1178_v17  ;;  %vm1374_vm12 = vcmp.gt.f32.partialorder %v8652_v38, 0.5  ;;  %vm1375_vm13 = vcmp.gt.f32.partialorder %v8651_v24, 0.5  ;;  %v4255_v29 = vpop.eup %4254  ;;  %4274 = vpow2.f32 %v1676_v21 }
 0x110   : > { %v1273_v45 = vmul.f32 %v4251_v61, %v5844_v27  ;;  %v1219_v6 = vmul.f32 0.6931472, %v4253_v10  ;;  %v6008_v20 = vsel %vm1374_vm12, 1.0, %v8757_v12  ;;  %v6010_v5 = vpop.eup %4256  ;;  %v2456_v43 = vmul.f32 1.442695, %v2425_v34 }
 0x111   : > { %8849 = vst [vmem:[#allocation71_spill] sm:$0xff] %v6008_v20  ;;  %v1221_v33 = vmul.f32 0.6931472, %v4255_v29  ;;  %v1915_v41 = vmax.f32 %v5867_v15, 0.0  ;;  %v6014_v28 = vsel %vm1375_vm13, 1.0, %v8757_v12  ;;  %v6016_v17 = vpop.eup %4258  ;;  %v8851_v19 = vunpack.c.h.bf16 %v5568_v31 }
 0x112   : > { %8850 = vst [vmem:[#allocation72_spill] sm:$0xff] %v6014_v28  ;;  %v1242_v22 = vadd.f32 %v1219_v6, %v1194_v35  ;;  %v6023_v48 = vpack.i.bf16 %v6014_v28, %v6008_v20  ;;  %v1086_v13 = vand.u32 2147483647, %v6004_v62  ;;  %v6029_v4 = vpop.eup %4260  ;;  %4276 = vpow2.f32 %v2426_v42  ;;  %v6097_v20 = vld [vmem:[%s4808_s26 + $0x1f8] sm:$0xff] }
 0x113   : > { %v1931_v27 = vmul.f32 %v8851_v19, %v5867_v15  ;;  %v1288_v2 = vsub.f32 2.0, %v1272_v46  ;;  %v1243_v21 = vadd.f32 %v1221_v33, %v1195_v18  ;;  %v6032_v57 = vpop.eup %4262  ;;  %v1289_v35 = vsub.f32 2.0, %v1273_v45  ;;  %8857 = vst [vmem:[#allocation76_spill] sm:$0xff] %v6097_v20 }
 0x114   : > { %vm1320_vm14 = vcmp.ge.f32.partialorder %v5681_v37, 0.0  ;;  %v1721_v31 = vadd.f32 %v1720_v26, %v1242_v22  ;;  %v6036_v10 = vadd.f32 1.0, %v6029_v4  ;;  %v8852_v29 = vunpack.c.l.bf16 %v5864_v59  ;;  %3837 = vrot.lane.b32.xlu1 %v6023_v48, %s4664_s18 }
 0x115   : > { %4278 = vpow2.f32 %v2456_v43  ;;  %vm1321_vm15 = vcmp.ge.f32.partialorder %v5692_v40, 0.0  ;;  %v1274_v18 = vmul.f32 %v6010_v5, %v5916_v39  ;;  %v6047_v42 = vadd.f32 1.0, %v6032_v57 }
 0x116   : > { %v1932_v6 = vmul.f32 %v8852_v29, %v5876_v9  ;;  %v1087_v26 = vand.u32 2147483647, %v6026_v32  ;;  %v6050_v46 = vadd.f32 %v1721_v31, %v1243_v21  ;;  %v6052_v45 = vsub.f32 %v1915_v41, %v1931_v27  ;;  %v6055_v22 = vpop.eup %4264  ;;  %v6062_v29 = vld [vmem:[%s4814_s19 + $0xc0] sm:$0xff]  }
 0x117   : > { %4280 = vlog2.f32 %v6036_v10  ;;  %v1102_v33 = vsub.f32 0.0, %v1086_v13  ;;  %v1304_v43 = vmul.f32 %v4249_v44, %v1288_v2  ;;  %v1275_v39 = vmul.f32 %v6016_v17, %v5926_v55  ;;  %v6064_v21 = vpop.eup %4266  ;;  %v6072_v13 = vld [vmem:[%s4814_s19 + $0xf8] sm:$0xff]  }
 0x118   : > { %4282 = vlog2.f32 %v6047_v42  ;;  %v1164_v19 = vmax.f32 %v5919_v54, 0.0  ;;  %8853 = vst [vmem:[#allocation73_spill] sm:$0xff] %v6064_v21  ;;  %v1305_v41 = vmul.f32 %v4251_v61, %v1289_v35  ;;  %v6068_v27 = vadd.f32 1.0, %v6055_v22  ;;  %v6081_v35 = vld [vmem:[%s4808_s26 + $0x180] sm:$0xff]  ;;  %3842 = vrot.lane.b32.xlu1 %v5491_v49, %s4664_s18 }
 0x119   : > { %4284 = vrcp.f32 %v6036_v10  ;;  %v1165_v44 = vmax.f32 %v5931_v56, 0.0  ;;  %v6074_v2 = vpop.eup %4268  ;;  %v1290_v55 = vsub.f32 2.0, %v1274_v18  ;;  %v8854_v31 = vunpack.c.l.bf16 %v5909_v63 }
 0x11a   : > { %4286 = vrcp.f32 %v6047_v42  ;;  %v1103_v61 = vsub.f32 0.0, %v1087_v26  ;;  %v6083_v38 = vpop.eup %4270  ;;  %vm1322_vm0 = vcmp.ge.f32.partialorder %v5774_v60, 0.0  ;;  %v6087_v34 = vadd.f32 1.0, %v6074_v2 }
 0x11b   : > { %v1180_v24 = vmul.f32 %v8854_v31, %v5919_v54  ;;  %8855 = vst [vmem:[#allocation74_spill] sm:$0xff] %v6083_v38  ;;  %4288 = vlog2.f32 %v6068_v27  ;;  %v1130_v18 = vmul.f32 1.442695, %v1102_v33  ;;  %v8657_v0 = vunpack.c.l.bf16 %v6062_v29  ;;  %v6091_v7 = vpop.eup %4272 }
 0x11c   : > { %8856 = vst [vmem:[#allocation75_spill] sm:$0xff] %v6091_v7  ;;  %v1336_v21 = vmul.f32 %v5831_v3, %v1304_v43  ;;  %v1291_v31 = vsub.f32 2.0, %v1275_v39  ;;  %4290 = vrcp.f32 %v6068_v27  ;;  %v8658_v26 = vunpack.c.h.bf16 %v6072_v13  ;;  %v6104_v58 = vpop.eup %4274  ;;  %3852 = vrot.lane.b32.xlu1 %v5423_v25, %s4665_s23 }
 0x11d   : > { %v1337_v28 = vmul.f32 %v5835_v11, %v1305_v41  ;;  %4292 = vlog2.f32 %v6087_v34  ;;  %vm2882_vm1 = vcmp.gt.f32.partialorder %v8657_v0, 0.5  ;;  %v2594_v33 = vand.u32 2147483647, %v6081_v35  ;;  %8858 = vst [vmem:[#allocation77_spill] sm:$0xff] %v6104_v58 }
 0x11e   : > { %v1306_v3 = vmul.f32 %v6010_v5, %v1290_v55  ;;  %v1132_v39 = vmul.f32 1.442695, %v1103_v61  ;;  %vm2897_vm2 = vcmp.gt.f32.partialorder %v8658_v26, 0.5  ;;  %v6110_v52 = vsel %vm2882_vm1, 1.0, %v8757_v12 }
 0x11f   : > { %vm1323_vm3 = vcmp.ge.f32.partialorder %v5777_v30, 0.0  ;;  %v8859_v11 = vunpack.c.h.bf16 %v5909_v63  ;;  %4294 = vpow2.f32 %v1130_v18  ;;  %v6117_v0 = vsel %vm2897_vm2, 1.0, %v8757_v12  ;;  %v6125_v38 = vpop.eup %4276 }
 0x120   : > { %v2609_v5 = vand.u32 2147483647, %v6097_v20  ;;  %v1352_v55 = vsel %vm1320_vm14, %v1304_v43, %v1336_v21  ;;  %v1307_v61 = vmul.f32 %v6016_v17, %v1291_v31  ;;  %v3906_v26 = vpack.i.bf16 %v6117_v0, %v6110_v52  ;;  %v6135_v21 = vld [vmem:[%s4814_s19 + $0xc8] sm:$0xff]   ;;  %3857 = vrot.lane.b32.xlu1 %v5578_v8, %s4665_s23 }
 0x121   : > { %v1181_v7 = vmul.f32 %v8859_v11, %v5931_v56  ;;  %v2610_v58 = vsub.f32 0.0, %v2594_v33  ;;  %v1353_v63 = vsel %vm1321_vm15, %v1305_v41, %v1337_v28  ;;  %v8860_v18 = vmax.f32 %v5876_v9, 0.0  ;;  %v6140_v41 = vld [vmem:[%s4808_s26 + $0x188] sm:$0xff] }
 0x122   : > { %4296 = vrcp.f32 %v6087_v34  ;;  %v2625_v51 = vsub.f32 0.0, %v2609_v5  ;;  %v1338_v37 = vmul.f32 %v5893_v36, %v1306_v3  ;;  %v1196_v43 = vsub.f32 %v1164_v19, %v1180_v24  ;;  %3907 = vrot.lane.b32.xlu0 %v3906_v26, %s4664_s18  ;;  %v6137_v31 = vpop.eup %4278 }
 0x123   : > { %v1948_v11 = vsub.f32 %v8860_v18, %v1932_v6  ;;  %4298 = vpow2.f32 %v1132_v39  ;;  %v2626_v17 = vmul.f32 1.442695, %v2610_v58  ;;  %8861 = vst [vmem:[#allocation78_spill] sm:$0xff] %v6137_v31  ;;  %v1656_v33 = vmul.f32 10.0, %v1352_v55 }
 0x124   : > { %v1197_v40 = vsub.f32 %v1165_v44, %v1181_v7  ;;  %v2656_v28 = vmul.f32 1.442695, %v2625_v51  ;;  %v4281_v6 = vpop.eup %4280  ;;  %v1657_v18 = vmul.f32 10.0, %v1353_v63  ;;  %v1339_v5 = vmul.f32 %v5911_v14, %v1307_v61  ;;  %3862 = vrot.lane.b32.xlu1 %v5710_v16, %s4665_s23 }
 0x125   : > { %4300 = vpow2.f32 %v2626_v17  ;;  %v4283_v36 = vpop.eup %4282  ;;  %v1965_v24 = vmul.f32 0.6931472, %v4281_v6  ;;  %v8660_v58 = vunpack.c.h.bf16 %v6062_v29  ;;  %v8659_v19 = vunpack.c.l.bf16 %v6135_v21 }
 0x126   : > { %v4285_v39 = vpop.eup %4284  ;;  %v1354_v51 = vsel %vm1322_vm0, %v1306_v3, %v1338_v37  ;;  %v1967_v7 = vmul.f32 0.6931472, %v4283_v36  ;;  %4302 = vpow2.f32 %v2656_v28  ;;  %3912 = vrot.lane.b32.xlu0 %v3906_v26, %s4665_s23  ;;  %v2595_v14 = vand.u32 2147483647, %v6140_v41 }
 0x127   : > { %v4287_v44 = vpop.eup %4286  ;;  %v1995_v55 = vadd.f32 %v1965_v24, %v6052_v45  ;;  %v2027_v63 = vmul.f32 %v4285_v39, %v6036_v10  ;;  %vm2883_vm4 = vcmp.gt.f32.partialorder %v8660_v58, 0.5  ;;  %vm2884_vm5 = vcmp.gt.f32.partialorder %v8659_v19, 0.5 }
 0x128   : > { %v4289_v49 = vpop.eup %4288  ;;  %v1996_v60 = vadd.f32 %v1967_v7, %v1948_v11  ;;  %v2028_v3 = vmul.f32 %v4287_v44, %v6047_v42  ;;  %v6159_v37 = vsel %vm2883_vm4, 1.0, %v8757_v12  ;;  %v6162_v26 = vsel %vm2884_vm5, 1.0, %v8757_v12  ;;  %3867 = vrot.lane.b32.xlu1 %v5806_v50, %s4665_s23 }
 0x129   : > { %8862 = vst [vmem:[#allocation79_spill] sm:$0xff] %v6162_v26  ;;  %v4291_v45 = vpop.eup %4290  ;;  %v2474_v10 = vadd.f32 %v1995_v55, %v5992_v1  ;;  %v1223_v17 = vmul.f32 0.6931472, %v4289_v49  ;;  %v6169_v28 = vpack.i.bf16 %v6162_v26, %v6159_v37  ;;  %v1355_v42 = vsel %vm1323_vm3, %v1307_v61, %v1339_v5  ;;  %v6177_v55 = vld [vmem:[%s4808_s26 + $0x190] sm:$0xff] }
 0x12a   : > { %v4293_v11 = vpop.eup %4292  ;;  %v2043_v6 = vsub.f32 2.0, %v2027_v63  ;;  %v2044_v36 = vsub.f32 2.0, %v2028_v3  ;;  %v2611_v24 = vsub.f32 0.0, %v2595_v14  ;;  %v1276_v1 = vmul.f32 %v4291_v45, %v6068_v27 }
 0x12b   : > { %v6173_v7 = vadd.f32 %v2474_v10, %v1996_v60  ;;  %v1225_v19 = vmul.f32 0.6931472, %v4293_v11  ;;  %v1244_v58 = vadd.f32 %v1223_v17, %v1196_v43  ;;  %3917 = vrot.lane.b32.xlu0 %v6169_v28, %s4664_s18  ;;  %v1678_v49 = vmul.f32 1.442695, %v1656_v33 }
 0x12c   : > { %v6181_v25 = vpop.eup %4294  ;;  %v1658_v31 = vmul.f32 10.0, %v1354_v51  ;;  %v1166_v30 = vmax.f32 %v6004_v62, 0.0  ;;  %v2628_v61 = vmul.f32 1.442695, %v2611_v24  ;;  %v1659_v5 = vmul.f32 10.0, %v1355_v42  ;;  %3872 = vrot.lane.b32.xlu1 %v5960_v53, %s4665_s23 }
 0x12d   : > { %v1245_v14 = vadd.f32 %v1225_v19, %v1197_v40  ;;  %v1723_v63 = vadd.f32 %v6050_v46, %v1244_v58  ;;  %v6186_v43 = vadd.f32 1.0, %v6181_v25  ;;  %v1680_v60 = vmul.f32 1.442695, %v1657_v18 }
 0x12e   : > { %v2059_v3 = vmul.f32 %v4285_v39, %v2043_v6  ;;  %v2596_v10 = vand.u32 2147483647, %v6177_v55  ;;  %4304 = vpow2.f32 %v2628_v61  ;;  %v2060_v51 = vmul.f32 %v4287_v44, %v2044_v36 }
 0x12f   : > { %v4297_v27 = vpop.eup %4296  ;;  %v1292_v17 = vsub.f32 2.0, %v1276_v1  ;;  %v6193_v11 = vadd.f32 %v1723_v63, %v1245_v14  ;;  %4306 = vlog2.f32 %v6186_v43  ;;  %v1682_v46 = vmul.f32 1.442695, %v1658_v31  ;;  %v6228_v63 = vld [vmem:[%s4808_s26 + $0x198] sm:$0xff]  ;;  %3922 = vrot.lane.b32.xlu0 %v6169_v28, %s4665_s23 }
 0x130   : > { %v6191_v33 = vpop.eup %4298  ;;  %v1167_v40 = vmax.f32 %v6026_v32, 0.0  ;;  %v8863_v8 = vunpack.c.l.bf16 %v5978_v23  ;;  %v8864_v18 = vunpack.c.h.bf16 %v5978_v23  ;;  %v1684_v42 = vmul.f32 1.442695, %v1659_v5  ;;  %3877 = vrot.lane.b32.xlu1 %v6023_v48, %s4665_s23 }
 0x131   : > { %vm2075_vm6 = vcmp.ge.f32.partialorder %v5867_v15, 0.0  ;;  %v1277_v44 = vmul.f32 %v4297_v27, %v6087_v34  ;;  %4308 = vrcp.f32 %v6186_v43  ;;  %v2091_v31 = vmul.f32 %v6029_v4, %v2059_v3 }
 0x132   : > { %v1182_v58 = vmul.f32 %v8863_v8, %v6004_v62  ;;  %v1183_v19 = vmul.f32 %v8864_v18, %v6026_v32  ;;  %v6203_v39 = vpop.eup %4300  ;;  %4310 = vpow2.f32 %v1678_v49  ;;  %v6210_v6 = vadd.f32 1.0, %v6191_v33 }
 0x133   : > { %v2612_v36 = vsub.f32 0.0, %v2596_v10  ;;  %v6212_v24 = vpop.eup %4302  ;;  %4312 = vpow2.f32 %v1680_v60  ;;  %vm2076_vm7 = vcmp.ge.f32.partialorder %v5876_v9, 0.0  ;;  %v2092_v23 = vmul.f32 %v6032_v57, %v2060_v51 }
 0x134   : > { %v1308_v1 = vmul.f32 %v4291_v45, %v1292_v17  ;;  %4314 = vpow2.f32 %v1682_v46  ;;  %vm1324_vm8 = vcmp.ge.f32.partialorder %v5919_v54, 0.0  ;;  %v1198_v34 = vsub.f32 %v1166_v30, %v1182_v58 }
 0x135   : > { %v6217_v49 = vsub.f32 %v1167_v40, %v1183_v19  ;;  %4316 = vpow2.f32 %v1684_v42  ;;  %v1293_v4 = vsub.f32 2.0, %v1277_v44  ;;  %v2107_v14 = vsel %vm2075_vm6, %v2059_v3, %v2091_v31  ;;  %v6277_v31 = vld [vmem:[%s4814_s19 + $0x90] sm:$0xff]  }
 0x136   : > { %4318 = vrcp.f32 %v6210_v6  ;;  %v6225_v57 = vadd.f32 1.0, %v6203_v39  ;;  %v2630_v45 = vmul.f32 1.442695, %v2612_v36  ;;  %v2108_v30 = vsel %vm2076_vm7, %v2060_v51, %v2092_v23 }
 0x137   : > { %vm1325_vm9 = vcmp.ge.f32.partialorder %v5931_v56, 0.0  ;;  %v1340_v60 = vmul.f32 %v6055_v22, %v1308_v1  ;;  %v6235_v10 = vadd.f32 1.0, %v6212_v24  ;;  %v8661_v15 = vunpack.c.h.bf16 %v5864_v59 }
 0x138   : > { %4320 = vlog2.f32 %v6225_v57  ;;  %v8662_v3 = vunpack.c.h.bf16 %v6135_v21  ;;  %v2411_v17 = vmul.f32 10.0, %v2107_v14  ;;  %v1309_v46 = vmul.f32 %v4297_v27, %v1293_v4  ;;  %v6256_v27 = vld [vmem:[%s4808_s26 + $0x118] sm:$0xff] }
 0x139   : > { %8865 = vst [vmem:[#allocation80_spill] sm:$0xff] %v6235_v10  ;;  %v8866_v9 = vunpack.c.l.bf16 %v6062_v29  ;;  %v2597_v22 = vand.u32 2147483647, %v6228_v63  ;;  %v2412_v40 = vmul.f32 10.0, %v2108_v30  ;;  %4322 = vrcp.f32 %v6225_v57 }
 0x13a   : > { %vm2125_vm10 = vcmp.gt.f32.partialorder %v8661_v15, 0.5  ;;  %vm2885_vm11 = vcmp.gt.f32.partialorder %v8662_v3, 0.5  ;;  %4324 = vrcp.f32 %v6235_v10  ;;  %v1356_v19 = vsel %vm1324_vm8, %v1308_v1, %v1340_v60 }
 0x13b   : > { %v6243_v51 = vmul.f32 %v8866_v9, %v6081_v35  ;;  %v6258_v8 = vpop.eup %4304  ;;  %v6262_v28 = vsel %vm2125_vm10, 1.0, %v8757_v12  ;;  %v2613_v58 = vsub.f32 0.0, %v2597_v22  ;;  %v6265_v18 = vsel %vm2885_vm11, 1.0, %v8757_v12 }
 0x13c   : > { %8867 = vst [vmem:[#allocation81_spill] sm:$0xff] %v6262_v28  ;;  %8868 = vst [vmem:[#allocation82_spill] sm:$0xff] %v6265_v18  ;;  %v4307_v16 = vpop.eup %4306  ;;  %4326 = vpow2.f32 %v2630_v45  ;;  %v6270_v42 = vadd.f32 1.0, %v6258_v8  ;;  %v6274_v44 = vpack.i.bf16 %v6265_v18, %v6262_v28  ;;  %v1837_v4 = vand.u32 2147483647, %v6256_v27  ;;  %v6286_v45 = vld [vmem:[%s4814_s19 + $0xd0] sm:$0xff]  }
 0x13d   : > { %v1227_v36 = vmul.f32 0.6931472, %v4307_v16  ;;  %4328 = vlog2.f32 %v6210_v6  ;;  %v2632_v23 = vmul.f32 1.442695, %v2613_v58  ;;  %v2428_v54 = vmul.f32 1.442695, %v2411_v17 }
 0x13e   : > { %v4309_v14 = vpop.eup %4308  ;;  %v1341_v1 = vmul.f32 %v6074_v2, %v1309_v46  ;;  %4330 = vlog2.f32 %v6270_v42  ;;  %3927 = vrot.lane.b32.xlu0 %v6274_v44, %s4664_s18  ;;  %v1853_v22 = vsub.f32 0.0, %v1837_v4  ;;  %v6293_v58 = vld [vmem:[%s4808_s26 + $0x1a0] sm:$0xff]  ;;  %v1660_v2 = vmul.f32 10.0, %v1356_v19  ;;  %3932 = vrot.lane.b32.xlu1 %v6274_v44, %s4665_s23 }
 0x13f   : > { %v6288_v30 = vpop.eup %4310  ;;  %v1246_v60 = vadd.f32 %v1227_v36, %v1198_v34  ;;  %v1278_v9 = vmul.f32 %v4309_v14, %v6186_v43  ;;  %4332 = vrcp.f32 %v6270_v42  ;;  %v8871_v16 = vunpack.c.h.bf16 %v6072_v13 }
 0x140   : > { %8869 = vst [vmem:[#allocation83_spill] sm:$0xff] %v6288_v30  ;;  %v6295_v17 = vpop.eup %4312  ;;  %4334 = vpow2.f32 %v2632_v23  ;;  %v8663_v43 = vunpack.c.l.bf16 %v6277_v31  ;;  %vm1326_vm12 = vcmp.ge.f32.partialorder %v6004_v62, 0.0  ;;  %v1872_v19 = vmul.f32 1.442695, %v1853_v22 }
 0x141   : > { %8870 = vst [vmem:[#allocation84_spill] sm:$0xff] %v6295_v17  ;;  %v6300_v5 = vmul.f32 %v8871_v16, %v6097_v20  ;;  %v6305_v34 = vpop.eup %4314  ;;  %v1294_v36 = vsub.f32 2.0, %v1278_v9  ;;  %v6309_v4 = vadd.f32 %v6193_v11, %v1246_v60  ;;  %4336 = vpow2.f32 %v2428_v54  ;;  %v6320_v9 = vld [vmem:[%s4808_s26 + $0x120] sm:$0xff] }
 0x142   : > { %8873 = vst [vmem:[#allocation86_spill] sm:$0xff] %v6305_v34  ;;  %v6312_v15 = vpop.eup %4316  ;;  %v1357_v23 = vsel %vm1325_vm9, %v1309_v46, %v1341_v1  ;;  %vm2126_vm13 = vcmp.gt.f32.partialorder %v8663_v43, 0.5  ;;  %v2598_v50 = vand.u32 2147483647, %v6293_v58  ;;  %v2430_v3 = vmul.f32 1.442695, %v2412_v40 }
 0x143   : > { %8872 = vst [vmem:[#allocation85_spill] sm:$0xff] %v6300_v5  ;;  %8874 = vst [vmem:[#allocation87_spill] sm:$0xff] %v6309_v4  ;;  %v4319_v16 = vpop.eup %4318  ;;  %v2675_v11 = vmax.f32 %v6140_v41, 0.0  ;;  %v8876_v60 = vunpack.c.h.bf16 %v6062_v29  ;;  %4338 = vpow2.f32 %v1872_v19  ;;  %v1310_v56 = vmul.f32 %v4309_v14, %v1294_v36 }
 0x144   : > { %8875 = vst [vmem:[#allocation88_spill] sm:$0xff] %v6312_v15  ;;  %v1279_v54 = vmul.f32 %v4319_v16, %v6210_v6  ;;  %v6328_v46 = vsel %vm2126_vm13, 1.0, %v8757_v12  ;;  %v2614_v1 = vsub.f32 0.0, %v2598_v50  ;;  %v1661_v61 = vmul.f32 10.0, %v1357_v23 }
 0x145   : > { %v2691_v22 = vmul.f32 %v8876_v60, %v6140_v41  ;;  %8877 = vst [vmem:[#allocation89_spill] sm:$0xff] %v6328_v46  ;;  %v4321_v43 = vpop.eup %4320  ;;  %v2676_v13 = vmax.f32 %v6177_v55, 0.0  ;;  %v8878_v40 = vunpack.c.l.bf16 %v6286_v45  ;;  %v1838_v5 = vand.u32 2147483647, %v6320_v9 }
 0x146   : > { %v1686_v4 = vmul.f32 1.442695, %v1660_v2  ;;  %v8879_v29 = vunpack.c.l.bf16 %v6135_v21  ;;  %v2634_v6 = vmul.f32 1.442695, %v2614_v1  ;;  %v4323_v36 = vpop.eup %4322  ;;  %4340 = vpow2.f32 %v2430_v3 }
 0x147   : > { %vm2886_vm14 = vcmp.gt.f32.partialorder %v8878_v40, 0.5  ;;  %v8881_v23 = vmax.f32 %v6081_v35, 0.0  ;;  %v1854_v40 = vsub.f32 0.0, %v1838_v5  ;;  %v4325_v18 = vpop.eup %4324  ;;  %v1295_v2 = vsub.f32 2.0, %v1279_v54 }
 0x148   : > { %v2692_v19 = vmul.f32 %v8879_v29, %v6177_v55  ;;  %v6338_v14 = vsel %vm2886_vm14, 1.0, %v8757_v12  ;;  %v1342_v28 = vmul.f32 %v6181_v25, %v1310_v56  ;;  %v2723_v15 = vmul.f32 0.6931472, %v4321_v43 }
 0x149   : > { %8880 = vst [vmem:[#allocation90_spill] sm:$0xff] %v6338_v14  ;;  %v2706_v50 = vsub.f32 %v8881_v23, %v6243_v51  ;;  %v3936_v60 = vpack.i.bf16 %v6338_v14, %v6328_v46  ;;  %v2707_v29 = vsub.f32 %v2675_v11, %v2691_v22  ;;  %v6346_v1 = vpop.eup %4326  ;;  %v2786_v34 = vmul.f32 %v4323_v36, %v6225_v57 }
 0x14a   : > { %v2801_v3 = vmul.f32 %v4325_v18, %v6235_v10  ;;  %4342 = vpow2.f32 %v2634_v6  ;;  %v1874_v17 = vmul.f32 1.442695, %v1854_v40  ;;  %v4329_v51 = vpop.eup %4328  ;;  %v1688_v23 = vmul.f32 1.442695, %v1661_v61 }
 0x14b   : > { %3937 = vrot.lane.b32.xlu0 %v3936_v60, %s4664_s18  ;;  %4344 = vpow2.f32 %v1686_v4  ;;  %vm1327_vm15 = vcmp.ge.f32.partialorder %v6026_v32, 0.0  ;;  %v6353_v5 = vadd.f32 1.0, %v6346_v1  ;;  %v6355_v25 = vsub.f32 %v2676_v13, %v2692_v19  ;;  %v4331_v43 = vpop.eup %4330 }
 0x14c   : > { %v2677_v11 = vmax.f32 %v6228_v63, 0.0  ;;  %v8882_v57 = vunpack.c.h.bf16 %v6135_v21  ;;  %4346 = vpow2.f32 %v1874_v17  ;;  %v4333_v54 = vpop.eup %4332  ;;  %v1358_v4 = vsel %vm1326_vm12, %v1310_v56, %v1342_v28 }
 0x14d   : > { %v2754_v61 = vadd.f32 %v2723_v15, %v2706_v50  ;;  %v2725_v6 = vmul.f32 0.6931472, %v4331_v43  ;;  %v8883_v40 = vunpack.c.h.bf16 %v5864_v59  ;;  %v6366_v13 = vpop.eup %4334  ;;  %v1311_v19 = vmul.f32 %v4319_v16, %v1295_v2 }
 0x14e   : > { %v2693_v22 = vmul.f32 %v8882_v57, %v6228_v63  ;;  %v2802_v14 = vsub.f32 2.0, %v2786_v34  ;;  %v2817_v46 = vsub.f32 2.0, %v2801_v3  ;;  %4348 = vlog2.f32 %v6353_v5  ;;  %v6377_v15 = vpop.eup %4336 }
 0x14f   : > { %v1933_v10 = vmul.f32 %v8883_v40, %v6256_v27  ;;  %vm2834_vm0 = vcmp.ge.f32.partialorder %v6081_v35, 0.0  ;;  %v2755_v62 = vadd.f32 %v2725_v6, %v2707_v29  ;;  %4350 = vrcp.f32 %v6353_v5  ;;  %3942 = vrot.lane.b32.xlu0 %v3936_v60, %s4665_s23  ;;  %v6461_v35 = vld [vmem:[%s4814_s19 + $0xd8] sm:$0xff]  }
 0x150   : > { %v2787_v21 = vmul.f32 %v4333_v54, %v6270_v42  ;;  %v6375_v59 = vadd.f32 1.0, %v6366_v13  ;;  %v1229_v28 = vmul.f32 0.6931472, %v4329_v51  ;;  %vm2849_vm1 = vcmp.ge.f32.partialorder %v6097_v20, 0.0  ;;  %v6382_v53 = vpop.eup %4338  ;;  %v6388_v42 = vld [vmem:[%s4808_s26 + $0x1a8] sm:$0xff] }
 0x151   : > { %v1917_v17 = vmax.f32 %v6256_v27, 0.0  ;;  %v2678_v34 = vmax.f32 %v6293_v58, 0.0  ;;  %v1662_v16 = vmul.f32 10.0, %v1358_v4  ;;  %v6384_v56 = vadd.f32 %v2755_v62, %v2754_v61  ;;  %v6423_v61 = vld [vmem:[%s4808_s26 + $0x128] sm:$0xff] }
 0x152   : > { %4352 = vlog2.f32 %v6375_v59  ;;  %v1343_v50 = vmul.f32 %v6191_v33, %v1311_v19  ;;  %v2818_v2 = vmul.f32 %v4323_v36, %v2802_v14  ;;  %v2833_v29 = vmul.f32 %v4325_v18, %v2817_v46 }
 0x153   : > { %v8884_v3 = vunpack.c.l.bf16 %v6286_v45  ;;  %v2803_v43 = vsub.f32 2.0, %v2787_v21  ;;  %4354 = vrcp.f32 %v6375_v59  ;;  %v6397_v57 = vadd.f32 1.0, %v6382_v53  ;;  %v6407_v36 = vpop.eup %4340 }
 0x154   : > { %v8669_v33 = vunpack.c.h.bf16 %v6277_v31  ;;  %4356 = vpow2.f32 %v1688_v23  ;;  %vm2835_vm2 = vcmp.ge.f32.partialorder %v6140_v41, 0.0  ;;  %v6403_v18 = vsub.f32 %v2677_v11, %v2693_v22  ;;  %8885 = vst [vmem:[#allocation91_spill] sm:$0xff] %v6407_v36 }
 0x155   : > { %v2694_v51 = vmul.f32 %v8884_v3, %v6293_v58  ;;  %v8670_v46 = vunpack.c.h.bf16 %v6286_v45  ;;  %v2599_v14 = vand.u32 2147483647, %v6388_v42  ;;  %v1690_v60 = vmul.f32 1.442695, %v1662_v16 }
 0x156   : > { %v6409_v4 = vsub.f32 %v1917_v17, %v1933_v10  ;;  %4358 = vlog2.f32 %v6397_v57  ;;  %vm2127_vm3 = vcmp.gt.f32.partialorder %v8669_v33, 0.5  ;;  %v6415_v48 = vadd.f32 %v1229_v28, %v6217_v49 }
 0x157   : > { %v1359_v23 = vsel %vm1327_vm15, %v1311_v19, %v1343_v50  ;;  %v2850_v11 = vmul.f32 %v6203_v39, %v2818_v2  ;;  %v6420_v22 = vsub.f32 %v2678_v34, %v2694_v51  ;;  %v6425_v6 = vpop.eup %4342  ;;  %v2865_v10 = vmul.f32 %v6212_v24, %v2833_v29 }
 0x158   : > { %8886 = vst [vmem:[#allocation92_spill] sm:$0xff] %v6415_v48  ;;  %v2819_v40 = vmul.f32 %v4333_v54, %v2803_v43  ;;  %v6429_v62 = vsel %vm2127_vm3, 1.0, %v8757_v12  ;;  %v2615_v21 = vsub.f32 0.0, %v2599_v14  ;;  %v6431_v49 = vpop.eup %4344  ;;  %4360 = vrcp.f32 %v6397_v57 }
 0x159   : > { %8887 = vst [vmem:[#allocation93_spill] sm:$0xff] %v6429_v62  ;;  %8888 = vst [vmem:[#allocation94_spill] sm:$0xff] %v6431_v49  ;;  %v6435_v32 = vadd.f32 1.0, %v6425_v6  ;;  %vm2887_vm4 = vcmp.gt.f32.partialorder %v8670_v46, 0.5  ;;  %v6440_v24 = vpop.eup %4346  ;;  %v1663_v54 = vmul.f32 10.0, %v1359_v23  ;;  %4362 = vpow2.f32 %v1690_v60  ;;  %v6458_v60 = vld [vmem:[%s4814_s19 + $0x98] sm:$0xff]  }
 0x15a   : > { %v6443_v19 = vsel %vm2887_vm4, 1.0, %v8757_v12  ;;  %v1839_v28 = vand.u32 2147483647, %v6423_v61  ;;  %v2866_v17 = vsel %vm2834_vm0, %v2818_v2, %v2850_v11  ;;  %v6450_v34 = vadd.f32 1.0, %v6440_v24  ;;  %v6466_v11 = vld [vmem:[%s4808_s26 + $0x1b0] sm:$0xff] }
 0x15b   : > { %8889 = vst [vmem:[#allocation95_spill] sm:$0xff] %v6443_v19  ;;  %4364 = vlog2.f32 %v6435_v32  ;;  %v3946_v16 = vpack.i.bf16 %v6443_v19, %v6429_v62  ;;  %v4349_v50 = vpop.eup %4348  ;;  %v2881_v3 = vsel %vm2849_vm1, %v2833_v29, %v2865_v10  ;;  %v2851_v51 = vmul.f32 %v6258_v8, %v2819_v40 }
 0x15c   : > { %v2636_v43 = vmul.f32 1.442695, %v2615_v21  ;;  %v1855_v14 = vsub.f32 0.0, %v1839_v28  ;;  %v4351_v2 = vpop.eup %4350  ;;  %v2727_v23 = vmul.f32 0.6931472, %v4349_v50  ;;  %4366 = vrcp.f32 %v6435_v32 }
 0x15d   : > { %3947 = vrot.lane.b32.xlu0 %v3946_v16, %s4664_s18  ;;  %v3170_v33 = vmul.f32 10.0, %v2866_v17  ;;  %v2788_v46 = vmul.f32 %v4351_v2, %v6353_v5  ;;  %4368 = vlog2.f32 %v6450_v34  ;;  %v8671_v21 = vunpack.c.l.bf16 %v6458_v60 }
 0x15e   : > { %v1876_v8 = vmul.f32 1.442695, %v1855_v14  ;;  %v2756_v10 = vadd.f32 %v2727_v23, %v6355_v25  ;;  %4370 = vrcp.f32 %v6450_v34  ;;  %v3626_v28 = vunpack.c.l.bf16 %v6461_v35 }
 0x15f   : > { %v4353_v29 = vpop.eup %4352  ;;  %v2867_v17 = vsel %vm2835_vm2, %v2819_v40, %v2851_v51  ;;  %4372 = vpow2.f32 %v2636_v43  ;;  %v2600_v50 = vand.u32 2147483647, %v6466_v11  ;;  %v8890_v23 = vunpack.c.l.bf16 %v6277_v31 }
 0x160   : > { %v2729_v5 = vmul.f32 0.6931472, %v4353_v29  ;;  %v4355_v14 = vpop.eup %4354  ;;  %v3235_v25 = vadd.f32 %v6384_v56, %v2756_v10  ;;  %4374 = vpow2.f32 %v1876_v8  ;;  %vm2128_vm5 = vcmp.gt.f32.partialorder %v8671_v21, 0.5  ;;  %v6491_v29 = vld [vmem:[%s4808_s26 + $0x130] sm:$0xff] }
 0x161   : > { %v1934_v39 = vmul.f32 %v8890_v23, %v6320_v9  ;;  %3952 = vrot.lane.b32.xlu0 %v3946_v16, %s4665_s23  ;;  %v6486_v41 = vpop.eup %4356  ;;  %v3185_v44 = vmul.f32 10.0, %v2881_v3  ;;  %v2804_v40 = vsub.f32 2.0, %v2788_v46  ;;  %v2789_v43 = vmul.f32 %v4355_v14, %v6375_v59 }
 0x162   : > { %8891 = vst [vmem:[#allocation96_spill] sm:$0xff] %v6486_v41  ;;  %v2757_v51 = vadd.f32 %v2729_v5, %v6403_v18  ;;  %vm2836_vm6 = vcmp.ge.f32.partialorder %v6177_v55, 0.0  ;;  %v3171_v10 = vmul.f32 10.0, %v2867_v17  ;;  %v6495_v8 = vsel %vm2128_vm5, 1.0, %v8757_v12 }
 0x163   : > { %v4359_v56 = vpop.eup %4358  ;;  %8892 = vst [vmem:[#allocation97_spill] sm:$0xff] %v6495_v8  ;;  %v2616_v16 = vsub.f32 0.0, %v2600_v50  ;;  %vm2888_vm7 = vcmp.gt.f32.partialorder %v3626_v28, 0.5  ;;  %v1692_v23 = vmul.f32 1.442695, %v1663_v54  ;;  %v2805_v18 = vsub.f32 2.0, %v2789_v43 }
 0x164   : > { %v3186_v3 = vmul.f32 1.442695, %v3170_v33  ;;  %v3236_v46 = vadd.f32 %v3235_v25, %v2757_v51  ;;  %v1969_v21 = vmul.f32 0.6931472, %v4359_v56  ;;  %v6500_v59 = vsel %vm2888_vm7, 1.0, %v8757_v12 }
 0x165   : > { %v2638_v5 = vmul.f32 1.442695, %v2616_v16  ;;  %8893 = vst [vmem:[#allocation98_spill] sm:$0xff] %v6500_v59  ;;  %v1840_v20 = vand.u32 2147483647, %v6491_v29  ;;  %v4361_v48 = vpop.eup %4360  ;;  %v2820_v62 = vmul.f32 %v4351_v2, %v2804_v40  ;;  %vm2837_vm8 = vcmp.ge.f32.partialorder %v6228_v63, 0.0 }
 0x166   : > { %v3216_v17 = vmul.f32 1.442695, %v3185_v44  ;;  %v1997_v50 = vadd.f32 %v1969_v21, %v6409_v4  ;;  %v3961_v54 = vpack.i.bf16 %v6500_v59, %v6495_v8  ;;  %v6507_v33 = vpop.eup %4362  ;;  %v3188_v25 = vmul.f32 1.442695, %v3171_v10 }
 0x167   : > { %8894 = vst [vmem:[#allocation99_spill] sm:$0xff] %v6507_v33  ;;  %v2029_v51 = vmul.f32 %v4361_v48, %v6397_v57  ;;  %4376 = vpow2.f32 %v2638_v5  ;;  %v1856_v43 = vsub.f32 0.0, %v1840_v20  ;;  %v8895_v2 = vmax.f32 %v6320_v9, 0.0 }
 0x168   : > { %v4365_v56 = vpop.eup %4364  ;;  %4378 = vpow2.f32 %v1692_v23  ;;  %v2476_v16 = vadd.f32 %v6173_v7, %v1997_v50  ;;  %v2679_v40 = vmax.f32 %v6388_v42, 0.0  ;;  %3962 = vrot.lane.b32.xlu1 %v3961_v54, %s4665_s23  ;;  %v2821_v4 = vmul.f32 %v4355_v14, %v2805_v18  ;;  %3957 = vrot.lane.b32.xlu0 %v3961_v54, %s4664_s18 }
 0x169   : > { %v1950_v44 = vsub.f32 %v8895_v2, %v1934_v39  ;;  %4380 = vpow2.f32 %v3186_v3  ;;  %v2045_v21 = vsub.f32 2.0, %v2029_v51  ;;  %vm2077_vm9 = vcmp.ge.f32.partialorder %v6256_v27, 0.0  ;;  %v4367_v57 = vpop.eup %4366 }
 0x16a   : > { %v2731_v10 = vmul.f32 0.6931472, %v4365_v56  ;;  %4382 = vpow2.f32 %v3216_v17  ;;  %v2852_v20 = vmul.f32 %v6346_v1, %v2820_v62  ;;  %v1878_v23 = vmul.f32 1.442695, %v1856_v43  ;;  %v4369_v5 = vpop.eup %4368 }
 0x16b   : > { %4384 = vpow2.f32 %v3188_v25  ;;  %v8896_v39 = vunpack.c.h.bf16 %v6286_v45  ;;  %v1919_v3 = vmax.f32 %v6423_v61, 0.0  ;;  %v4371_v14 = vpop.eup %4370  ;;  %v2061_v18 = vmul.f32 %v4361_v48, %v2045_v21 }
 0x16c   : > { %v2758_v7 = vadd.f32 %v2731_v10, %v6420_v22  ;;  %v2790_v51 = vmul.f32 %v4367_v57, %v6435_v32  ;;  %v1971_v56 = vmul.f32 0.6931472, %v4369_v5  ;;  %4386 = vpow2.f32 %v1878_v23  ;;  %v6524_v1 = vpop.eup %4372 }
 0x16d   : > { %v2695_v50 = vmul.f32 %v8896_v39, %v6388_v42  ;;  %v2853_v17 = vmul.f32 %v6366_v13, %v2821_v4  ;;  %v2030_v45 = vmul.f32 %v4371_v14, %v6450_v34  ;;  %v8674_v25 = vunpack.c.h.bf16 %v6458_v60  ;;  %v6531_v43 = vpop.eup %4374 }
 0x16e   : > { %v6527_v22 = vadd.f32 %v3236_v46, %v2758_v7  ;;  %v2868_v48 = vsel %vm2836_vm6, %v2820_v62, %v2852_v20  ;;  %v2806_v32 = vsub.f32 2.0, %v2790_v51  ;;  %v1998_v2 = vadd.f32 %v1971_v56, %v1950_v44  ;;  %v6550_v62 = vld [vmem:[%s4808_s26 + $0x1b8] sm:$0xff] }
 0x16f   : > { %v6536_v54 = vadd.f32 1.0, %v6524_v1  ;;  %vm2838_vm10 = vcmp.ge.f32.partialorder %v6293_v58, 0.0  ;;  %v6540_v13 = vadd.f32 1.0, %v6531_v43  ;;  %v8897_v34 = vunpack.c.h.bf16 %v6277_v31 }
 0x170   : > { %v2680_v21 = vmax.f32 %v6466_v11, 0.0  ;;  %v2696_v55 = vmul.f32 %v3626_v28, %v6466_v11  ;;  %v2093_v44 = vmul.f32 %v6382_v53, %v2061_v18  ;;  %v2046_v10 = vsub.f32 2.0, %v2030_v45  ;;  %v6619_v28 = vld [vmem:[%s4814_s19 + $0xe0] sm:$0xff]  }
 0x171   : > { %v1935_v46 = vmul.f32 %v8897_v34, %v6423_v61  ;;  %v6553_v20 = vadd.f32 %v2476_v16, %v1998_v2  ;;  %4388 = vlog2.f32 %v6536_v54  ;;  %v3172_v23 = vmul.f32 10.0, %v2868_v48 }
 0x172   : > { %v2869_v31 = vsel %vm2837_vm8, %v2821_v4, %v2853_v17  ;;  %4390 = vrcp.f32 %v6536_v54  ;;  %vm6561_vm11 = vcmp.gt.f32.partialorder %v8674_v25, 0.5  ;;  %v2822_v5 = vmul.f32 %v4367_v57, %v2806_v32  ;;  %v6575_v4 = vld [vmem:[%s4808_s26 + $0x138] sm:$0xff] }
 0x173   : > { %4392 = vlog2.f32 %v6540_v13  ;;  %v8675_v53 = vunpack.c.h.bf16 %v6461_v35  ;;  %v2601_v16 = vand.u32 2147483647, %v6550_v62  ;;  %vm2078_vm12 = vcmp.ge.f32.partialorder %v6320_v9, 0.0 }
 0x174   : > { %v6569_v7 = vsub.f32 %v2679_v40, %v2695_v50  ;;  %v6571_v63 = vsub.f32 %v1919_v3, %v1935_v46  ;;  %4394 = vrcp.f32 %v6540_v13  ;;  %v6577_v39 = vpop.eup %4376  ;;  %v2109_v57 = vsel %vm2077_vm9, %v2061_v18, %v2093_v44 }
 0x175   : > { %v2062_v51 = vmul.f32 %v4371_v14, %v2046_v10  ;;  %v6581_v56 = vsub.f32 %v2680_v21, %v2696_v55  ;;  %v2617_v17 = vsub.f32 0.0, %v2601_v16  ;;  %v6583_v45 = vpop.eup %4378  ;;  %v3190_v40 = vmul.f32 1.442695, %v3172_v23  ;;  %v6607_v55 = vld [vmem:[%s4814_s19 + $0xa0] sm:$0xff]  }
 0x176   : > { %8900 = vst [vmem:[#allocation100_spill] sm:$0xff] %v6583_v45  ;;  %v3173_v50 = vmul.f32 10.0, %v2869_v31  ;;  %v6586_v3 = vadd.f32 1.0, %v6577_v39  ;;  %v6591_v48 = vsel %vm6561_vm11, 1.0, %v8757_v12  ;;  %v6593_v32 = vpop.eup %4380  ;;  %v2854_v27 = vmul.f32 %v6425_v6, %v2822_v5  ;;  %v6616_v31 = vld [vmem:[%s4808_s26 + $0x1c0] sm:$0xff] }
 0x177   : > { %8901 = vst [vmem:[#allocation101_spill] sm:$0xff] %v6591_v48  ;;  %8902 = vst [vmem:[#allocation102_spill] sm:$0xff] %v6593_v32  ;;  %vm2889_vm13 = vcmp.gt.f32.partialorder %v8675_v53, 0.5  ;;  %v1841_v18 = vand.u32 2147483647, %v6575_v4  ;;  %v6600_v2 = vpop.eup %4382  ;;  %v2413_v34 = vmul.f32 10.0, %v2109_v57  ;;  %v2094_v44 = vmul.f32 %v6440_v24, %v2062_v51 }
 0x178   : > { %8903 = vst [vmem:[#allocation103_spill] sm:$0xff] %v6600_v2  ;;  %4396 = vlog2.f32 %v6586_v3  ;;  %v2640_v46 = vmul.f32 1.442695, %v2617_v17  ;;  %v6604_v21 = vsel %vm2889_vm13, 1.0, %v8757_v12  ;;  %v6609_v6 = vpop.eup %4384  ;;  %v3192_v57 = vmul.f32 1.442695, %v3173_v50 }
 0x179   : > { %8904 = vst [vmem:[#allocation104_spill] sm:$0xff] %v6604_v21  ;;  %8905 = vst [vmem:[#allocation105_spill] sm:$0xff] %v6609_v6  ;;  %4398 = vrcp.f32 %v6586_v3  ;;  %v3971_v10 = vpack.i.bf16 %v6604_v21, %v6591_v48  ;;  %v1857_v23 = vsub.f32 0.0, %v1841_v18  ;;  %v6621_v16 = vpop.eup %4386  ;;  %v8906_v17 = vunpack.c.l.bf16 %v6458_v60 }
 0x17a   : > { %4400 = vpow2.f32 %v3190_v40  ;;  %v2870_v24 = vsel %vm2838_vm10, %v2822_v5, %v2854_v27  ;;  %v6629_v14 = vadd.f32 1.0, %v6621_v16  ;;  %v8677_v53 = vunpack.c.l.bf16 %v6607_v55 }
 0x17b   : > { %v1936_v25 = vmul.f32 %v8906_v17, %v6491_v29  ;;  %v1880_v18 = vmul.f32 1.442695, %v1857_v23  ;;  %3972 = vrot.lane.b32.xlu1 %v3971_v10, %s4665_s23  ;;  %v2432_v2 = vmul.f32 1.442695, %v2413_v34  ;;  %4402 = vpow2.f32 %v2640_v46  ;;  %3967 = vrot.lane.b32.xlu0 %v3971_v10, %s4664_s18  ;;  %v6637_v17 = vld [vmem:[%s4808_s26 + $0x140] sm:$0xff] }
 0x17c   : > { %v2602_v50 = vand.u32 2147483647, %v6616_v31  ;;  %v2110_v58 = vsel %vm2078_vm12, %v2062_v51, %v2094_v44  ;;  %4404 = vlog2.f32 %v6629_v14  ;;  %v2681_v5 = vmax.f32 %v6550_v62, 0.0 }
 0x17d   : > { %vm2130_vm14 = vcmp.gt.f32.partialorder %v8677_v53, 0.5  ;;  %v3174_v34 = vmul.f32 10.0, %v2870_v24  ;;  %4406 = vrcp.f32 %v6629_v14  ;;  %v8908_v9 = vunpack.c.l.bf16 %v6619_v28 }
 0x17e   : > { %v4389_v27 = vpop.eup %4388  ;;  %v6647_v46 = vsel %vm2130_vm14, 1.0, %v8757_v12  ;;  %v2618_v10 = vsub.f32 0.0, %v2602_v50  ;;  %4408 = vpow2.f32 %v1880_v18  ;;  %v1842_v51 = vand.u32 2147483647, %v6637_v17 }
 0x17f   : > { %8907 = vst [vmem:[#allocation106_spill] sm:$0xff] %v6647_v46  ;;  %v4391_v23 = vpop.eup %4390  ;;  %v2733_v40 = vmul.f32 0.6931472, %v4389_v27  ;;  %vm2890_vm15 = vcmp.gt.f32.partialorder %v8908_v9, 0.5  ;;  %v2414_v48 = vmul.f32 10.0, %v2110_v58  ;;  %vm2839_vm0 = vcmp.ge.f32.partialorder %v6388_v42, 0.0 }
 0x180   : > { %v4393_v44 = vpop.eup %4392  ;;  %v2791_v53 = vmul.f32 %v4391_v23, %v6536_v54  ;;  %v2642_v21 = vmul.f32 1.442695, %v2618_v10  ;;  %v6654_v24 = vsel %vm2890_vm15, 1.0, %v8757_v12  ;;  %v1858_v27 = vsub.f32 0.0, %v1842_v51 }
 0x181   : > { %8909 = vst [vmem:[#allocation107_spill] sm:$0xff] %v6654_v24  ;;  %v4395_v8 = vpop.eup %4394  ;;  %v2759_v59 = vadd.f32 %v2733_v40, %v6569_v7  ;;  %v1973_v50 = vmul.f32 0.6931472, %v4393_v44  ;;  %v3981_v18 = vpack.i.bf16 %v6654_v24, %v6647_v46  ;;  %v8910_v54 = vunpack.c.h.bf16 %v6461_v35 }
 0x182   : > { %v2807_v36 = vsub.f32 2.0, %v2791_v53  ;;  %v2031_v9 = vmul.f32 %v4395_v8, %v6540_v13  ;;  %4410 = vpow2.f32 %v2642_v21  ;;  %v3194_v10 = vmul.f32 1.442695, %v3174_v34 }
 0x183   : > { %v2697_v58 = vmul.f32 %v8910_v54, %v6550_v62  ;;  %v3238_v19 = vadd.f32 %v6527_v22, %v2759_v59  ;;  %v1999_v7 = vadd.f32 %v1973_v50, %v6571_v63  ;;  %v1882_v40 = vmul.f32 1.442695, %v1858_v27  ;;  %3982 = vrot.lane.b32.xlu1 %v3981_v18, %s4665_s23  ;;  %3977 = vrot.lane.b32.xlu0 %v3981_v18, %s4664_s18  ;;  %v6685_v50 = vld [vmem:[%s4808_s26 + $0x1c8] sm:$0xff] }
 0x184   : > { %4412 = vpow2.f32 %v3192_v57  ;;  %v2434_v51 = vmul.f32 1.442695, %v2414_v48  ;;  %v2047_v53 = vsub.f32 2.0, %v2031_v9  ;;  %v2823_v46 = vmul.f32 %v4391_v23, %v2807_v36 }
 0x185   : > { %v4397_v44 = vpop.eup %4396  ;;  %vm2079_vm1 = vcmp.ge.f32.partialorder %v6423_v61, 0.0  ;;  %v2478_v13 = vadd.f32 %v6553_v20, %v1999_v7  ;;  %4414 = vpow2.f32 %v1882_v40  ;;  %vm2840_vm2 = vcmp.ge.f32.partialorder %v6466_v11, 0.0  ;;  %v6762_v11 = vld [vmem:[%s4814_s19 + $0xa8] sm:$0xff]  }
 0x186   : > { %v4399_v35 = vpop.eup %4398  ;;  %4416 = vpow2.f32 %v2432_v2  ;;  %v2735_v21 = vmul.f32 0.6931472, %v4397_v44  ;;  %v8911_v59 = vmax.f32 %v6491_v29, 0.0  ;;  %v8683_v63 = vunpack.c.h.bf16 %v6607_v55 }
 0x187   : > { %v6674_v48 = vpop.eup %4400  ;;  %4418 = vpow2.f32 %v3194_v10  ;;  %v2063_v36 = vmul.f32 %v4395_v8, %v2047_v53  ;;  %v2792_v20 = vmul.f32 %v4399_v35, %v6586_v3  ;;  %v6677_v57 = vsub.f32 %v2681_v5, %v2697_v58 }
 0x188   : > { %v1952_v22 = vsub.f32 %v8911_v59, %v1936_v25  ;;  %8912 = vst [vmem:[#allocation108_spill] sm:$0xff] %v6674_v48  ;;  %4420 = vpow2.f32 %v2434_v51  ;;  %v2760_v2 = vadd.f32 %v2735_v21, %v6581_v56  ;;  %v1921_v34 = vmax.f32 %v6575_v4, 0.0  ;;  %v6687_v18 = vpop.eup %4402 }
 0x189   : > { %v8913_v25 = vunpack.c.h.bf16 %v6458_v60  ;;  %v2855_v27 = vmul.f32 %v6524_v1, %v2823_v46  ;;  %v2808_v8 = vsub.f32 2.0, %v2792_v20  ;;  %v2682_v3 = vmax.f32 %v6616_v31, 0.0  ;;  %v4405_v56 = vpop.eup %4404 }
 0x18a   : > { %v8914_v5 = vunpack.c.l.bf16 %v6619_v28  ;;  %v6694_v54 = vadd.f32 %v3238_v19, %v2760_v2  ;;  %v6697_v58 = vadd.f32 1.0, %v6687_v18  ;;  %vm6701_vm3 = vcmp.gt.f32.partialorder %v8683_v63, 0.5  ;;  %v4407_v10 = vpop.eup %4406 }
 0x18b   : > { %v1937_v23 = vmul.f32 %v8913_v25, %v6575_v4  ;;  %v8684_v1 = vunpack.c.h.bf16 %v6619_v28  ;;  %v2095_v7 = vmul.f32 %v6531_v43, %v2063_v36  ;;  %v2824_v40 = vmul.f32 %v4399_v35, %v2808_v8  ;;  %v6709_v53 = vpop.eup %4408 }
 0x18c   : > { %v2698_v9 = vmul.f32 %v8914_v5, %v6616_v31  ;;  %v1975_v51 = vmul.f32 0.6931472, %v4405_v56  ;;  %vm2080_vm4 = vcmp.ge.f32.partialorder %v6491_v29, 0.0  ;;  %v2603_v19 = vand.u32 2147483647, %v6685_v50  ;;  %v6732_v5 = vld [vmem:[%s4808_s26 + $0x148] sm:$0xff] }
 0x18d   : > { %v2032_v44 = vmul.f32 %v4407_v10, %v6629_v14  ;;  %4422 = vlog2.f32 %v6697_v58  ;;  %v1922_v21 = vmax.f32 %v6637_v17, 0.0  ;;  %v8917_v59 = vunpack.c.l.bf16 %v6607_v55 }
 0x18e   : > { %v2871_v43 = vsel %vm2839_vm0, %v2823_v46, %v2855_v27  ;;  %v2856_v35 = vmul.f32 %v6577_v39, %v2824_v40  ;;  %v2000_v2 = vadd.f32 %v1975_v51, %v1952_v22  ;;  %v6723_v25 = vsel %vm6701_vm3, 1.0, %v8757_v12 }
 0x18f   : > { %v1938_v20 = vmul.f32 %v8917_v59, %v6637_v17  ;;  %8918 = vst [vmem:[#allocation109_spill] sm:$0xff] %v6723_v25  ;;  %v2048_v14 = vsub.f32 2.0, %v2032_v44  ;;  %4424 = vrcp.f32 %v6697_v58  ;;  %v6727_v8 = vadd.f32 1.0, %v6709_v53  ;;  %v6734_v42 = vpop.eup %4410 }
 0x190   : > { %vm2891_vm5 = vcmp.gt.f32.partialorder %v8684_v1, 0.5  ;;  %v2111_v39 = vsel %vm2079_vm1, %v2063_v36, %v2095_v7  ;;  %v6738_v46 = vadd.f32 %v2478_v13, %v2000_v2  ;;  %v2619_v22 = vsub.f32 0.0, %v2603_v19 }
 0x191   : > { %v6741_v27 = vsel %vm2891_vm5, 1.0, %v8757_v12  ;;  %v3175_v56 = vmul.f32 10.0, %v2871_v43  ;;  %v2064_v60 = vmul.f32 %v4407_v10, %v2048_v14  ;;  %4426 = vlog2.f32 %v6727_v8  ;;  %v6747_v44 = vpop.eup %4412  ;;  %v6772_v14 = vld [vmem:[%s4808_s26 + $0x1d0] sm:$0xff] }
 0x192   : > { %8919 = vst [vmem:[#allocation110_spill] sm:$0xff] %v6741_v27  ;;  %v6745_v51 = vadd.f32 1.0, %v6734_v42  ;;  %8920 = vst [vmem:[#allocation111_spill] sm:$0xff] %v6747_v44  ;;  %v2872_v61 = vsel %vm2840_vm2, %v2824_v40, %v2856_v35  ;;  %4428 = vrcp.f32 %v6727_v8  ;;  %v3991_v13 = vpack.i.bf16 %v6741_v27, %v6723_v25  ;;  %v6755_v10 = vpop.eup %4414 }
 0x193   : > { %v1843_v36 = vand.u32 2147483647, %v6732_v5  ;;  %v2415_v7 = vmul.f32 10.0, %v2111_v39  ;;  %v2096_v19 = vmul.f32 %v6621_v16, %v2064_v60  ;;  %v6758_v59 = vsub.f32 %v1921_v34, %v1937_v23  ;;  %v6764_v40 = vpop.eup %4416  ;;  %v6775_v16 = vld [vmem:[%s4814_s19 + $0xe8] sm:$0xff]  }
 0x194   : > { %4430 = vlog2.f32 %v6745_v51  ;;  %8921 = vst [vmem:[#allocation112_spill] sm:$0xff] %v6764_v40  ;;  %v6768_v43 = vadd.f32 1.0, %v6755_v10  ;;  %v2644_v35 = vmul.f32 1.442695, %v2619_v22  ;;  %3992 = vrot.lane.b32.xlu1 %v3991_v13, %s4665_s23  ;;  %v6777_v34 = vpop.eup %4418  ;;  %v3176_v23 = vmul.f32 10.0, %v2872_v61  ;;  %3987 = vrot.lane.b32.xlu0 %v3991_v13, %s4664_s18 }
 0x195   : > { %4432 = vrcp.f32 %v6745_v51  ;;  %v1859_v2 = vsub.f32 0.0, %v1843_v36  ;;  %8922 = vst [vmem:[#allocation113_spill] sm:$0xff] %v6777_v34  ;;  %v6779_v39 = vsub.f32 %v2682_v3, %v2698_v9  ;;  %v6781_v63 = vsub.f32 %v1922_v21, %v1938_v20  ;;  %v6783_v1 = vpop.eup %4420  ;;  %v6794_v21 = vld [vmem:[%s4808_s26 + $0x150] sm:$0xff] }
 0x196   : > { %8923 = vst [vmem:[#allocation114_spill] sm:$0xff] %v6783_v1  ;;  %v3196_v25 = vmul.f32 1.442695, %v3175_v56  ;;  %4434 = vlog2.f32 %v6768_v43  ;;  %v8688_v36 = vunpack.c.l.bf16 %v6762_v11  ;;  %v2112_v27 = vsel %vm2080_vm4, %v2064_v60, %v2096_v19  ;;  %v6816_v56 = vld [vmem:[%s4808_s26 + $0x1d8] sm:$0xff] }
 0x197   : > { %v1884_v22 = vmul.f32 1.442695, %v1859_v2  ;;  %4436 = vrcp.f32 %v6768_v43  ;;  %v3634_v3 = vunpack.c.l.bf16 %v6775_v16  ;;  %v2604_v9 = vand.u32 2147483647, %v6772_v14 }
 0x198   : > { %v2436_v20 = vmul.f32 1.442695, %v2415_v7  ;;  %4438 = vpow2.f32 %v2644_v35  ;;  %vm2132_vm6 = vcmp.gt.f32.partialorder %v8688_v36, 0.5  ;;  %v3198_v61 = vmul.f32 1.442695, %v3176_v23 }
 0x199   : > { %v8924_v29 = vunpack.c.h.bf16 %v6619_v28  ;;  %v6805_v13 = vsel %vm2132_vm6, 1.0, %v8757_v12  ;;  %v2620_v19 = vsub.f32 0.0, %v2604_v9  ;;  %v2416_v24 = vmul.f32 10.0, %v2112_v27 }
 0x19a   : > { %8925 = vst [vmem:[#allocation115_spill] sm:$0xff] %v6805_v13  ;;  %v4423_v2 = vpop.eup %4422  ;;  %vm2841_vm7 = vcmp.ge.f32.partialorder %v6550_v62, 0.0  ;;  %4440 = vpow2.f32 %v1884_v22  ;;  %vm2892_vm8 = vcmp.gt.f32.partialorder %v3634_v3, 0.5  ;;  %v1844_v7 = vand.u32 2147483647, %v6794_v21 }
 0x19b   : > { %v6802_v60 = vmul.f32 %v8924_v29, %v6685_v50  ;;  %4442 = vpow2.f32 %v3196_v25  ;;  %v2737_v35 = vmul.f32 0.6931472, %v4423_v2  ;;  %v2646_v23 = vmul.f32 1.442695, %v2620_v19 }
 0x19c   : > { %v6810_v28 = vsel %vm2892_vm8, 1.0, %v8757_v12  ;;  %v4425_v29 = vpop.eup %4424  ;;  %4444 = vpow2.f32 %v2436_v20  ;;  %v1860_v27 = vsub.f32 0.0, %v1844_v7  ;;  %vm2081_vm9 = vcmp.ge.f32.partialorder %v6575_v4, 0.0 }
 0x19d   : > { %8926 = vst [vmem:[#allocation116_spill] sm:$0xff] %v6810_v28  ;;  %v4001_v9 = vpack.i.bf16 %v6810_v28, %v6805_v13  ;;  %v2761_v22 = vadd.f32 %v2737_v35, %v6677_v57  ;;  %v2793_v1 = vmul.f32 %v4425_v29, %v6697_v58  ;;  %4446 = vpow2.f32 %v2646_v23 }
 0x19e   : > { %v4427_v25 = vpop.eup %4426  ;;  %4448 = vpow2.f32 %v3198_v61  ;;  %v2438_v19 = vmul.f32 1.442695, %v2416_v24  ;;  %v1886_v2 = vmul.f32 1.442695, %v1860_v27  ;;  %vm2842_vm10 = vcmp.ge.f32.partialorder %v6616_v31, 0.0 }
 0x19f   : > { %4002 = vrot.lane.b32.xlu1 %v4001_v9, %s4665_s23  ;;  %v4429_v36 = vpop.eup %4428  ;;  %v2809_v13 = vsub.f32 2.0, %v2793_v1  ;;  %v3240_v7 = vadd.f32 %v6694_v54, %v2761_v22  ;;  %v1977_v28 = vmul.f32 0.6931472, %v4427_v25  ;;  %3997 = vrot.lane.b32.xlu0 %v4001_v9, %s4664_s18  ;;  %v2605_v57 = vand.u32 2147483647, %v6816_v56 }
 0x1a0   : > { %v2033_v61 = vmul.f32 %v4429_v36, %v6727_v8  ;;  %v8927_v24 = vunpack.c.h.bf16 %v6607_v55  ;;  %v2684_v23 = vmax.f32 %v6772_v14, 0.0  ;;  %4450 = vpow2.f32 %v1886_v2 }
 0x1a1   : > { %v4431_v58 = vpop.eup %4430  ;;  %v2825_v27 = vmul.f32 %v4425_v29, %v2809_v13  ;;  %v2001_v54 = vadd.f32 %v1977_v28, %v6758_v59  ;;  %v6834_v25 = vmul.f32 %v3634_v3, %v6772_v14  ;;  %4452 = vpow2.f32 %v2438_v19 }
 0x1a2   : > { %v1939_v35 = vmul.f32 %v8927_v24, %v6732_v5  ;;  %v4433_v1 = vpop.eup %4432  ;;  %v2739_v22 = vmul.f32 0.6931472, %v4431_v58  ;;  %v2049_v9 = vsub.f32 2.0, %v2033_v61  ;;  %vm2082_vm11 = vcmp.ge.f32.partialorder %v6637_v17, 0.0 }
 0x1a3   : > { %v2794_v20 = vmul.f32 %v4433_v1, %v6745_v51  ;;  %v2621_v8 = vsub.f32 0.0, %v2605_v57  ;;  %v4435_v55 = vpop.eup %4434  ;;  %v2857_v24 = vmul.f32 %v6687_v18, %v2825_v27  ;;  %v2480_v2 = vadd.f32 %v6738_v46, %v2001_v54 }
 0x1a4   : > { %v2762_v13 = vadd.f32 %v2739_v22, %v6779_v39  ;;  %v8928_v59 = vunpack.c.h.bf16 %v6762_v11  ;;  %v4437_v3 = vpop.eup %4436  ;;  %v2065_v29 = vmul.f32 %v4429_v36, %v2049_v9  ;;  %v1979_v51 = vmul.f32 0.6931472, %v4435_v55 }
 0x1a5   : > { %v2810_v19 = vsub.f32 2.0, %v2794_v20  ;;  %v2648_v58 = vmul.f32 1.442695, %v2621_v8  ;;  %v6847_v57 = vpop.eup %4438  ;;  %v2873_v18 = vsel %vm2841_vm7, %v2825_v27, %v2857_v24  ;;  %v2034_v39 = vmul.f32 %v4437_v3, %v6768_v43  ;;  %v6868_v43 = vld [vmem:[%s4808_s26 + $0x158] sm:$0xff] }
 0x1a6   : > { %vm6843_vm12 = vcmp.gt.f32.partialorder %v8928_v59, 0.5  ;;  %v6851_v46 = vadd.f32 %v3240_v7, %v2762_v13  ;;  %v3635_v61 = vunpack.c.h.bf16 %v6775_v16  ;;  %v3177_v54 = vmul.f32 10.0, %v2873_v18 }
 0x1a7   : > { %v2097_v22 = vmul.f32 %v6709_v53, %v2065_v29  ;;  %v2826_v59 = vmul.f32 %v4433_v1, %v2810_v19  ;;  %v2002_v36 = vadd.f32 %v1979_v51, %v6781_v63  ;;  %v6857_v20 = vpop.eup %4440  ;;  %v2050_v9 = vsub.f32 2.0, %v2034_v39 }
 0x1a8   : > { %v6860_v8 = vadd.f32 1.0, %v6847_v57  ;;  %v6865_v62 = vsel %vm6843_vm12, 1.0, %v8757_v12  ;;  %4454 = vpow2.f32 %v2648_v58  ;;  %v6870_v16 = vpop.eup %4442  ;;  %v3200_v53 = vmul.f32 1.442695, %v3177_v54 }
 0x1a9   : > { %8931 = vst [vmem:[#allocation117_spill] sm:$0xff] %v6865_v62  ;;  %8932 = vst [vmem:[#allocation118_spill] sm:$0xff] %v6870_v16  ;;  %v2113_v63 = vsel %vm2081_vm9, %v2065_v29, %v2097_v22  ;;  %v2858_v7 = vmul.f32 %v6734_v42, %v2826_v59  ;;  %v6875_v1 = vadd.f32 %v2480_v2, %v2002_v36  ;;  %v6877_v27 = vpop.eup %4444  ;;  %vm2893_vm13 = vcmp.gt.f32.partialorder %v3635_v61, 0.5 }
 0x1aa   : > { %8933 = vst [vmem:[#allocation119_spill] sm:$0xff] %v6877_v27  ;;  %v2417_v55 = vmul.f32 10.0, %v2113_v63  ;;  %v2066_v24 = vmul.f32 %v4437_v3, %v2050_v9  ;;  %4456 = vlog2.f32 %v6860_v8  ;;  %v6880_v13 = vpop.eup %4446  ;;  %v6885_v19 = vadd.f32 1.0, %v6857_v20 }
 0x1ab   : > { %v2874_v28 = vsel %vm2842_vm10, %v2826_v59, %v2858_v7  ;;  %v6888_v4 = vsel %vm2893_vm13, 1.0, %v8757_v12  ;;  %v1845_v42 = vand.u32 2147483647, %v6868_v43  ;;  %v6891_v2 = vpop.eup %4448  ;;  %4458 = vrcp.f32 %v6860_v8 }
 0x1ac   : > { %8934 = vst [vmem:[#allocation120_spill] sm:$0xff] %v6888_v4  ;;  %8935 = vst [vmem:[#allocation121_spill] sm:$0xff] %v6891_v2  ;;  %v2440_v29 = vmul.f32 1.442695, %v2417_v55  ;;  %v3178_v3 = vmul.f32 10.0, %v2874_v28  ;;  %v2098_v51 = vmul.f32 %v6755_v10, %v2066_v24  ;;  %v8936_v31 = vmax.f32 %v6685_v50, 0.0 }
 0x1ad   : > { %v8937_v18 = vmax.f32 %v6732_v5, 0.0  ;;  %4460 = vlog2.f32 %v6885_v19  ;;  %v4011_v54 = vpack.i.bf16 %v6888_v4, %v6865_v62  ;;  %v6907_v22 = vpop.eup %4450  ;;  %v6912_v59 = vadd.f32 1.0, %v6880_v13  ;;  %v6928_v55 = vld [vmem:[%s4814_s19 + $0xb0] sm:$0xff]  }
 0x1ae   : > { %v6898_v58 = vsub.f32 %v8936_v31, %v6802_v60  ;;  %4462 = vpow2.f32 %v3200_v53  ;;  %v2114_v10 = vsel %vm2082_vm11, %v2066_v24, %v2098_v51  ;;  %v1861_v60 = vsub.f32 0.0, %v1845_v42  ;;  %v6917_v63 = vpop.eup %4452 }
 0x1af   : > { %v6902_v39 = vsub.f32 %v8937_v18, %v1939_v35  ;;  %v3202_v35 = vmul.f32 1.442695, %v3178_v3  ;;  %v2418_v36 = vmul.f32 10.0, %v2114_v10  ;;  %4464 = vrcp.f32 %v6885_v19  ;;  %4012 = vrot.lane.b32.xlu1 %v4011_v54, %s4665_s23  ;;  %8938 = vst [vmem:[#allocation122_spill] sm:$0xff] %v6917_v63  ;;  %v6940_v3 = vld [vmem:[%s4814_s19 + $0xf0] sm:$0xff]   ;;  %4007 = vrot.lane.b32.xlu0 %v4011_v54, %s4664_s18  ;;  %v3738_v18 = vpop.permute.xlu1 %3737 }
 0x1b0   : > { %v1924_v9 = vmax.f32 %v6794_v21, 0.0  ;;  %4466 = vpow2.f32 %v2440_v29  ;;  %v6922_v17 = vsub.f32 %v2684_v23, %v6834_v25  ;;  %v8939_v53 = vunpack.c.l.bf16 %v6762_v11  ;;  %v6937_v29 = vld [vmem:[%s4808_s26 + $0x1e0] sm:$0xff] }
 0x1b1   : > { %4468 = vlog2.f32 %v6912_v59  ;;  %v6932_v24 = vadd.f32 1.0, %v6907_v22  ;;  %v2685_v28 = vmax.f32 %v6816_v56, 0.0  ;;  %v2701_v42 = vmul.f32 %v3635_v61, %v6816_v56 }
 0x1b2   : > { %v1940_v7 = vmul.f32 %v8939_v53, %v6794_v21  ;;  %4470 = vrcp.f32 %v6912_v59  ;;  %v1888_v23 = vmul.f32 1.442695, %v1861_v60  ;;  %v1925_v25 = vmax.f32 %v6868_v43, 0.0 }
 0x1b3   : > { %v8940_v51 = vunpack.c.h.bf16 %v6762_v11  ;;  %4472 = vpow2.f32 %v3202_v35  ;;  %v2442_v10 = vmul.f32 1.442695, %v2418_v36  ;;  %v8694_v61 = vunpack.c.l.bf16 %v6928_v55  ;;  %v6959_v35 = vpop.permute.xlu0 %3727 }
 0x1b4   : > { %v6949_v62 = vsub.f32 %v1924_v9, %v1940_v7  ;;  %4474 = vlog2.f32 %v6932_v24  ;;  %v3638_v60 = vunpack.c.l.bf16 %v6940_v3  ;;  %v2606_v4 = vand.u32 2147483647, %v6937_v29 }
 0x1b5   : > { %v1941_v31 = vmul.f32 %v8940_v51, %v6868_v43  ;;  %v6954_v63 = vpop.eup %4454  ;;  %4476 = vrcp.f32 %v6932_v24  ;;  %v6957_v11 = vsub.f32 %v2685_v28, %v2701_v42  ;;  %v3740_v54 = vunpack.i.h.bf16 %v3738_v18  ;;  %v6969_v51 = vld [vmem:[%s4808_s26 + $0x160] sm:$0xff] }
 0x1b6   : > { %vm2134_vm14 = vcmp.gt.f32.partialorder %v8694_v61, 0.5  ;;  %v6964_v36 = vadd.f32 1.0, %v6954_v63  ;;  %4478 = vpow2.f32 %v1888_v23  ;;  %v3739_v7 = vunpack.i.l.bf16 %v3738_v18 }
 0x1b7   : > { %v6966_v9 = vsub.f32 %v1925_v25, %v1941_v31  ;;  %v4457_v53 = vpop.eup %4456  ;;  %4480 = vpow2.f32 %v2442_v10  ;;  %vm2843_vm15 = vcmp.ge.f32.partialorder %v6685_v50, 0.0  ;;  %v8941_v28 = vlaneseq }
 0x1b8   : > { %v6976_v2 = vsel %vm2134_vm14, 1.0, %v8757_v12  ;;  %v2622_v61 = vsub.f32 0.0, %v2606_v4  ;;  %v2741_v27 = vmul.f32 0.6931472, %v4457_v53  ;;  %4482 = vlog2.f32 %v6964_v36  ;;  %v4459_v25 = vpop.eup %4458 }
 0x1b9   : > { %v6973_v42 = vand.u32 127, %v8941_v28  ;;  %8942 = vst [vmem:[#allocation123_spill] sm:$0xff] %v6976_v2  ;;  %v3730_v23 = vunpack.i.h.bf16 %v6959_v35  ;;  %vm2894_vm0 = vcmp.gt.f32.partialorder %v3638_v60, 0.5  ;;  %4484 = vrcp.f32 %v6964_v36 }
 0x1ba   : > { %v2650_v31 = vmul.f32 1.442695, %v2622_v61  ;;  %v6982_v18 = vsel %vm2894_vm0, 1.0, %v8757_v12  ;;  %v1846_v10 = vand.u32 2147483647, %v6969_v51  ;;  %v4461_v16 = vpop.eup %4460  ;;  %v2763_v34 = vadd.f32 %v2741_v27, %v6898_v58 }
 0x1bb   : > { %8943 = vst [vmem:[#allocation124_spill] sm:$0xff] %v6982_v18  ;;  %v2795_v4 = vmul.f32 %v4459_v25, %v6860_v8  ;;  %vm2083_vm1 = vcmp.ge.f32.partialorder %v6732_v5, 0.0  ;;  %v3729_v53 = vunpack.i.l.bf16 %v6959_v35  ;;  %v4021_v44 = vpack.i.bf16 %v6982_v18, %v6976_v2  ;;  %v6991_v48 = vpop.eup %4462 }
 0x1bc   : > { %8944 = vst [vmem:[#allocation125_spill] sm:$0xff] %v6991_v48  ;;  %v1981_v61 = vmul.f32 0.6931472, %v4461_v16  ;;  %vm228_vm2 = vcmp.gt.s32.totalorder %v6973_v42, 0  ;;  %4486 = vpow2.f32 %v2650_v31  ;;  %v1862_v40 = vsub.f32 0.0, %v1846_v10  ;;  %v4465_v45 = vpop.eup %4464 }
 0x1bd   : > { %v2811_v33 = vsub.f32 2.0, %v2795_v4  ;;  %v3242_v27 = vadd.f32 %v6851_v46, %v2763_v34  ;;  %v2686_v8 = vmax.f32 %v6937_v29, 0.0  ;;  %v2702_v58 = vmul.f32 %v3638_v60, %v6937_v29  ;;  %4022 = vrot.lane.b32.xlu1 %v4021_v44, %s4665_s23  ;;  %v6998_v35 = vpop.eup %4466  ;;  %4017 = vrot.lane.b32.xlu0 %v4021_v44, %s4664_s18 }
 0x1be   : > { %8945 = vst [vmem:[#allocation126_spill] sm:$0xff] %v6998_v35  ;;  %v2003_v2 = vadd.f32 %v1981_v61, %v6902_v39  ;;  %v2035_v16 = vmul.f32 %v4465_v45, %v6885_v19  ;;  %vm2844_vm3 = vcmp.ge.f32.partialorder %v6772_v14, 0.0  ;;  %v1890_v31 = vmul.f32 1.442695, %v1862_v40  ;;  %v4469_v10 = vpop.eup %4468 }
 0x1bf   : > { %v2827_v18 = vmul.f32 %v4459_v25, %v2811_v33  ;;  %v7005_v34 = vsel %vm228_vm2, %v3740_v54, 0.0  ;;  %v7009_v46 = vsel %vm228_vm2, %v3739_v7, 0.0  ;;  %v7013_v60 = vsel %vm228_vm2, %v3730_v23, 0.0  ;;  %v4471_v39 = vpop.eup %4470  ;;  %v7017_v33 = vpop.permute.xlu1 %3742 }
 0x1c0   : > { %v2051_v4 = vsub.f32 2.0, %v2035_v16  ;;  %v2482_v19 = vadd.f32 %v6875_v1, %v2003_v2  ;;  %v2743_v61 = vmul.f32 0.6931472, %v4469_v10  ;;  %4488 = vpow2.f32 %v1890_v31  ;;  %v7019_v40 = vpop.eup %4472 }
 0x1c1   : > { %8946 = vst [vmem:[#allocation127_spill] sm:$0xff] %v7019_v40  ;;  %v2859_v54 = vmul.f32 %v6847_v57, %v2827_v18  ;;  %v2796_v7 = vmul.f32 %v4471_v39, %v6912_v59  ;;  %vm2084_vm4 = vcmp.ge.f32.partialorder %v6794_v21, 0.0  ;;  %v1926_v23 = vmax.f32 %v6969_v51, 0.0  ;;  %v4475_v2 = vpop.eup %4474 }
 0x1c2   : > { %v8947_v25 = vunpack.c.l.bf16 %v6928_v55  ;;  %v2067_v16 = vmul.f32 %v4465_v45, %v2051_v4  ;;  %v2764_v44 = vadd.f32 %v2743_v61, %v6922_v17  ;;  %v7031_v31 = vsel %vm228_vm2, %v3729_v53, 0.0  ;;  %v4477_v57 = vpop.eup %4476 }
 0x1c3   : > { %v7033_v10 = vsub.f32 %v2686_v8, %v2702_v58  ;;  %v2875_v59 = vsel %vm2843_vm15, %v2827_v18, %v2859_v54  ;;  %v2812_v40 = vsub.f32 2.0, %v2796_v7  ;;  %v1983_v35 = vmul.f32 0.6931472, %v4475_v2  ;;  %v7038_v41 = vpop.eup %4478 }
 0x1c4   : > { %v1942_v1 = vmul.f32 %v8947_v25, %v6969_v51  ;;  %v3745_v48 = vunpack.i.h.bf16 %v7017_v33  ;;  %v3179_v25 = vmul.f32 10.0, %v2875_v59  ;;  %v2099_v45 = vmul.f32 %v6857_v20, %v2067_v16  ;;  %v7042_v53 = vpop.eup %4480 }
 0x1c5   : > { %v3243_v17 = vadd.f32 %v3242_v27, %v2764_v44  ;;  %v2036_v4 = vmul.f32 %v4477_v57, %v6932_v24  ;;  %8948 = vst [vmem:[#allocation128_spill] sm:$0xff] %v7042_v53  ;;  %v2828_v8 = vmul.f32 %v4471_v39, %v2812_v40  ;;  %v2004_v58 = vadd.f32 %v1983_v35, %v6949_v62  ;;  %v4483_v61 = vpop.eup %4482  ;;  %v7054_v24 = vpop.permute.xlu0 %3732 }
 0x1c6   : > { %vm2845_vm5 = vcmp.ge.f32.partialorder %v6816_v56, 0.0  ;;  %v7046_v50 = vsub.f32 %v1926_v23, %v1942_v1  ;;  %v3744_v18 = vunpack.i.l.bf16 %v7017_v33  ;;  %v2115_v54 = vsel %vm2083_vm1, %v2067_v16, %v2099_v45  ;;  %v4485_v39 = vpop.eup %4484 }
 0x1c7   : > { %v2052_v7 = vsub.f32 2.0, %v2036_v4  ;;  %v7052_v20 = vadd.f32 1.0, %v7038_v41  ;;  %v3607_v27 = vunpack.c.h.bf16 %v6928_v55  ;;  %v2419_v62 = vmul.f32 10.0, %v2115_v54 }
 0x1c8   : > { %v2860_v35 = vmul.f32 %v6880_v13, %v2828_v8  ;;  %v7058_v40 = vadd.f32 %v2482_v19, %v2004_v58  ;;  %v2745_v33 = vmul.f32 0.6931472, %v4483_v61  ;;  %v3204_v23 = vmul.f32 1.442695, %v3179_v25 }
 0x1c9   : > { %v2068_v1 = vmul.f32 %v4477_v57, %v2052_v7  ;;  %v2797_v5 = vmul.f32 %v4485_v39, %v6964_v36  ;;  %v7063_v2 = vsel %vm228_vm2, %v3745_v48, 0.0  ;;  %v7065_v16 = vpop.eup %4486  ;;  %4490 = vlog2.f32 %v7052_v20  ;;  %v7075_v36 = vld [vmem:[%s4808_s26 + $0x1e8] sm:$0xff] }
 0x1ca   : > { %v2876_v55 = vsel %vm2844_vm3, %v2828_v8, %v2860_v35  ;;  %v2765_v44 = vadd.f32 %v2745_v33, %v6957_v11  ;;  %v3735_v13 = vunpack.i.h.bf16 %v7054_v24  ;;  %v2444_v19 = vmul.f32 1.442695, %v2419_v62  ;;  %v7100_v62 = vld [vmem:[%s4808_s26 + $0x168] sm:$0xff] }
 0x1cb   : > { %v2100_v57 = vmul.f32 %v6907_v22, %v2068_v1  ;;  %v2813_v59 = vsub.f32 2.0, %v2797_v5  ;;  %4492 = vrcp.f32 %v7052_v20  ;;  %v3180_v48 = vmul.f32 10.0, %v2876_v55 }
 0x1cc   : > { %v7077_v25 = vadd.f32 %v3243_v17, %v2765_v44  ;;  %v7080_v14 = vadd.f32 1.0, %v7065_v16  ;;  %vm2135_vm6 = vcmp.gt.f32.partialorder %v3607_v27, 0.5  ;;  %4494 = vpow2.f32 %v3204_v23  ;;  %v3753_v44 = vpop.permute.xlu1 %3752 }
 0x1cd   : > { %v2116_v11 = vsel %vm2084_vm4, %v2068_v1, %v2100_v57  ;;  %v2829_v45 = vmul.f32 %v4485_v39, %v2813_v59  ;;  %v3639_v22 = vunpack.c.h.bf16 %v6940_v3  ;;  %v7085_v4 = vpop.eup %4488  ;;  %v3734_v17 = vunpack.i.l.bf16 %v7054_v24 }
 0x1ce   : > { %v2420_v8 = vmul.f32 10.0, %v2116_v11  ;;  %4496 = vlog2.f32 %v7080_v14  ;;  %v2607_v58 = vand.u32 2147483647, %v7075_v36  ;;  %v7092_v54 = vadd.f32 1.0, %v7085_v4  ;;  %v7124_v11 = vpop.permute.xlu0 %3747 }
 0x1cf   : > { %4498 = vpow2.f32 %v2444_v19  ;;  %v2861_v61 = vmul.f32 %v6954_v63, %v2829_v45  ;;  %v7095_v21 = vsel %vm2135_vm6, 1.0, %v8757_v12  ;;  %v3206_v7 = vmul.f32 1.442695, %v3180_v48 }
 0x1d0   : > { %8949 = vst [vmem:[#allocation129_spill] sm:$0xff] %v7095_v21  ;;  %4500 = vrcp.f32 %v7080_v14  ;;  %v2623_v3 = vsub.f32 0.0, %v2607_v58  ;;  %v2687_v39 = vmax.f32 %v7075_v36, 0.0  ;;  %v2703_v63 = vmul.f32 %v3639_v22, %v7075_v36 }
 0x1d1   : > { %v2877_v24 = vsel %vm2845_vm5, %v2829_v45, %v2861_v61  ;;  %4502 = vlog2.f32 %v7092_v54  ;;  %vm2895_vm7 = vcmp.gt.f32.partialorder %v3639_v22, 0.5  ;;  %v2446_v35 = vmul.f32 1.442695, %v2420_v8  ;;  %v7134_v8 = vld [vmem:[%s4808_s26 + $0x1f0] sm:$0xff] }
 0x1d2   : > { %v3181_v33 = vmul.f32 10.0, %v2877_v24  ;;  %v2652_v23 = vmul.f32 1.442695, %v2623_v3  ;;  %v7107_v1 = vsel %vm2895_vm7, 1.0, %v8757_v12  ;;  %4504 = vrcp.f32 %v7092_v54 }
 0x1d3   : > { %8950 = vst [vmem:[#allocation130_spill] sm:$0xff] %v7107_v1  ;;  %v7112_v5 = vsel %vm228_vm2, %v3744_v18, 0.0  ;;  %v4031_v56 = vpack.i.bf16 %v7107_v1, %v7095_v21  ;;  %v1847_v55 = vand.u32 2147483647, %v7100_v62  ;;  %v1927_v57 = vmax.f32 %v7100_v62, 0.0 }
 0x1d4   : > { %v3208_v19 = vmul.f32 1.442695, %v3181_v33  ;;  %4506 = vpow2.f32 %v2652_v23  ;;  %v1943_v59 = vmul.f32 %v3607_v27, %v7100_v62  ;;  %v7121_v48 = vsel %vm228_vm2, %v3735_v13, 0.0 }
 0x1d5   : > { %4508 = vpow2.f32 %v3206_v7  ;;  %v1863_v18 = vsub.f32 0.0, %v1847_v55  ;;  %4032 = vrot.lane.b32.xlu1 %v4031_v56, %s4665_s23  ;;  %vm2085_vm8 = vcmp.ge.f32.partialorder %v6868_v43, 0.0  ;;  %v7129_v45 = vsel %vm228_vm2, %v3734_v17, 0.0  ;;  %4027 = vrot.lane.b32.xlu0 %v4031_v56, %s4664_s18  ;;  %v4558_v7 = vld [vmem:[%s4814_s19 + $0xb8] sm:$0xff]  }
 0x1d6   : > { %4510 = vpow2.f32 %v2446_v35  ;;  %v7131_v27 = vsub.f32 %v2687_v39, %v2703_v63  ;;  %v3755_v22 = vunpack.i.h.bf16 %v3753_v44  ;;  %v4491_v13 = vpop.eup %4490  ;;  %v3754_v61 = vunpack.i.l.bf16 %v3753_v44  ;;  %v4559_v39 = vld [vmem:[%s4814_s19 + $0xf8] sm:$0xff]  }
 0x1d7   : > { %4512 = vpow2.f32 %v3208_v19  ;;  %v1892_v58 = vmul.f32 1.442695, %v1863_v18  ;;  %v3610_v3 = vunpack.c.l.bf16 %v4558_v7  ;;  %v1985_v35 = vmul.f32 0.6931472, %v4491_v13  ;;  %v7156_v18 = vld [vmem:[%s4808_s26 + $0x170] sm:$0xff] }
 0x1d8   : > { %v4493_v24 = vpop.eup %4492  ;;  %v7138_v33 = vsub.f32 %v1927_v57, %v1943_v59  ;;  %v3750_v17 = vunpack.i.h.bf16 %v7124_v11  ;;  %v3642_v63 = vunpack.c.l.bf16 %v4559_v39  ;;  %v2608_v55 = vand.u32 2147483647, %v7134_v8 }
 0x1d9   : > { %v2037_v23 = vmul.f32 %v4493_v24, %v7052_v20  ;;  %4514 = vpow2.f32 %v1892_v58  ;;  %vm2136_vm9 = vcmp.gt.f32.partialorder %v3610_v3, 0.5  ;;  %v7144_v19 = vpop.eup %4494  ;;  %v2005_v56 = vadd.f32 %v1985_v35, %v6966_v9 }
 0x1da   : > { %8951 = vst [vmem:[#allocation131_spill] sm:$0xff] %v7144_v19  ;;  %v7149_v44 = vsel %vm228_vm2, %v3755_v22, 0.0  ;;  %v3749_v57 = vunpack.i.l.bf16 %v7124_v11  ;;  %v7153_v59 = vsel %vm2136_vm9, 1.0, %v8757_v12  ;;  %vm2846_vm10 = vcmp.ge.f32.partialorder %v6937_v29, 0.0 }
 0x1db   : > { %8952 = vst [vmem:[#allocation132_spill] sm:$0xff] %v7153_v59  ;;  %v4497_v20 = vpop.eup %4496  ;;  %v2053_v13 = vsub.f32 2.0, %v2037_v23  ;;  %v7161_v58 = vsel %vm228_vm2, %v3754_v61, 0.0  ;;  %v2624_v9 = vsub.f32 0.0, %v2608_v55  ;;  %vm2896_vm11 = vcmp.gt.f32.partialorder %v3642_v63, 0.5 }
 0x1dc   : > { %v7163_v7 = vpop.eup %4498  ;;  %v2484_v22 = vadd.f32 %v7058_v40, %v2005_v56  ;;  %v2747_v11 = vmul.f32 0.6931472, %v4497_v20  ;;  %v7168_v35 = vsel %vm228_vm2, %v3750_v17, 0.0  ;;  %v7171_v39 = vsel %vm2896_vm11, 1.0, %v8757_v12  ;;  %v3763_v56 = vpop.permute.xlu1 %3762 }
 0x1dd   : > { %8953 = vst [vmem:[#allocation133_spill] sm:$0xff] %v7163_v7  ;;  %8954 = vst [vmem:[#allocation134_spill] sm:$0xff] %v7171_v39  ;;  %v4501_v23 = vpop.eup %4500  ;;  %v2069_v21 = vmul.f32 %v4493_v24, %v2053_v13  ;;  %v2654_v1 = vmul.f32 1.442695, %v2624_v9  ;;  %v4041_v61 = vpack.i.bf16 %v7171_v39, %v7153_v59  ;;  %v1848_v55 = vand.u32 2147483647, %v7156_v18 }
 0x1de   : > { %v4503_v19 = vpop.eup %4502  ;;  %v2766_v7 = vadd.f32 %v2747_v11, %v7033_v10  ;;  %v2798_v40 = vmul.f32 %v4501_v23, %v7080_v14  ;;  %vm2086_vm12 = vcmp.ge.f32.partialorder %v6969_v51, 0.0  ;;  %v2688_v17 = vmax.f32 %v7134_v8, 0.0 }
 0x1df   : > { %v2704_v12 = vmul.f32 %v3642_v63, %v7134_v8  ;;  %v2101_v24 = vmul.f32 %v7038_v41, %v2069_v21  ;;  %v1987_v20 = vmul.f32 0.6931472, %v4503_v19  ;;  %4516 = vpow2.f32 %v2654_v1  ;;  %4042 = vrot.lane.b32.xlu1 %v4041_v61, %s4665_s23  ;;  %v4505_v9 = vpop.eup %4504  ;;  %4037 = vrot.lane.b32.xlu0 %v4041_v61, %s4664_s18 }
 0x1e0   : > { %v1864_v13 = vsub.f32 0.0, %v1848_v55  ;;  %v2814_v59 = vsub.f32 2.0, %v2798_v40  ;;  %v7184_v10 = vadd.f32 %v7077_v25, %v2766_v7  ;;  %v1928_v14 = vmax.f32 %v7156_v18, 0.0  ;;  %v7199_v7 = vpop.permute.xlu0 %3757 }
 0x1e1   : > { %v1944_v11 = vmul.f32 %v3610_v3, %v7156_v18  ;;  %v7188_v39 = vpop.eup %4506  ;;  %v2117_v63 = vsel %vm2085_vm8, %v2069_v21, %v2101_v24  ;;  %v2006_v41 = vadd.f32 %v1987_v20, %v7046_v50  ;;  %v2038_v1 = vmul.f32 %v4505_v9, %v7092_v54 }
 0x1e2   : > { %8955 = vst [vmem:[#allocation135_spill] sm:$0xff] %v7184_v10  ;;  %v1894_v19 = vmul.f32 1.442695, %v1864_v13  ;;  %v7194_v55 = vpop.eup %4508  ;;  %v2421_v40 = vmul.f32 10.0, %v2117_v63  ;;  %v2830_v53 = vmul.f32 %v4501_v23, %v2814_v59  ;;  %v7197_v25 = vadd.f32 1.0, %v7188_v39  ;;  %v3773_v23 = vpop.permute.xlu1 %3772 }
 0x1e3   : > { %8956 = vst [vmem:[#allocation136_spill] sm:$0xff] %v7194_v55  ;;  %v7201_v3 = vpop.eup %4510  ;;  %v2054_v10 = vsub.f32 2.0, %v2038_v1  ;;  %v7203_v49 = vadd.f32 %v2484_v22, %v2006_v41  ;;  %v3765_v43 = vunpack.i.h.bf16 %v3763_v56  ;;  %v3764_v59 = vunpack.i.l.bf16 %v3763_v56  ;;  %v8969_v55 = vld [vmem:[#allocation15_spill] sm:$0xff] }
 0x1e4   : > { %8957 = vst [vmem:[#allocation137_spill] sm:$0xff] %v7201_v3  ;;  %4518 = vpow2.f32 %v1894_v19  ;;  %v7205_v50 = vpop.eup %4512  ;;  %v2448_v54 = vmul.f32 1.442695, %v2421_v40  ;;  %v2862_v21 = vmul.f32 %v7065_v16, %v2830_v53  ;;  %v7213_v22 = vsel %vm228_vm2, %v3749_v57, 0.0 }
 0x1e5   : > { %8958 = vst [vmem:[#allocation138_spill] sm:$0xff] %v7203_v49  ;;  %8959 = vst [vmem:[#allocation139_spill] sm:$0xff] %v7205_v50  ;;  %4520 = vlog2.f32 %v7197_v25  ;;  %v2070_v24 = vmul.f32 %v4505_v9, %v2054_v10  ;;  %v7215_v20 = vsub.f32 %v2688_v17, %v2704_v12  ;;  %v7221_v63 = vsub.f32 %v1928_v14, %v1944_v11  ;;  %v3768_v10 = vpop.permute.xlu0 %3767 }
 0x1e6   : > { %4522 = vrcp.f32 %v7197_v25  ;;  %v7217_v13 = vpop.eup %4514  ;;  %v2878_v16 = vsel %vm2846_vm10, %v2830_v53, %v2862_v21  ;;  %v7225_v61 = vsel %vm228_vm2, %v3765_v43, 0.0  ;;  %v3760_v56 = vunpack.i.h.bf16 %v7199_v7  ;;  %v3783_v40 = vpop.permute.xlu1 %3782 }
 0x1e7   : > { %4524 = vpow2.f32 %v2448_v54  ;;  %v3182_v9 = vmul.f32 10.0, %v2878_v16  ;;  %v2102_v57 = vmul.f32 %v7085_v4, %v2070_v24  ;;  %v7230_v17 = vadd.f32 1.0, %v7217_v13 }
 0x1e8   : > { %v7234_v12 = vsel %vm228_vm2, %v3764_v59, 0.0  ;;  %v3759_v29 = vunpack.i.l.bf16 %v7199_v7  ;;  %vm229_vm13 = vcmp.lt.s32.totalorder %v6973_v42, 127  ;;  %v3775_v53 = vunpack.i.h.bf16 %v3773_v23  ;;  %v9111_v42 = vld [vmem:[#allocation46_spill] sm:$0xff] }
 0x1e9   : > { %v3210_v14 = vmul.f32 1.442695, %v3182_v9  ;;  %v2118_v11 = vsel %vm2086_vm12, %v2070_v24, %v2102_v57  ;;  %4526 = vlog2.f32 %v7230_v17  ;;  %v3774_v4 = vunpack.i.l.bf16 %v3773_v23  ;;  %v8960_v57 = vld [vmem:[#allocation17_spill] sm:$0xff] }
 0x1ea   : > { %v2422_v41 = vmul.f32 10.0, %v2118_v11  ;;  %4528 = vrcp.f32 %v7230_v17  ;;  %v7244_v1 = vsel %vm228_vm2, %v3760_v56, 0.0  ;;  %v7247_v19 = vshrl.u32 %v8941_v28, 7 }
 0x1eb   : > { %4530 = vpow2.f32 %v3210_v14  ;;  %v713_v7 = vsel %vm229_vm13, %v3775_v53, 0.0  ;;  %v712_v51 = vsel %vm229_vm13, %v3774_v4, 0.0  ;;  %v3770_v43 = vunpack.i.h.bf16 %v3768_v10  ;;  %v8961_v14 = vld [vmem:[#allocation18_spill] sm:$0xff] }
 0x1ec   : > { %v7253_v54 = vpop.eup %4516  ;;  %v2450_v21 = vmul.f32 1.442695, %v2422_v41  ;;  %v728_v59 = vmax.f32 %v7129_v45, %v712_v51  ;;  %v729_v23 = vmax.f32 %v7121_v48, %v713_v7  ;;  %v3769_v24 = vunpack.i.l.bf16 %v3768_v10 }
 0x1ed   : > { %v7258_v28 = vadd.f32 1.0, %v7253_v54  ;;  %v711_v16 = vsel %vm229_vm13, %v3770_v43, 0.0  ;;  %v3785_v56 = vunpack.i.h.bf16 %v3783_v40  ;;  %v3784_v9 = vunpack.i.l.bf16 %v3783_v40  ;;  %v8962_v43 = vld [vmem:[#allocation11_spill] sm:$0xff] }
 0x1ee   : > { %4532 = vpow2.f32 %v2450_v21  ;;  %v744_v53 = vmax.f32 %v8960_v57, %v728_v59  ;;  %v7264_v11 = vmax.f32 %v8961_v14, %v729_v23  ;;  %v710_v45 = vsel %vm229_vm13, %v3769_v24, 0.0  ;;  %v8963_v21 = vld [vmem:[#allocation12_spill] sm:$0xff] }
 0x1ef   : > { %4534 = vlog2.f32 %v7258_v28  ;;  %vm774_vm14 = vcmp.lt.s32.totalorder %v7247_v19, 1  ;;  %v726_v48 = vmax.f32 %v7031_v31, %v710_v45  ;;  %v727_v10 = vmax.f32 %v7013_v60, %v711_v16 }
 0x1f0   : > { %vm2847_vm15 = vcmp.ge.f32.partialorder %v7075_v36, 0.0  ;;  %4536 = vrcp.f32 %v7258_v28  ;;  %vm823_vm0 = vcmp.lt.s32.totalorder %v7247_v19, 7  ;;  %v809_v41 = vrot.slane %v744_v53, 1 }
 0x1f1   : > { %v7272_v4 = vpop.eup %4518  ;;  %v717_v40 = vsel %vm229_vm13, %v3785_v56, 0.0  ;;  %v7284_v60 = vmax.f32 %v8962_v43, %v726_v48  ;;  %v743_v59 = vmax.f32 %v8963_v21, %v727_v10  ;;  %v760_v16 = vrot.slane %v744_v53, 7  ;;  %v3778_v48 = vpop.permute.xlu0 %3777 }
 0x1f2   : > { %v4521_v7 = vpop.eup %4520  ;;  %v7280_v51 = vadd.f32 1.0, %v7272_v4  ;;  %v716_v14 = vsel %vm229_vm13, %v3784_v9, 0.0  ;;  %v733_v31 = vmax.f32 %v7063_v2, %v717_v40  ;;  %v7299_v10 = vsel %vm228_vm2, %v3759_v29, 0.0 }
 0x1f3   : > { %v4523_v23 = vpop.eup %4522  ;;  %v2749_v24 = vmul.f32 0.6931472, %v4521_v7  ;;  %v8965_v7 = vrot.slane %v7264_v11, 1  ;;  %v759_v9 = vrot.slane %v743_v59, 7  ;;  %vm2087_vm1 = vcmp.ge.f32.partialorder %v7100_v62, 0.0 }
 0x1f4   : > { %v2799_v56 = vmul.f32 %v4523_v23, %v7197_v25  ;;  %4538 = vlog2.f32 %v7280_v51  ;;  %v7294_v43 = vpop.eup %4524  ;;  %v808_v40 = vrot.slane %v743_v59, 1  ;;  %v732_v45 = vmax.f32 %v7112_v5, %v716_v14 }
 0x1f5   : > { %8964 = vst [vmem:[#allocation17_spill] sm:$0xff] %v7294_v43  ;;  %4540 = vrcp.f32 %v7280_v51  ;;  %v836_v25 = vsel %vm823_vm0, %v809_v41, %v8965_v7  ;;  %v8966_v49 = vrot.slane %v7264_v11, 7  ;;  %v788_v43 = vsel %vm774_vm14, %v759_v9, %v760_v16 }
 0x1f6   : > { %v2815_v21 = vsub.f32 2.0, %v2799_v56  ;;  %v4527_v57 = vpop.eup %4526  ;;  %v8967_v7 = vrot.slane %v7284_v60, 7  ;;  %v3780_v50 = vunpack.i.h.bf16 %v3778_v48  ;;  %v7321_v3 = vadd.f32 %v2749_v24, %v7131_v27 }
 0x1f7   : > { %v7312_v29 = vsel %vm774_vm14, %v760_v16, %v8966_v49  ;;  %v4529_v2 = vpop.eup %4528  ;;  %v837_v14 = vsel %vm823_vm0, %v808_v40, %v809_v41  ;;  %v7326_v49 = vmax.f32 %v8969_v55, %v733_v31  ;;  %v1989_v16 = vmul.f32 0.6931472, %v4527_v57 }
 0x1f8   : > { %v789_v56 = vsel %vm774_vm14, %v8967_v7, %v759_v9  ;;  %8968 = vst [vmem:[#allocation18_spill] sm:$0xff] %v7321_v3  ;;  %v2831_v5 = vmul.f32 %v4523_v23, %v2815_v21  ;;  %v7328_v30 = vpop.eup %4530  ;;  %v2039_v6 = vmul.f32 %v4529_v2, %v7230_v17  ;;  %v858_v26 = vmax.f32 %v788_v43, %v836_v25  ;;  %v8971_v23 = vld [vmem:[#allocation14_spill] sm:$0xff] }
 0x1f9   : > { %v857_v32 = vmax.f32 %v789_v56, %v837_v14  ;;  %v8970_v7 = vrot.slane %v7284_v60, 1  ;;  %v748_v41 = vmax.f32 %v8971_v23, %v732_v45  ;;  %v3779_v24 = vunpack.i.l.bf16 %v3778_v48  ;;  %v8973_v56 = vld [vmem:[#allocation9_spill] sm:$0xff]  ;;  %v3793_v14 = vpop.permute.xlu1 %3792 }
 0x1fa   : > { %v2863_v9 = vmul.f32 %v7188_v39, %v2831_v5  ;;  %v2055_v55 = vsub.f32 2.0, %v2039_v6  ;;  %v7341_v21 = vmax.f32 %v744_v53, %v858_v26  ;;  %v715_v17 = vsel %vm229_vm13, %v3780_v50, 0.0 }
 0x1fb   : > { %v7336_v27 = vsel %vm823_vm0, %v8970_v7, %v808_v40  ;;  %v7339_v31 = vmax.f32 %v743_v59, %v857_v32  ;;  %v7345_v57 = vpop.eup %4532  ;;  %vm2848_vm3 = vcmp.ge.f32.partialorder %v7134_v8, 0.0  ;;  %v8702_v43 = vrot.slane %v7326_v49, 1 }
 0x1fc   : > { %v2879_v39 = vsel %vm2847_vm15, %v2831_v5, %v2863_v9  ;;  %v813_v25 = vrot.slane %v748_v41, 1  ;;  %v731_v45 = vmax.f32 %v7005_v34, %v715_v17  ;;  %v4535_v6 = vpop.eup %4534  ;;  %v7353_v32 = vadd.f32 %v1989_v16, %v7138_v33  ;;  %v8974_v33 = vld [vmem:[#allocation36_spill] sm:$0xff] }
 0x1fd   : > { %v2071_v26 = vmul.f32 %v4529_v2, %v2055_v55  ;;  %v8703_v53 = vrot.slane %v7326_v49, 7  ;;  %v764_v50 = vrot.slane %v748_v41, 7  ;;  %v4537_v59 = vpop.eup %4536  ;;  %v3183_v48 = vmul.f32 10.0, %v2879_v39 }
 0x1fe   : > { %8972 = vst [vmem:[#allocation11_spill] sm:$0xff] %v7353_v32  ;;  %v2751_v40 = vmul.f32 0.6931472, %v4535_v6  ;;  %v7358_v36 = vmul.f32 %v5363_v47, %v7339_v31  ;;  %v747_v5 = vmax.f32 %v8973_v56, %v731_v45  ;;  %v2800_v9 = vmul.f32 %v4537_v59, %v7258_v28 }
 0x1ff   : > { %v2103_v34 = vmul.f32 %v7217_v13, %v2071_v26  ;;  %v7365_v2 = vmul.f32 %v8974_v33, %v7341_v21  ;;  %v714_v16 = vsel %vm229_vm13, %v3779_v24, 0.0  ;;  %vm2088_vm4 = vcmp.ge.f32.partialorder %v7156_v18, 0.0  ;;  %v8982_v18 = vld [vmem:[#allocation19_spill] sm:$0xff] }
 0x200   : > { %v832_v47 = vsel %vm823_vm0, %v813_v25, %v8702_v43  ;;  %v763_v7 = vrot.slane %v747_v5, 7  ;;  %v812_v23 = vrot.slane %v747_v5, 1  ;;  %v730_v13 = vmax.f32 %v7009_v46, %v714_v16 }
 0x201   : > { %v4539_v55 = vpop.eup %4538  ;;  %v2119_v28 = vsel %vm2087_vm1, %v2071_v26, %v2103_v34  ;;  %v2816_v17 = vsub.f32 2.0, %v2800_v9  ;;  %v7381_v24 = vsel %vm774_vm14, %v764_v50, %v8703_v53  ;;  %v3795_v39 = vunpack.i.h.bf16 %v3793_v14  ;;  %v8976_v34 = vld [vmem:[#allocation8_spill] sm:$0xff] }
 0x202   : > { %v4541_v45 = vpop.eup %4540  ;;  %v3212_v6 = vmul.f32 1.442695, %v3183_v48  ;;  %v2423_v56 = vmul.f32 10.0, %v2119_v28  ;;  %v7384_v33 = vadd.f32 %v2751_v40, %v7215_v20  ;;  %v784_v46 = vsel %vm774_vm14, %v763_v7, %v764_v50 }
 0x203   : > { %v2832_v16 = vmul.f32 %v4537_v59, %v2816_v17  ;;  %v2040_v62 = vmul.f32 %v4541_v45, %v7280_v51  ;;  %v862_v26 = vmax.f32 %v784_v46, %v832_v47  ;;  %v746_v9 = vmax.f32 %v8976_v34, %v730_v13 }
 0x204   : > { %8975 = vst [vmem:[#allocation12_spill] sm:$0xff] %v7384_v33  ;;  %v1991_v43 = vmul.f32 0.6931472, %v4539_v55  ;;  %v833_v53 = vsel %vm823_vm0, %v812_v23, %v813_v25  ;;  %v721_v48 = vsel %vm229_vm13, %v3795_v39, 0.0  ;;  %v3794_v28 = vunpack.i.l.bf16 %v3793_v14 }
 0x205   : > { %v2452_v32 = vmul.f32 1.442695, %v2423_v56  ;;  %v2864_v20 = vmul.f32 %v7253_v54, %v2832_v16  ;;  %v2056_v40 = vsub.f32 2.0, %v2040_v62  ;;  %v762_v33 = vrot.slane %v746_v9, 7  ;;  %v3788_v56 = vpop.permute.xlu0 %3787 }
 0x206   : > { %v7395_v50 = vmax.f32 %v748_v41, %v862_v26  ;;  %v811_v59 = vrot.slane %v746_v9, 1  ;;  %v737_v51 = vmax.f32 %v7149_v44, %v721_v48  ;;  %v720_v47 = vsel %vm229_vm13, %v3794_v28, 0.0  ;;  %v3803_v48 = vpop.permute.xlu1 %3802  ;;  %v8981_v28 = vld [vmem:[#allocation25_spill] sm:$0xff] }
 0x207   : > { %v2880_v25 = vsel %vm2848_vm3, %v2832_v16, %v2864_v20  ;;  %v2072_v13 = vmul.f32 %v4541_v45, %v2056_v40  ;;  %v785_v14 = vsel %vm774_vm14, %v762_v33, %v763_v7  ;;  %v8977_v55 = vrot.slane %v7264_v11, 7 }
 0x208   : > { %v3184_v41 = vmul.f32 10.0, %v2880_v25  ;;  %v834_v17 = vsel %vm823_vm0, %v811_v59, %v812_v23  ;;  %v8978_v44 = vrot.slane %v7264_v11, 1  ;;  %v861_v8 = vmax.f32 %v785_v14, %v833_v53  ;;  %v8985_v25 = vld [vmem:[#allocation13_spill] sm:$0xff] }
 0x209   : > { %v786_v54 = vsel %vm774_vm14, %v8977_v55, %v762_v33  ;;  %4542 = vpow2.f32 %v3212_v6  ;;  %v2104_v45 = vmul.f32 %v7272_v4, %v2072_v13  ;;  %v8979_v33 = vld [vmem:[#allocation21_spill] sm:$0xff]  ;;  %v736_v23 = vmax.f32 %v7161_v58, %v720_v47 }
 0x20a   : > { %v835_v39 = vsel %vm823_vm0, %v8978_v44, %v811_v59  ;;  %v860_v46 = vmax.f32 %v786_v54, %v834_v17  ;;  %v3214_v16 = vmul.f32 1.442695, %v3184_v41  ;;  %v7416_v62 = vmax.f32 %v747_v5, %v861_v8  ;;  %v8984_v59 = vld [vmem:[#allocation26_spill] sm:$0xff]  ;;  %v3798_v54 = vpop.permute.xlu0 %3797 }
 0x20b   : > { %v859_v7 = vmax.f32 %v7312_v29, %v835_v39  ;;  %v7419_v26 = vmax.f32 %v8979_v33, %v737_v51  ;;  %v2120_v34 = vsel %vm2088_vm4, %v2072_v13, %v2104_v45  ;;  %v3790_v4 = vunpack.i.h.bf16 %v3788_v56  ;;  %v8986_v45 = vld [vmem:[#allocation24_spill] sm:$0xff] }
 0x20c   : > { %v7427_v6 = vmax.f32 %v746_v9, %v860_v46  ;;  %4544 = vpow2.f32 %v2452_v32  ;;  %v7430_v29 = vadd.f32 %v1991_v43, %v7221_v63  ;;  %v2424_v5 = vmul.f32 10.0, %v2120_v34  ;;  %v8983_v9 = vld [vmem:[#allocation20_spill] sm:$0xff]  ;;  %v8987_v34 = vld [vmem:[#allocation23_spill] sm:$0xff] }
 0x20d   : > { %v7425_v53 = vmax.f32 %v7264_v11, %v859_v7  ;;  %v7434_v20 = vmul.f32 %v8981_v28, %v7395_v50  ;;  %4546 = vpow2.f32 %v3214_v16  ;;  %v7438_v58 = vmul.f32 %v8982_v18, %v7416_v62 }
 0x20e   : > { %8980 = vst [vmem:[#allocation15_spill] sm:$0xff] %v7430_v29  ;;  %v8704_v11 = vrot.slane %v7419_v26, 1  ;;  %v752_v40 = vmax.f32 %v8983_v9, %v736_v23  ;;  %v8705_v63 = vrot.slane %v7419_v26, 7  ;;  %v719_v43 = vsel %vm229_vm13, %v3790_v4, 0.0 }
 0x20f   : > { %v7444_v32 = vmul.f32 %v8984_v59, %v7425_v53  ;;  %v3789_v51 = vunpack.i.l.bf16 %v3788_v56  ;;  %v2454_v47 = vmul.f32 1.442695, %v2424_v5  ;;  %v7451_v13 = vmul.f32 %v8985_v25, %v7427_v6  ;;  %v7481_v25 = vpop.permute.xlu0 %3847 }
 0x210   : > { %v817_v14 = vrot.slane %v752_v40, 1  ;;  %v735_v55 = vmax.f32 %v7168_v35, %v719_v43  ;;  %v768_v41 = vrot.slane %v752_v40, 7  ;;  %v7457_v44 = vadd.s32 120, %v7247_v19  ;;  %v7466_v35 = vpop.permute.xlu1 %3807 }
 0x211   : > { %v718_v17 = vsel %vm229_vm13, %v3789_v51, 0.0  ;;  %v3805_v39 = vunpack.i.h.bf16 %v3803_v48  ;;  %vm230_vm5 = vcmp.gt.s32.totalorder %v7247_v19, 0  ;;  %v3804_v16 = vunpack.i.l.bf16 %v3803_v48 }
 0x212   : > { %v828_v8 = vsel %vm823_vm0, %v817_v14, %v8704_v11  ;;  %v734_v56 = vmax.f32 %v7213_v22, %v718_v17  ;;  %v751_v7 = vmax.f32 %v8986_v45, %v735_v55  ;;  %v3800_v33 = vunpack.i.h.bf16 %v3798_v54  ;;  %v8989_v55 = vld [vmem:[#allocation30_spill] sm:$0xff] }
 0x213   : > { %v725_v46 = vsel %vm229_vm13, %v3805_v39, 0.0  ;;  %v3799_v23 = vunpack.i.l.bf16 %v3798_v54  ;;  %4548 = vpow2.f32 %v2454_v47  ;;  %vm261_vm6 = vcmp.lt.s32.totalorder %v7457_v44, 127 }
 0x214   : > { %v750_v4 = vmax.f32 %v8987_v34, %v734_v56  ;;  %v767_v5 = vrot.slane %v751_v7, 7  ;;  %v816_v28 = vrot.slane %v751_v7, 1  ;;  %v741_v18 = vmax.f32 %v7225_v61, %v725_v46 }
 0x215   : > { %v724_v22 = vsel %vm229_vm13, %v3804_v16, 0.0  ;;  %v723_v9 = vsel %vm229_vm13, %v3800_v33, 0.0  ;;  %v722_v39 = vsel %vm229_vm13, %v3799_v23, 0.0  ;;  %v8990_v45 = vrot.slane %v7326_v49, 7 }
 0x216   : > { %v766_v59 = vrot.slane %v750_v4, 7  ;;  %v780_v48 = vsel %vm774_vm14, %v767_v5, %v768_v41  ;;  %v815_v43 = vrot.slane %v750_v4, 1  ;;  %v829_v51 = vsel %vm823_vm0, %v816_v28, %v817_v14  ;;  %v7483_v61 = vpop.eup %4542 }
 0x217   : > { %8988 = vst [vmem:[#allocation14_spill] sm:$0xff] %v7483_v61  ;;  %v866_v47 = vmax.f32 %v780_v48, %v828_v8  ;;  %v757_v54 = vmax.f32 %v8989_v55, %v741_v18  ;;  %v740_v17 = vmax.f32 %v7234_v12, %v724_v22  ;;  %v8991_v8 = vrot.slane %v7326_v49, 1  ;;  %v7501_v12 = vpop.permute.xlu1 %3812  ;;  %v8993_v48 = vld [vmem:[#allocation28_spill] sm:$0xff] }
 0x218   : > { %v781_v56 = vsel %vm774_vm14, %v766_v59, %v767_v5  ;;  %v782_v14 = vsel %vm774_vm14, %v8990_v45, %v766_v59  ;;  %v830_v46 = vsel %vm823_vm0, %v815_v43, %v816_v28  ;;  %v7512_v28 = vsel %vm774_vm14, %v768_v41, %v8705_v63 }
 0x219   : > { %v831_v16 = vsel %vm823_vm0, %v8991_v8, %v815_v43  ;;  %v864_v23 = vmax.f32 %v782_v14, %v830_v46  ;;  %v865_v34 = vmax.f32 %v781_v56, %v829_v51  ;;  %v7504_v5 = vmax.f32 %v752_v40, %v866_v47  ;;  %v7506_v18 = vpop.eup %4544  ;;  %v7535_v46 = vpop.permute.xlu0 %3882 }
 0x21a   : > { %v863_v33 = vmax.f32 %v7381_v24, %v831_v16  ;;  %8992 = vst [vmem:[#allocation9_spill] sm:$0xff] %v7506_v18  ;;  %v773_v22 = vrot.slane %v757_v54, 7  ;;  %v822_v59 = vrot.slane %v757_v54, 1  ;;  %v7515_v43 = vmax.f32 %v8993_v48, %v740_v17  ;;  %v7517_v55 = vpop.eup %4546  ;;  %v8998_v16 = vld [vmem:[#allocation35_spill] sm:$0xff] }
 0x21b   : > { %8994 = vst [vmem:[#allocation36_spill] sm:$0xff] %v7517_v55  ;;  %v738_v40 = vmax.f32 %v7299_v10, %v722_v39  ;;  %v739_v51 = vmax.f32 %v7244_v1, %v723_v9  ;;  %v3810_v47 = vunpack.i.h.bf16 %v7466_v35  ;;  %v8995_v41 = vrot.slane %v7284_v60, 7  ;;  %v8997_v9 = vld [vmem:[#allocation39_spill] sm:$0xff] }
 0x21c   : > { %v7520_v24 = vmax.f32 %v7326_v49, %v863_v33  ;;  %v772_v56 = vrot.slane %v7515_v43, 7  ;;  %v821_v17 = vrot.slane %v7515_v43, 1  ;;  %v8996_v14 = vrot.slane %v7284_v60, 1 }
 0x21d   : > { %v790_v45 = vsel %vm774_vm14, %v773_v22, %v8995_v41  ;;  %v7537_v10 = vmax.f32 %v750_v4, %v864_v23  ;;  %v7539_v1 = vmax.f32 %v751_v7, %v865_v34  ;;  %v7543_v39 = vmul.f32 %v8997_v9, %v7504_v5  ;;  %v7556_v23 = vpop.permute.xlu1 %3817  ;;  %v9000_v9 = vld [vmem:[#allocation33_spill] sm:$0xff] }
 0x21e   : > { %v839_v49 = vsel %vm823_vm0, %v822_v59, %v8996_v14  ;;  %v791_v8 = vsel %vm230_vm5, %v790_v45, 0.0  ;;  %v7549_v33 = vmul.f32 %v8998_v16, %v7520_v24  ;;  %v775_v48 = vsel %vm774_vm14, %v772_v56, %v773_v22  ;;  %v8999_v14 = vld [vmem:[#allocation32_spill] sm:$0xff] }
 0x21f   : > { %v855_v4 = vsel %vm261_vm6, %v839_v49, 0.0  ;;  %v856_v7 = vmax.f32 %v791_v8, %v7336_v27  ;;  %v824_v34 = vsel %vm823_vm0, %v821_v17, %v822_v59  ;;  %v754_v45 = vmax.f32 %v8999_v14, %v738_v40  ;;  %v9001_v40 = vld [vmem:[#allocation16_spill] sm:$0xff] }
 0x220   : > { %v871_v41 = vmax.f32 %v775_v48, %v855_v4  ;;  %v755_v11 = vmax.f32 %v9000_v9, %v739_v51  ;;  %v1427_v22 = vsel %vm228_vm2, %v3810_v47, 0.0  ;;  %v3809_v63 = vunpack.i.l.bf16 %v7466_v35  ;;  %v7568_v59 = vpop.eup %4548 }
 0x221   : > { %v872_v16 = vmax.f32 %v7284_v60, %v856_v7  ;;  %v3850_v49 = vunpack.i.h.bf16 %v7481_v25  ;;  %v770_v27 = vrot.slane %v754_v45, 7  ;;  %v819_v29 = vrot.slane %v754_v45, 1  ;;  %v7574_v7 = vpop.permute.xlu0 %3887 }
 0x222   : > { %v771_v8 = vrot.slane %v755_v11, 7  ;;  %v3849_v3 = vunpack.i.l.bf16 %v7481_v25  ;;  %v7570_v48 = vmax.f32 %v757_v54, %v871_v41  ;;  %v820_v4 = vrot.slane %v755_v11, 1 }
 0x223   : > { %v936_v51 = vmul.f32 %v9001_v40, %v872_v16  ;;  %v994_v60 = vadd.f32 %v7339_v31, %v872_v16  ;;  %v9002_v14 = vrot.slane %v7419_v26, 7  ;;  %v1426_v54 = vsel %vm228_vm2, %v3809_v63, 0.0  ;;  %v7592_v16 = vpop.permute.xlu1 %3822 }
 0x224   : > { %v776_v35 = vsel %vm774_vm14, %v771_v8, %v772_v56  ;;  %v777_v47 = vsel %vm774_vm14, %v770_v27, %v771_v8  ;;  %v825_v9 = vsel %vm823_vm0, %v820_v4, %v821_v17  ;;  %v826_v56 = vsel %vm823_vm0, %v819_v29, %v820_v4 }
 0x225   : > { %v778_v25 = vsel %vm774_vm14, %v9002_v14, %v770_v27  ;;  %v973_v41 = vadd.f32 %v7358_v36, %v936_v51  ;;  %v995_v31 = vadd.f32 %v994_v60, %v7341_v21  ;;  %v9003_v8 = vrot.slane %v7419_v26, 1  ;;  %v9004_v60 = vld [vmem:[#allocation51_spill] sm:$0xff] }
 0x226   : > { %v868_v40 = vmax.f32 %v778_v25, %v826_v56  ;;  %v869_v14 = vmax.f32 %v777_v47, %v825_v9  ;;  %v870_v63 = vmax.f32 %v776_v35, %v824_v34  ;;  %v1475_v17 = vsel %vm229_vm13, %v3850_v49, 0.0  ;;  %v9005_v47 = vld [vmem:[#allocation52_spill] sm:$0xff]  ;;  %v3893_v35 = vpop.permute.xlu0 %3892 }
 0x227   : > { %v827_v27 = vsel %vm823_vm0, %v9003_v8, %v819_v29  ;;  %v974_v36 = vadd.f32 %v973_v41, %v7365_v2  ;;  %v996_v21 = vadd.f32 %v995_v31, %v7425_v53  ;;  %v944_v4 = vmul.f32 %v9004_v60, %v7537_v10  ;;  %v9006_v49 = vld [vmem:[#allocation56_spill] sm:$0xff]  ;;  %v7632_v56 = vpop.permute.xlu1 %3827 }
 0x228   : > { %v867_v51 = vmax.f32 %v7512_v28, %v827_v27  ;;  %v7605_v55 = vmax.f32 %v754_v45, %v868_v40  ;;  %v7607_v61 = vmax.f32 %v755_v11, %v869_v14  ;;  %v1491_v29 = vmax.f32 %v1427_v22, %v1475_v17  ;;  %v9007_v11 = vld [vmem:[#allocation22_spill] sm:$0xff]  ;;  %v9009_v8 = vld [vmem:[#allocation60_spill] sm:$0xff] }
 0x229   : > { %v945_v34 = vmul.f32 %v9005_v47, %v7539_v1  ;;  %v975_v2 = vadd.f32 %v974_v36, %v7444_v32  ;;  %v997_v53 = vadd.f32 %v996_v21, %v7427_v6  ;;  %v1474_v28 = vsel %vm229_vm13, %v3849_v3, 0.0  ;;  %v9008_v6 = vld [vmem:[#allocation57_spill] sm:$0xff]  ;;  %v9010_v27 = vld [vmem:[#allocation10_spill] sm:$0xff]  ;;  %v9011_v60 = vld [vmem:[#allocation40_spill] sm:$0xff] }
 0x22a   : > { %v7617_v25 = vmul.f32 %v9006_v49, %v7570_v48  ;;  %v7620_v45 = vmax.f32 %v7515_v43, %v870_v63  ;;  %v7623_v22 = vmax.f32 %v9007_v11, %v1491_v29  ;;  %v1490_v41 = vmax.f32 %v1426_v54, %v1474_v28  ;;  %v3898_v47 = vpop.permute.xlu0 %3897 }
 0x22b   : > { %v976_v31 = vadd.f32 %v975_v2, %v7451_v13  ;;  %v883_v32 = vmax.f32 %v7419_v26, %v867_v51  ;;  %v7629_v9 = vmul.f32 %v9008_v6, %v7605_v55  ;;  %v998_v3 = vadd.f32 %v997_v53, %v7416_v62 }
 0x22c   : > { %v7636_v43 = vmul.f32 %v9009_v8, %v7607_v61  ;;  %v7639_v40 = vmax.f32 %v9010_v27, %v1490_v41  ;;  %v3815_v54 = vunpack.i.h.bf16 %v7501_v12  ;;  %v3814_v13 = vunpack.i.l.bf16 %v7501_v12  ;;  %v3833_v41 = vpop.permute.xlu1 %3832 }
 0x22d   : > { %v977_v26 = vadd.f32 %v976_v31, %v7438_v58  ;;  %v999_v14 = vadd.f32 %v998_v3, %v7395_v50  ;;  %v8709_v63 = vrot.slane %v7623_v22, 7  ;;  %v3885_v62 = vunpack.i.h.bf16 %v7535_v46 }
 0x22e   : > { %v8708_v36 = vrot.slane %v7623_v22, 1  ;;  %v1522_v21 = vrot.slane %v7639_v40, 7  ;;  %v1570_v51 = vrot.slane %v7639_v40, 1  ;;  %v3884_v17 = vunpack.i.l.bf16 %v7535_v46 }
 0x22f   : > { %v947_v29 = vmul.f32 %v9011_v60, %v883_v32  ;;  %v978_v12 = vadd.f32 %v977_v26, %v7434_v20  ;;  %v1000_v58 = vadd.f32 %v999_v14, %v7520_v24  ;;  %v3820_v50 = vunpack.i.h.bf16 %v7556_v23 }
 0x230   : > { %v7657_v2 = vsel %vm228_vm2, %v3815_v54, 0.0  ;;  %v7661_v53 = vsel %vm228_vm2, %v3814_v13, 0.0  ;;  %v7665_v46 = vsel %vm229_vm13, %v3885_v62, 0.0  ;;  %v3819_v28 = vunpack.i.l.bf16 %v7556_v23 }
 0x231   : > { %v979_v20 = vadd.f32 %v978_v12, %v7549_v33  ;;  %v1001_v24 = vadd.f32 %v1000_v58, %v7537_v10  ;;  %v7676_v49 = vsel %vm774_vm14, %v1522_v21, %v8709_v63  ;;  %v3890_v11 = vunpack.i.h.bf16 %v7574_v7 }
 0x232   : > { %v7685_v33 = vsel %vm823_vm0, %v1570_v51, %v8708_v36  ;;  %v7689_v10 = vsel %vm229_vm13, %v3884_v17, 0.0  ;;  %v3889_v23 = vunpack.i.l.bf16 %v7574_v7  ;;  %v3825_v31 = vunpack.i.h.bf16 %v7592_v16  ;;  %v3903_v17 = vpop.permute.xlu0 %3902 }
 0x233   : > { %v980_v6 = vadd.f32 %v979_v20, %v944_v4  ;;  %v1002_v3 = vadd.f32 %v1001_v24, %v7539_v1  ;;  %v7696_v8 = vsel %vm228_vm2, %v3820_v50, 0.0  ;;  %v3895_v27 = vunpack.i.h.bf16 %v3893_v35  ;;  %v9012_v24 = vld [vmem:[#allocation45_spill] sm:$0xff] }
 0x234   : > { %v7700_v54 = vsel %vm228_vm2, %v3819_v28, 0.0  ;;  %v2201_v13 = vsel %vm228_vm2, %v3890_v11, 0.0  ;;  %v3824_v26 = vunpack.i.l.bf16 %v7592_v16  ;;  %v3894_v7 = vunpack.i.l.bf16 %v3893_v35  ;;  %v3838_v28 = vpop.permute.xlu1 %3837 }
 0x235   : > { %v981_v14 = vadd.f32 %v980_v6, %v945_v34  ;;  %v1003_v4 = vadd.f32 %v1002_v3, %v7504_v5  ;;  %v2186_v1 = vsel %vm228_vm2, %v3889_v23, 0.0  ;;  %v2249_v62 = vsel %vm229_vm13, %v3895_v27, 0.0  ;;  %v9013_v27 = vld [vmem:[#allocation44_spill] sm:$0xff] }
 0x236   : > { %v7712_v60 = vsel %vm228_vm2, %v3825_v31, 0.0  ;;  %v2234_v12 = vsel %vm229_vm13, %v3894_v7, 0.0  ;;  %v2265_v58 = vmax.f32 %v2201_v13, %v2249_v62  ;;  %v3830_v16 = vunpack.i.h.bf16 %v7632_v56 }
 0x237   : > { %v982_v34 = vadd.f32 %v981_v14, %v7543_v39  ;;  %v1004_v5 = vadd.f32 %v1003_v4, %v883_v32  ;;  %v2250_v35 = vmax.f32 %v2186_v1, %v2234_v12  ;;  %v3829_v50 = vunpack.i.l.bf16 %v7632_v56 }
 0x238   : > { %v7721_v20 = vsel %vm228_vm2, %v3824_v26, 0.0  ;;  %v7724_v11 = vmax.f32 %v9012_v24, %v2265_v58  ;;  %v3900_v23 = vunpack.i.h.bf16 %v3898_v47  ;;  %v3899_v31 = vunpack.i.l.bf16 %v3898_v47 }
 0x239   : > { %v983_v6 = vadd.f32 %v982_v34, %v947_v29  ;;  %v1005_v3 = vadd.f32 %v1004_v5, %v7605_v55  ;;  %v2266_v13 = vmax.f32 %v9013_v27, %v2250_v35  ;;  %v3835_v39 = vunpack.i.h.bf16 %v3833_v41  ;;  %v3908_v55 = vpop.permute.xlu0 %3907  ;;  %v3843_v34 = vpop.permute.xlu1 %3842 }
 0x23a   : > { %v8707_v32 = vrot.slane %v7724_v11, 7  ;;  %v8706_v56 = vrot.slane %v7724_v11, 1  ;;  %v7732_v7 = vsel %vm228_vm2, %v3830_v16, 0.0  ;;  %v3834_v26 = vunpack.i.l.bf16 %v3833_v41 }
 0x23b   : > { %v984_v14 = vadd.f32 %v983_v6, %v7629_v9  ;;  %v2282_v4 = vrot.slane %v2266_v13, 7  ;;  %v2330_v1 = vrot.slane %v2266_v13, 1  ;;  %v7737_v29 = vsel %vm228_vm2, %v3829_v50, 0.0 }
 0x23c   : > { %v1006_v47 = vadd.f32 %v1005_v3, %v7607_v61  ;;  %v2188_v62 = vsel %vm228_vm2, %v3900_v23, 0.0  ;;  %v3905_v12 = vunpack.i.h.bf16 %v3903_v17  ;;  %v3904_v58 = vunpack.i.l.bf16 %v3903_v17 }
 0x23d   : > { %v2313_v41 = vsel %vm774_vm14, %v8707_v32, %v2282_v4  ;;  %v2187_v9 = vsel %vm228_vm2, %v3899_v31, 0.0  ;;  %v7750_v16 = vsel %vm228_vm2, %v3835_v39, 0.0  ;;  %v7754_v61 = vsel %vm228_vm2, %v3834_v26, 0.0 }
 0x23e   : > { %v7757_v5 = vadd.f32 %v984_v14, %v7636_v43  ;;  %v2361_v17 = vsel %vm823_vm0, %v8706_v56, %v2330_v1  ;;  %v2236_v35 = vsel %vm229_vm13, %v3905_v12, 0.0  ;;  %v2235_v50 = vsel %vm229_vm13, %v3904_v58, 0.0  ;;  %v9014_v14 = vld [vmem:[#allocation61_spill] sm:$0xff]  ;;  %v9015_v56 = vld [vmem:[#allocation62_spill] sm:$0xff] }
 0x23f   : > { %v2251_v24 = vmax.f32 %v2187_v9, %v2235_v50  ;;  %v2252_v23 = vmax.f32 %v2188_v62, %v2236_v35  ;;  %v3840_v31 = vunpack.i.h.bf16 %v3838_v28  ;;  %v3839_v6 = vunpack.i.l.bf16 %v3838_v28  ;;  %v3913_v9 = vpop.permute.xlu0 %3912 }
 0x240   : > { %v7768_v3 = vadd.f32 %v1006_v47, %v7620_v45  ;;  %v2314_v43 = vsel %vm230_vm5, %v2313_v41, 0.0  ;;  %v3845_v27 = vunpack.i.h.bf16 %v3843_v34  ;;  %v3844_v39 = vunpack.i.l.bf16 %v3843_v34 }
 0x241   : > { %v7774_v26 = vsel %vm261_vm6, %v2361_v17, 0.0  ;;  %v2267_v12 = vmax.f32 %v9014_v14, %v2251_v24  ;;  %v7778_v58 = vmax.f32 %v9015_v56, %v2252_v23  ;;  %v3910_v62 = vunpack.i.h.bf16 %v3908_v55 }
 0x242   : > { %v7782_v28 = vsel %vm228_vm2, %v3840_v31, 0.0  ;;  %v3909_v47 = vunpack.i.l.bf16 %v3908_v55  ;;  %v1441_v41 = vsel %vm228_vm2, %v3845_v27, 0.0  ;;  %v1440_v34 = vsel %vm228_vm2, %v3844_v39, 0.0 }
 0x243   : > { %v2283_v17 = vrot.slane %v2267_v12, 7  ;;  %v2331_v35 = vrot.slane %v2267_v12, 1  ;;  %v8710_v50 = vrot.slane %v7778_v58, 1  ;;  %v7791_v56 = vsel %vm228_vm2, %v3839_v6, 0.0 }
 0x244   : > { %v1504_v24 = vmax.f32 %v1440_v34, %v7689_v10  ;;  %v1505_v23 = vmax.f32 %v1441_v41, %v7665_v46  ;;  %v3915_v31 = vunpack.i.h.bf16 %v3913_v9  ;;  %v3914_v55 = vunpack.i.l.bf16 %v3913_v9  ;;  %v9016_v10 = vld [vmem:[#allocation27_spill] sm:$0xff] }
 0x245   : > { %v8713_v14 = vrot.slane %v7778_v58, 7  ;;  %v2312_v27 = vsel %vm774_vm14, %v2282_v4, %v2283_v17  ;;  %v2359_v39 = vsel %vm823_vm0, %v2331_v35, %v8710_v50  ;;  %v2360_v6 = vsel %vm823_vm0, %v2330_v1, %v2331_v35  ;;  %v9017_v46 = vld [vmem:[#allocation31_spill] sm:$0xff]  ;;  %v3853_v1 = vpop.permute.xlu1 %3852 }
 0x246   : > { %v2378_v32 = vmax.f32 %v2314_v43, %v2360_v6  ;;  %v2379_v36 = vmax.f32 %v2312_v27, %v2359_v39  ;;  %v7805_v34 = vmax.f32 %v9016_v10, %v1504_v24  ;;  %v1521_v9 = vmax.f32 %v9017_v46, %v1505_v23 }
 0x247   : > { %v2961_v41 = vsel %vm228_vm2, %v3910_v62, 0.0  ;;  %v2946_v4 = vsel %vm228_vm2, %v3909_v47, 0.0  ;;  %v3009_v63 = vsel %vm229_vm13, %v3915_v31, 0.0  ;;  %v2994_v50 = vsel %vm229_vm13, %v3914_v55, 0.0  ;;  %v3918_v55 = vpop.permute.xlu0 %3917 }
 0x248   : > { %v2394_v43 = vmax.f32 %v2266_v13, %v2378_v32  ;;  %v2395_v35 = vmax.f32 %v2267_v12, %v2379_v36  ;;  %v8714_v24 = vrot.slane %v7805_v34, 7  ;;  %v1537_v27 = vrot.slane %v1521_v9, 7 }
 0x249   : > { %v7821_v62 = vsel %vm774_vm14, %v2283_v17, %v8713_v14  ;;  %v1585_v23 = vrot.slane %v1521_v9, 1  ;;  %v3010_v47 = vmax.f32 %v2946_v4, %v2994_v50  ;;  %v3025_v39 = vmax.f32 %v2961_v41, %v3009_v63 }
 0x24a   : > { %v1538_v31 = vsel %vm774_vm14, %v8714_v24, %v1537_v27  ;;  %v8715_v13 = vrot.slane %v7805_v34, 1  ;;  %v3855_v36 = vunpack.i.h.bf16 %v3853_v1  ;;  %v3854_v32 = vunpack.i.l.bf16 %v3853_v1 }
 0x24b   : > { %v2458_v12 = vmul.f32 %v6125_v38, %v2394_v43  ;;  %v1553_v17 = vsel %vm774_vm14, %v1537_v27, %v1522_v21  ;;  %v1601_v63 = vsel %vm823_vm0, %v1585_v23, %v1570_v51  ;;  %v7838_v50 = vmax.f32 %v6110_v52, %v3010_v47 }
 0x24c   : > { %v2459_v6 = vmul.f32 %v6377_v15, %v2395_v35  ;;  %v1554_v10 = vsel %vm230_vm5, %v1553_v17, 0.0  ;;  %v1617_v38 = vsel %vm261_vm6, %v1601_v63, 0.0  ;;  %v7846_v46 = vmax.f32 %v6117_v0, %v3025_v39 }
 0x24d   : > { %v1618_v21 = vmax.f32 %v1554_v10, %v7685_v33  ;;  %v1633_v41 = vmax.f32 %v1538_v31, %v1617_v38  ;;  %v8717_v51 = vrot.slane %v7838_v50, 7  ;;  %v8716_v52 = vrot.slane %v7838_v50, 1  ;;  %v9022_v10 = vld [vmem:[#allocation38_spill] sm:$0xff] }
 0x24e   : > { %v8712_v4 = vrot.slane %v7846_v46, 7  ;;  %v8711_v15 = vrot.slane %v7846_v46, 1  ;;  %v1477_v1 = vsel %vm229_vm13, %v3855_v36, 0.0  ;;  %v1476_v27 = vsel %vm229_vm13, %v3854_v32, 0.0  ;;  %v3923_v32 = vpop.permute.xlu0 %3922 }
 0x24f   : > { %v7857_v47 = vmax.f32 %v1521_v9, %v1633_v41  ;;  %v1492_v0 = vmax.f32 %v7661_v53, %v1476_v27  ;;  %v1493_v33 = vmax.f32 %v7657_v2, %v1477_v1  ;;  %v1634_v39 = vmax.f32 %v7639_v40, %v1618_v21  ;;  %v3858_v2 = vpop.permute.xlu1 %3857  ;;  %v9019_v9 = vld [vmem:[#allocation37_spill] sm:$0xff]  ;;  %v9023_v21 = vld [vmem:[#allocation63_spill] sm:$0xff] }
 0x250   : > { %v7862_v31 = vadd.f32 %v2459_v6, %v2458_v12  ;;  %v7864_v17 = vadd.f32 %v2395_v35, %v2394_v43  ;;  %v7870_v36 = vsel %vm823_vm0, %v8715_v13, %v1585_v23  ;;  %v3073_v53 = vsel %vm774_vm14, %v8712_v4, %v8717_v51  ;;  %v9020_v12 = vld [vmem:[#allocation74_spill] sm:$0xff] }
 0x251   : > { %9018 = vst [vmem:[#allocation8_spill] sm:$0xff] %v7857_v47  ;;  %v7884_v40 = vsel %vm823_vm0, %v8711_v15, %v8716_v52  ;;  %v1508_v43 = vmax.f32 %v9019_v9, %v1492_v0  ;;  %v3920_v35 = vunpack.i.h.bf16 %v3918_v55  ;;  %v3919_v23 = vunpack.i.l.bf16 %v3918_v55 }
 0x252   : > { %v7889_v63 = vmul.f32 %v9020_v12, %v7857_v47  ;;  %v7893_v6 = vsel %vm230_vm5, %v3073_v53, 0.0  ;;  %v1509_v38 = vmax.f32 %v9022_v10, %v1493_v33  ;;  %v1698_v41 = vmul.f32 %v9023_v21, %v1634_v39 }
 0x253   : > { %v1524_v1 = vrot.slane %v1508_v43, 7  ;;  %v1572_v27 = vrot.slane %v1508_v43, 1  ;;  %v3860_v15 = vunpack.i.h.bf16 %v3858_v2  ;;  %v3859_v4 = vunpack.i.l.bf16 %v3858_v2 }
 0x254   : > { %9021 = vst [vmem:[#allocation21_spill] sm:$0xff] %v7889_v63  ;;  %v1525_v0 = vrot.slane %v1509_v38, 7  ;;  %v1573_v9 = vrot.slane %v1509_v38, 1  ;;  %v3925_v55 = vunpack.i.h.bf16 %v3923_v32  ;;  %v3924_v14 = vunpack.i.l.bf16 %v3923_v32 }
 0x255   : > { %v9024_v24 = vrot.slane %v7623_v22, 7  ;;  %v9025_v53 = vrot.slane %v7623_v22, 1  ;;  %v1479_v10 = vsel %vm229_vm13, %v3860_v15, 0.0  ;;  %v1478_v2 = vsel %vm229_vm13, %v3859_v4, 0.0 }
 0x256   : > { %v1598_v21 = vsel %vm823_vm0, %v1572_v27, %v1573_v9  ;;  %v2947_v13 = vsel %vm228_vm2, %v3919_v23, 0.0  ;;  %v1495_v51 = vmax.f32 %v7696_v8, %v1479_v10  ;;  %v2995_v15 = vsel %vm229_vm13, %v3924_v14, 0.0  ;;  %v3863_v23 = vpop.permute.xlu1 %3862  ;;  %v9027_v8 = vld [vmem:[#allocation42_spill] sm:$0xff] }
 0x257   : > { %v1551_v12 = vsel %vm774_vm14, %v9024_v24, %v1524_v1  ;;  %v1599_v33 = vsel %vm823_vm0, %v9025_v53, %v1572_v27  ;;  %v1494_v24 = vmax.f32 %v7700_v54, %v1478_v2  ;;  %v2996_v53 = vsel %vm229_vm13, %v3925_v55, 0.0  ;;  %v9028_v2 = vld [vmem:[#allocation64_spill] sm:$0xff] }
 0x258   : > { %v1619_v32 = vmax.f32 %v7676_v49, %v1599_v33  ;;  %v1620_v52 = vmax.f32 %v1551_v12, %v1598_v21  ;;  %v2948_v27 = vsel %vm228_vm2, %v3920_v35, 0.0  ;;  %v9026_v49 = vld [vmem:[#allocation41_spill] sm:$0xff]  ;;  %v3011_v63 = vmax.f32 %v2947_v13, %v2995_v15  ;;  %v9029_v15 = vld [vmem:[#allocation66_spill] sm:$0xff] }
 0x259   : > { %v1510_v33 = vmax.f32 %v9026_v49, %v1494_v24  ;;  %v1550_v54 = vsel %vm774_vm14, %v1524_v1, %v1525_v0  ;;  %v7927_v10 = vmax.f32 %v9027_v8, %v1495_v51  ;;  %v3012_v55 = vmax.f32 %v2948_v27, %v2996_v53  ;;  %v9030_v53 = vld [vmem:[#allocation79_spill] sm:$0xff] }
 0x25a   : > { %v1635_v4 = vmax.f32 %v7623_v22, %v1619_v32  ;;  %v1636_v12 = vmax.f32 %v1508_v43, %v1620_v52  ;;  %v3027_v35 = vmax.f32 %v6159_v37, %v3011_v63  ;;  %v3865_v24 = vunpack.i.h.bf16 %v3863_v23 }
 0x25b   : > { %v1526_v47 = vrot.slane %v1510_v33, 7  ;;  %v1574_v22 = vrot.slane %v1510_v33, 1  ;;  %v1575_v32 = vrot.slane %v7927_v10, 1  ;;  %v3864_v13 = vunpack.i.l.bf16 %v3863_v23 }
 0x25c   : > { %v1699_v21 = vmul.f32 %v9028_v2, %v1635_v4  ;;  %v1756_v14 = vadd.f32 %v1635_v4, %v1634_v39  ;;  %v1700_v49 = vmul.f32 %v9029_v15, %v1636_v12  ;;  %v7942_v37 = vmax.f32 %v9030_v53, %v3012_v55 }
 0x25d   : > { %v1549_v52 = vsel %vm774_vm14, %v1525_v0, %v1526_v47  ;;  %v1597_v51 = vsel %vm823_vm0, %v1573_v9, %v1574_v22  ;;  %v1596_v39 = vsel %vm823_vm0, %v1574_v22, %v1575_v32  ;;  %v1527_v63 = vrot.slane %v7927_v10, 7 }
 0x25e   : > { %v1735_v18 = vadd.f32 %v1699_v21, %v1698_v41  ;;  %v1757_v43 = vadd.f32 %v1756_v14, %v1636_v12  ;;  %v1621_v1 = vmax.f32 %v1550_v54, %v1597_v51  ;;  %v1622_v4 = vmax.f32 %v1549_v52, %v1596_v39  ;;  %v9033_v14 = vld [vmem:[#allocation68_spill] sm:$0xff]  ;;  %v3868_v39 = vpop.permute.xlu1 %3867 }
 0x25f   : > { %v3043_v41 = vrot.slane %v3027_v35, 7  ;;  %v3091_v27 = vrot.slane %v3027_v35, 1  ;;  %v8719_v8 = vrot.slane %v7942_v37, 1  ;;  %v1481_v9 = vsel %vm229_vm13, %v3865_v24, 0.0 }
 0x260   : > { %v1736_v23 = vadd.f32 %v1735_v18, %v1700_v49  ;;  %v1637_v0 = vmax.f32 %v1509_v38, %v1621_v1  ;;  %v1638_v12 = vmax.f32 %v1510_v33, %v1622_v4  ;;  %v9031_v2 = vrot.slane %v7838_v50, 7  ;;  %v7958_v38 = vpop.permute.xlu0 %3927 }
 0x261   : > { %v9032_v55 = vrot.slane %v7838_v50, 1  ;;  %v1480_v18 = vsel %vm229_vm13, %v3864_v13, 0.0  ;;  %v8720_v33 = vrot.slane %v7942_v37, 7  ;;  %v3119_v24 = vsel %vm823_vm0, %v3091_v27, %v8719_v8 }
 0x262   : > { %v3072_v54 = vsel %vm774_vm14, %v9031_v2, %v3043_v41  ;;  %v1701_v22 = vmul.f32 %v9033_v14, %v1637_v0  ;;  %v1758_v15 = vadd.f32 %v1757_v43, %v1637_v0  ;;  %v7969_v49 = vsel %vm261_vm6, %v7884_v40, 0.0  ;;  %v9035_v2 = vld [vmem:[#allocation49_spill] sm:$0xff] }
 0x263   : > { %v3120_v21 = vsel %vm823_vm0, %v9032_v55, %v3091_v27  ;;  %v3139_v13 = vmax.f32 %v3072_v54, %v3119_v24  ;;  %v1496_v51 = vmax.f32 %v7721_v20, %v1480_v18  ;;  %v1548_v43 = vsel %vm774_vm14, %v1526_v47, %v1527_v63  ;;  %v9034_v27 = vld [vmem:[#allocation75_spill] sm:$0xff]  ;;  %v9036_v47 = vld [vmem:[#allocation50_spill] sm:$0xff] }
 0x264   : > { %v3138_v52 = vmax.f32 %v7893_v6, %v3120_v21  ;;  %v1737_v1 = vadd.f32 %v1736_v23, %v1701_v22  ;;  %v1497_v53 = vmax.f32 %v7712_v60, %v1481_v9  ;;  %v3930_v4 = vunpack.i.h.bf16 %v7958_v38 }
 0x265   : > { %v1702_v0 = vmul.f32 %v9034_v27, %v1638_v12  ;;  %v3155_v40 = vmax.f32 %v3027_v35, %v3139_v13  ;;  %v1512_v55 = vmax.f32 %v9035_v2, %v1496_v51  ;;  %v1759_v6 = vadd.f32 %v1758_v15, %v1638_v12  ;;  %v9037_v35 = vld [vmem:[#allocation102_spill] sm:$0xff]  ;;  %v9038_v12 = vld [vmem:[#allocation105_spill] sm:$0xff]  ;;  %v3938_v15 = vpop.permute.xlu0 %3937 }
 0x266   : > { %v3154_v44 = vmax.f32 %v7838_v50, %v3138_v52  ;;  %v7984_v20 = vsel %vm774_vm14, %v3043_v41, %v8720_v33  ;;  %v1513_v23 = vmax.f32 %v9036_v47, %v1497_v53  ;;  %v3870_v54 = vunpack.i.h.bf16 %v3868_v39 }
 0x267   : > { %v1738_v60 = vadd.f32 %v1737_v1, %v1702_v0  ;;  %v1528_v9 = vrot.slane %v1512_v55, 7  ;;  %v7989_v21 = vsel %vm228_vm2, %v3930_v4, 0.0  ;;  %v7996_v14 = vmul.f32 %v9038_v12, %v3155_v40  ;;  %v3873_v1 = vpop.permute.xlu1 %3872 }
 0x268   : > { %v7993_v18 = vmul.f32 %v9037_v35, %v3154_v44  ;;  %v1576_v22 = vrot.slane %v1512_v55, 1  ;;  %v1577_v41 = vrot.slane %v1513_v23, 1  ;;  %v1529_v24 = vrot.slane %v1513_v23, 7 }
 0x269   : > { %v1547_v52 = vsel %vm774_vm14, %v1527_v63, %v1528_v9  ;;  %v1483_v13 = vsel %vm229_vm13, %v3870_v54, 0.0  ;;  %v3869_v51 = vunpack.i.l.bf16 %v3868_v39  ;;  %v8002_v53 = vadd.f32 %v3155_v40, %v3154_v44  ;;  %v9039_v44 = vld [vmem:[#allocation59_spill] sm:$0xff] }
 0x26a   : > { %v1594_v4 = vsel %vm823_vm0, %v1576_v22, %v1577_v41  ;;  %v1595_v27 = vsel %vm823_vm0, %v1575_v32, %v1576_v22  ;;  %v1499_v0 = vmax.f32 %v7732_v7, %v1483_v13  ;;  %v3940_v54 = vunpack.i.h.bf16 %v3938_v15 }
 0x26b   : > { %v1623_v2 = vmax.f32 %v1548_v43, %v1595_v27  ;;  %v1624_v47 = vmax.f32 %v1547_v52, %v1594_v4  ;;  %v1482_v63 = vsel %vm229_vm13, %v3869_v51, 0.0  ;;  %v3939_v35 = vunpack.i.l.bf16 %v3938_v15  ;;  %v9040_v43 = vld [vmem:[#allocation58_spill] sm:$0xff]  ;;  %v3943_v4 = vpop.permute.xlu0 %3942  ;;  %v9041_v27 = vld [vmem:[#allocation77_spill] sm:$0xff] }
 0x26c   : > { %v1498_v39 = vmax.f32 %v7737_v29, %v1482_v63  ;;  %v8015_v40 = vmax.f32 %v9039_v44, %v1499_v0  ;;  %v3875_v12 = vunpack.i.h.bf16 %v3873_v1  ;;  %v1546_v8 = vsel %vm774_vm14, %v1528_v9, %v1529_v24  ;;  %v9042_v63 = vld [vmem:[#allocation83_spill] sm:$0xff] }
 0x26d   : > { %v1639_v32 = vmax.f32 %v7927_v10, %v1623_v2  ;;  %v1640_v22 = vmax.f32 %v1512_v55, %v1624_v47  ;;  %v3874_v7 = vunpack.i.l.bf16 %v3873_v1  ;;  %v2950_v29 = vsel %vm228_vm2, %v3940_v54, 0.0 }
 0x26e   : > { %v1514_v52 = vmax.f32 %v9040_v43, %v1498_v39  ;;  %v1531_v13 = vrot.slane %v8015_v40, 7  ;;  %v1579_v51 = vrot.slane %v8015_v40, 1  ;;  %v2190_v9 = vsel %vm228_vm2, %v3939_v35, 0.0 }
 0x26f   : > { %v1703_v15 = vmul.f32 %v9041_v27, %v1639_v32  ;;  %v1760_v0 = vadd.f32 %v1759_v6, %v1639_v32  ;;  %v1485_v10 = vsel %vm229_vm13, %v3875_v12, 0.0  ;;  %v1484_v2 = vsel %vm229_vm13, %v3874_v7, 0.0 }
 0x270   : > { %v1530_v55 = vrot.slane %v1514_v52, 7  ;;  %v1578_v1 = vrot.slane %v1514_v52, 1  ;;  %v1501_v47 = vmax.f32 %v7750_v16, %v1485_v10  ;;  %v1704_v39 = vmul.f32 %v9042_v63, %v1640_v22  ;;  %v9043_v10 = vld [vmem:[#allocation65_spill] sm:$0xff] }
 0x271   : > { %v1739_v54 = vadd.f32 %v1738_v60, %v1703_v15  ;;  %v1500_v44 = vmax.f32 %v7754_v61, %v1484_v2  ;;  %v3945_v43 = vunpack.i.h.bf16 %v3943_v4  ;;  %v1761_v6 = vadd.f32 %v1760_v0, %v1640_v22  ;;  %v3878_v15 = vpop.permute.xlu1 %3877  ;;  %v9044_v2 = vld [vmem:[#allocation67_spill] sm:$0xff] }
 0x272   : > { %v1545_v35 = vsel %vm774_vm14, %v1529_v24, %v1530_v55  ;;  %v1592_v12 = vsel %vm823_vm0, %v1578_v1, %v1579_v51  ;;  %v1593_v32 = vsel %vm823_vm0, %v1577_v41, %v1578_v1  ;;  %v1544_v7 = vsel %vm774_vm14, %v1530_v55, %v1531_v13 }
 0x273   : > { %v1625_v16 = vmax.f32 %v1546_v8, %v1593_v32  ;;  %v1626_v27 = vmax.f32 %v1545_v35, %v1592_v12  ;;  %v1516_v60 = vmax.f32 %v9043_v10, %v1500_v44  ;;  %v1740_v61 = vadd.f32 %v1739_v54, %v1704_v39  ;;  %v9045_v35 = vld [vmem:[#allocation84_spill] sm:$0xff]  ;;  %v9047_v10 = vld [vmem:[#allocation89_spill] sm:$0xff] }
 0x274   : > { %v8045_v22 = vmax.f32 %v9044_v2, %v1501_v47  ;;  %v2998_v24 = vsel %vm229_vm13, %v3945_v43, 0.0  ;;  %v3944_v0 = vunpack.i.l.bf16 %v3943_v4  ;;  %v3880_v44 = vunpack.i.h.bf16 %v3878_v15  ;;  %v9046_v4 = vld [vmem:[#allocation86_spill] sm:$0xff] }
 0x275   : > { %v1641_v63 = vmax.f32 %v1513_v23, %v1625_v16  ;;  %v1642_v33 = vmax.f32 %v1514_v52, %v1626_v27  ;;  %v1532_v50 = vrot.slane %v1516_v60, 7  ;;  %v1580_v41 = vrot.slane %v1516_v60, 1 }
 0x276   : > { %v1581_v1 = vrot.slane %v8045_v22, 1  ;;  %v2238_v8 = vsel %vm229_vm13, %v3944_v0, 0.0  ;;  %v3014_v55 = vmax.f32 %v2950_v29, %v2998_v24  ;;  %v1533_v47 = vrot.slane %v8045_v22, 7  ;;  %v9048_v24 = vld [vmem:[#allocation90_spill] sm:$0xff] }
 0x277   : > { %v1705_v39 = vmul.f32 %v9045_v35, %v1641_v63  ;;  %v1762_v54 = vadd.f32 %v1761_v6, %v1641_v63  ;;  %v1543_v43 = vsel %vm774_vm14, %v1531_v13, %v1532_v50  ;;  %v1706_v23 = vmul.f32 %v9046_v4, %v1642_v33  ;;  %v3948_v35 = vpop.permute.xlu0 %3947 }
 0x278   : > { %v1590_v52 = vsel %vm823_vm0, %v1580_v41, %v1581_v1  ;;  %v1591_v12 = vsel %vm823_vm0, %v1579_v51, %v1580_v41  ;;  %v2254_v29 = vmax.f32 %v2190_v9, %v2238_v8  ;;  %v8067_v13 = vmax.f32 %v9048_v24, %v3014_v55  ;;  %v3933_v55 = vpop.permute.xlu1 %3932 }
 0x279   : > { %v1741_v32 = vadd.f32 %v1740_v61, %v1705_v39  ;;  %v1763_v16 = vadd.f32 %v1762_v54, %v1642_v33  ;;  %v1627_v27 = vmax.f32 %v1544_v7, %v1591_v12  ;;  %v1628_v6 = vmax.f32 %v1543_v43, %v1590_v52 }
 0x27a   : > { %v8064_v2 = vmax.f32 %v9047_v10, %v2254_v29  ;;  %v1487_v0 = vsel %vm229_vm13, %v3880_v44, 0.0  ;;  %v3879_v63 = vunpack.i.l.bf16 %v3878_v15  ;;  %v9049_v4 = vunpack.i.l.bf16 %v7958_v38  ;;  %v9050_v38 = vld [vmem:[#allocation88_spill] sm:$0xff] }
 0x27b   : > { %v1643_v33 = vmax.f32 %v8015_v40, %v1627_v27  ;;  %v1644_v9 = vmax.f32 %v1516_v60, %v1628_v6  ;;  %v1503_v7 = vmax.f32 %v7782_v28, %v1487_v0  ;;  %v8079_v61 = vadd.f32 %v7996_v14, %v7993_v18  ;;  %v9051_v14 = vld [vmem:[#allocation72_spill] sm:$0xff]  ;;  %v3953_v24 = vpop.permute.xlu0 %3952 }
 0x27c   : > { %v2189_v51 = vsel %vm228_vm2, %v9049_v4, 0.0  ;;  %v1742_v41 = vadd.f32 %v1741_v32, %v1706_v23  ;;  %v1542_v8 = vsel %vm774_vm14, %v1532_v50, %v1533_v47  ;;  %v2286_v15 = vrot.slane %v8064_v2, 7  ;;  %v9052_v23 = vld [vmem:[#allocation94_spill] sm:$0xff]  ;;  %v9053_v32 = vld [vmem:[#allocation71_spill] sm:$0xff] }
 0x27d   : > { %v1707_v44 = vmul.f32 %v9050_v38, %v1643_v33  ;;  %v1764_v39 = vadd.f32 %v1763_v16, %v1643_v33  ;;  %v2334_v54 = vrot.slane %v8064_v2, 1  ;;  %v1486_v40 = vsel %vm229_vm13, %v3879_v63, 0.0 }
 0x27e   : > { %v3046_v28 = vrot.slane %v8067_v13, 7  ;;  %v1502_v18 = vmax.f32 %v7791_v56, %v1486_v40  ;;  %v1519_v60 = vmax.f32 %v9051_v14, %v1503_v7  ;;  %v3950_v43 = vunpack.i.h.bf16 %v3948_v35 }
 0x27f   : > { %v1708_v50 = vmul.f32 %v9052_v23, %v1644_v9  ;;  %v3094_v52 = vrot.slane %v8067_v13, 1  ;;  %v3935_v12 = vunpack.i.h.bf16 %v3933_v55  ;;  %v3934_v29 = vunpack.i.l.bf16 %v3933_v55 }
 0x280   : > { %v1518_v16 = vmax.f32 %v9053_v32, %v1502_v18  ;;  %v1535_v27 = vrot.slane %v1519_v60, 7  ;;  %v1583_v6 = vrot.slane %v1519_v60, 1  ;;  %v3949_v10 = vunpack.i.l.bf16 %v3948_v35 }
 0x281   : > { %v1743_v0 = vadd.f32 %v1742_v41, %v1707_v44  ;;  %v1765_v63 = vadd.f32 %v1764_v39, %v1644_v9  ;;  %v2997_v56 = vsel %vm229_vm13, %v3935_v12, 0.0  ;;  %v2237_v4 = vsel %vm229_vm13, %v3934_v29, 0.0 }
 0x282   : > { %v1534_v33 = vrot.slane %v1518_v16, 7  ;;  %v1582_v7 = vrot.slane %v1518_v16, 1  ;;  %v9054_v38 = vrot.slane %v7805_v34, 1  ;;  %v2951_v40 = vsel %vm228_vm2, %v3950_v43, 0.0 }
 0x283   : > { %v9055_v35 = vrot.slane %v7805_v34, 7  ;;  %v2253_v41 = vmax.f32 %v2189_v51, %v2237_v4  ;;  %v3013_v44 = vmax.f32 %v7989_v21, %v2997_v56  ;;  %v3955_v39 = vunpack.i.h.bf16 %v3953_v24  ;;  %v9056_v56 = vld [vmem:[#allocation81_spill] sm:$0xff]  ;;  %v9057_v4 = vld [vmem:[#allocation82_spill] sm:$0xff] }
 0x284   : > { %v1587_v55 = vsel %vm823_vm0, %v1583_v6, %v9054_v38  ;;  %v1540_v18 = vsel %vm774_vm14, %v1534_v33, %v1535_v27  ;;  %v1541_v14 = vsel %vm774_vm14, %v1533_v47, %v1534_v33  ;;  %v1588_v23 = vsel %vm823_vm0, %v1582_v7, %v1583_v6 }
 0x285   : > { %v1539_v9 = vsel %vm774_vm14, %v1535_v27, %v9055_v35  ;;  %v1589_v43 = vsel %vm823_vm0, %v1581_v1, %v1582_v7  ;;  %v1744_v12 = vadd.f32 %v1743_v0, %v1708_v50  ;;  %v1630_v51 = vmax.f32 %v1541_v14, %v1588_v23  ;;  %v9059_v23 = vld [vmem:[#allocation99_spill] sm:$0xff] }
 0x286   : > { %v1629_v29 = vmax.f32 %v1542_v8, %v1589_v43  ;;  %v1631_v32 = vmax.f32 %v1540_v18, %v1587_v55  ;;  %v2191_v21 = vsel %vm228_vm2, %v3949_v10, 0.0  ;;  %v2269_v27 = vmax.f32 %v9056_v56, %v2253_v41  ;;  %v9058_v55 = vld [vmem:[#allocation96_spill] sm:$0xff] }
 0x287   : > { %v3029_v38 = vmax.f32 %v9057_v4, %v3013_v44  ;;  %v2999_v47 = vsel %vm229_vm13, %v3955_v39, 0.0  ;;  %v1632_v6 = vmax.f32 %v1539_v9, %v7870_v36  ;;  %v1646_v35 = vmax.f32 %v1518_v16, %v1630_v51  ;;  %v9062_v39 = vld [vmem:[#allocation100_spill] sm:$0xff] }
 0x288   : > { %v1645_v33 = vmax.f32 %v8045_v22, %v1629_v29  ;;  %v1647_v1 = vmax.f32 %v1519_v60, %v1631_v32  ;;  %v2285_v50 = vrot.slane %v2269_v27, 7  ;;  %v2333_v8 = vrot.slane %v2269_v27, 1 }
 0x289   : > { %v3045_v0 = vrot.slane %v3029_v38, 7  ;;  %v3093_v7 = vrot.slane %v3029_v38, 1  ;;  %v3954_v14 = vunpack.i.l.bf16 %v3953_v24  ;;  %v3015_v41 = vmax.f32 %v2951_v40, %v2999_v47 }
 0x28a   : > { %v1709_v18 = vmul.f32 %v9058_v55, %v1645_v33  ;;  %v1766_v10 = vadd.f32 %v1765_v63, %v1645_v33  ;;  %v1710_v44 = vmul.f32 %v9059_v23, %v1646_v35  ;;  %v9060_v43 = vrot.slane %v7778_v58, 7 }
 0x28b   : > { %v2357_v22 = vsel %vm823_vm0, %v2333_v8, %v2334_v54  ;;  %v9061_v60 = vrot.slane %v7778_v58, 1  ;;  %v1711_v29 = vmul.f32 %v9062_v39, %v1647_v1  ;;  %v9063_v51 = vrot.slane %v7942_v37, 7 }
 0x28c   : > { %v2310_v36 = vsel %vm774_vm14, %v9060_v43, %v2285_v50  ;;  %v1745_v63 = vadd.f32 %v1744_v12, %v1709_v18  ;;  %v1767_v24 = vadd.f32 %v1766_v10, %v1646_v35  ;;  %v3117_v56 = vsel %vm823_vm0, %v3093_v7, %v3094_v52  ;;  %v9065_v10 = vld [vmem:[#allocation95_spill] sm:$0xff] }
 0x28d   : > { %v2358_v16 = vsel %vm823_vm0, %v9061_v60, %v2333_v8  ;;  %v2381_v9 = vmax.f32 %v2310_v36, %v2357_v22  ;;  %v3070_v32 = vsel %vm774_vm14, %v9063_v51, %v3045_v0  ;;  %v9064_v4 = vrot.slane %v7942_v37, 1  ;;  %v9068_v22 = vld [vmem:[#allocation34_spill] sm:$0xff] }
 0x28e   : > { %v2380_v40 = vmax.f32 %v7821_v62, %v2358_v16  ;;  %v1746_v47 = vadd.f32 %v1745_v63, %v1710_v44  ;;  %v1768_v62 = vadd.f32 %v1767_v24, %v1647_v1  ;;  %v3141_v55 = vmax.f32 %v3070_v32, %v3117_v56  ;;  %v3963_v32 = vpop.permute.xlu1 %3962 }
 0x28f   : > { %v3118_v12 = vsel %vm823_vm0, %v9064_v4, %v3093_v7  ;;  %v2397_v35 = vmax.f32 %v2269_v27, %v2381_v9  ;;  %v2239_v18 = vsel %vm229_vm13, %v3954_v14, 0.0  ;;  %v8160_v23 = vmax.f32 %v9065_v10, %v3015_v41  ;;  %v9066_v7 = vld [vmem:[#allocation91_spill] sm:$0xff]  ;;  %v9075_v10 = vld [vmem:[#allocation48_spill] sm:$0xff] }
 0x290   : > { %v2396_v33 = vmax.f32 %v7778_v58, %v2380_v40  ;;  %v3140_v8 = vmax.f32 %v7984_v20, %v3118_v12  ;;  %v8163_v43 = vmax.f32 %v7805_v34, %v1632_v6  ;;  %v2309_v1 = vsel %vm774_vm14, %v2285_v50, %v2286_v15  ;;  %v9067_v6 = vld [vmem:[#allocation112_spill] sm:$0xff]  ;;  %v9073_v12 = vld [vmem:[#allocation53_spill] sm:$0xff] }
 0x291   : > { %v3069_v20 = vsel %vm774_vm14, %v3045_v0, %v3046_v28  ;;  %v8174_v27 = vadd.f32 %v1746_v47, %v1711_v29  ;;  %v3157_v41 = vmax.f32 %v3029_v38, %v3141_v55  ;;  %v2255_v44 = vmax.f32 %v2191_v21, %v2239_v18  ;;  %v9069_v0 = vld [vmem:[#allocation108_spill] sm:$0xff]  ;;  %v9071_v21 = vld [vmem:[#allocation93_spill] sm:$0xff] }
 0x292   : > { %v2460_v58 = vmul.f32 %v9066_v7, %v2396_v33  ;;  %v3156_v14 = vmax.f32 %v7942_v37, %v3140_v8  ;;  %v8178_v34 = vadd.f32 %v1768_v62, %v8163_v43  ;;  %v2461_v36 = vmul.f32 %v9067_v6, %v2397_v35  ;;  %v9070_v37 = vld [vmem:[#allocation111_spill] sm:$0xff]  ;;  %v9074_v47 = vld [vmem:[#allocation29_spill] sm:$0xff] }
 0x293   : > { %v3095_v50 = vrot.slane %v8160_v23, 1  ;;  %4550 = vlog2.f32 %v9068_v22  ;;  %v2517_v16 = vadd.f32 %v7864_v17, %v2396_v33  ;;  %v3221_v38 = vmul.f32 %v9070_v37, %v3157_v41  ;;  %v3973_v22 = vpop.permute.xlu1 %3972 }
 0x294   : > { %v2496_v60 = vadd.f32 %v7862_v31, %v2460_v58  ;;  %v3220_v63 = vmul.f32 %v9069_v0, %v3156_v14  ;;  %v3277_v24 = vadd.f32 %v8002_v53, %v3156_v14  ;;  %v8189_v40 = vmax.f32 %v9071_v21, %v2255_v44  ;;  %v9072_v53 = vld [vmem:[#allocation54_spill] sm:$0xff] }
 0x295   : > { %v3047_v9 = vrot.slane %v8160_v23, 7  ;;  %v3116_v31 = vsel %vm823_vm0, %v3094_v52, %v3095_v50  ;;  %v950_v51 = vmul.f32 %v9072_v53, %v7620_v45  ;;  %v964_v62 = vadd.f32 %v9074_v47, %v9073_v12  ;;  %v9077_v0 = vld [vmem:[#allocation114_spill] sm:$0xff] }
 0x296   : > { %v3256_v17 = vadd.f32 %v8079_v61, %v3220_v63  ;;  %v3278_v39 = vadd.f32 %v3277_v24, %v3157_v41  ;;  %v3142_v29 = vmax.f32 %v3069_v20, %v3116_v31  ;;  %v2287_v56 = vrot.slane %v8189_v40, 7  ;;  %v3958_v20 = vpop.permute.xlu0 %3957 }
 0x297   : > { %v2335_v4 = vrot.slane %v8189_v40, 1  ;;  %v1008_v33 = vadd.f32 %v7768_v3, %v7570_v48  ;;  %v2518_v8 = vadd.f32 %v2517_v16, %v2397_v35  ;;  %v986_v55 = vadd.f32 %v7757_v5, %v950_v51  ;;  %v9076_v5 = vld [vmem:[#allocation113_spill] sm:$0xff] }
 0x298   : > { %v3257_v52 = vadd.f32 %v3256_v17, %v3221_v38  ;;  %v3158_v61 = vmax.f32 %v8067_v13, %v3142_v29  ;;  %v2497_v18 = vadd.f32 %v2496_v60, %v2461_v36  ;;  %v965_v7 = vadd.f32 %v964_v62, %v9075_v10 }
 0x299   : > { %v2356_v45 = vsel %vm823_vm0, %v2334_v54, %v2335_v4  ;;  %v1009_v58 = vrot.slane %v1008_v33, 4  ;;  %v8222_v48 = vsel %vm774_vm14, %v3046_v28, %v3047_v9  ;;  %v987_v35 = vadd.f32 %v986_v55, %v7617_v25 }
 0x29a   : > { %v2382_v14 = vmax.f32 %v2309_v1, %v2356_v45  ;;  %v3222_v3 = vmul.f32 %v9076_v5, %v3158_v61  ;;  %v8232_v54 = vsel %vm774_vm14, %v2286_v15, %v2287_v56  ;;  %v8234_v1 = vadd.f32 %v3278_v39, %v3158_v61  ;;  %v3968_v39 = vpop.permute.xlu0 %3967  ;;  %v9078_v61 = vld [vmem:[#allocation98_spill] sm:$0xff]  ;;  %v9079_v45 = vld [vmem:[#allocation97_spill] sm:$0xff] }
 0x29b   : > { %v1010_v41 = vadd.f32 %v1009_v58, %v1008_v33  ;;  %v3965_v13 = vunpack.i.h.bf16 %v3963_v32  ;;  %v988_v6 = vrot.slane %v987_v35, 4  ;;  %v3964_v36 = vunpack.i.l.bf16 %v3963_v32 }
 0x29c   : > { %v2398_v44 = vmax.f32 %v8064_v2, %v2382_v14  ;;  %v8237_v28 = vadd.f32 %v3257_v52, %v3222_v3  ;;  %vm1016_vm7 = vcmp.eq.s32.totalorder %v7247_v19, 1  ;;  %v3960_v16 = vunpack.i.h.bf16 %v3958_v20 }
 0x29d   : > { %v1011_v25 = vrot.slane %v1010_v41, 2  ;;  %v3000_v60 = vsel %vm229_vm13, %v3965_v13, 0.0  ;;  %v3959_v15 = vunpack.i.l.bf16 %v3958_v20  ;;  %v989_v37 = vadd.f32 %v988_v6, %v987_v35  ;;  %v9080_v20 = vld [vmem:[#allocation47_spill] sm:$0xff] }
 0x29e   : > { %v2462_v63 = vmul.f32 %v9077_v0, %v2398_v44  ;;  %v2519_v24 = vadd.f32 %v2518_v8, %v2398_v44  ;;  %v2240_v2 = vsel %vm229_vm13, %v3964_v36, 0.0  ;;  %v2952_v21 = vsel %vm228_vm2, %v3960_v16, 0.0 }
 0x29f   : > { %v1012_v38 = vadd.f32 %v1011_v25, %v1010_v41  ;;  %v2192_v31 = vsel %vm228_vm2, %v3959_v15, 0.0  ;;  %v3975_v17 = vunpack.i.h.bf16 %v3973_v22  ;;  %v990_v51 = vrot.slane %v989_v37, 2 }
 0x2a0   : > { %v4551_v29 = vpop.eup %4550  ;;  %v2498_v53 = vadd.f32 %v2497_v18, %v2462_v63  ;;  %v3016_v32 = vmax.f32 %v2952_v21, %v3000_v60  ;;  %v2256_v12 = vmax.f32 %v2192_v31, %v2240_v2  ;;  %v3974_v8 = vunpack.i.l.bf16 %v3973_v22  ;;  %v3983_v60 = vpop.permute.xlu1 %3982 }
 0x2a1   : > { %v469_v47 = vmul.f32 0.6931472, %v4551_v29  ;;  %v1013_v62 = vrot.slane %v1012_v38, 1  ;;  %v3001_v33 = vsel %vm229_vm13, %v3975_v17, 0.0  ;;  %v991_v52 = vadd.f32 %v990_v51, %v989_v37  ;;  %v9081_v29 = vld [vmem:[#allocation104_spill] sm:$0xff] }
 0x2a2   : > { %v8252_v55 = vmax.f32 %v9078_v61, %v3016_v32  ;;  %v8255_v10 = vmax.f32 %v9079_v45, %v2256_v12  ;;  %v3970_v58 = vunpack.i.h.bf16 %v3968_v39  ;;  %v2241_v5 = vsel %vm229_vm13, %v3974_v8, 0.0  ;;  %v9082_v32 = vld [vmem:[#allocation101_spill] sm:$0xff]  ;;  %v9084_v61 = vld [vmem:[#allocation119_spill] sm:$0xff] }
 0x2a3   : > { %v485_v14 = vadd.f32 %v469_v47, %v9080_v20  ;;  %v1014_v18 = vadd.f32 %v1013_v62, %v1012_v38  ;;  %v3969_v3 = vunpack.i.l.bf16 %v3968_v39  ;;  %v992_v35 = vrot.slane %v991_v52, 1 }
 0x2a4   : > { %v3048_v41 = vrot.slane %v8252_v55, 7  ;;  %v3096_v13 = vrot.slane %v8252_v55, 1  ;;  %v2288_v44 = vrot.slane %v8255_v10, 7  ;;  %v2336_v36 = vrot.slane %v8255_v10, 1 }
 0x2a5   : > { %v966_v6 = vadd.f32 %v965_v7, %v485_v14  ;;  %v2953_v22 = vsel %vm228_vm2, %v3970_v58, 0.0  ;;  %v2193_v25 = vsel %vm228_vm2, %v3969_v3, 0.0  ;;  %v993_v16 = vadd.f32 %v992_v35, %v991_v52  ;;  %v3993_v35 = vpop.permute.xlu1 %3992 }
 0x2a6   : > { %v2307_v15 = vsel %vm774_vm14, %v2287_v56, %v2288_v44  ;;  %v3067_v7 = vsel %vm774_vm14, %v3047_v9, %v3048_v41  ;;  %v3115_v0 = vsel %vm823_vm0, %v3095_v50, %v3096_v13  ;;  %v2355_v37 = vsel %vm823_vm0, %v2335_v4, %v2336_v36  ;;  %v3978_v56 = vpop.permute.xlu0 %3977 }
 0x2a7   : > { %v967_v63 = vrot.slane %v966_v6, 4  ;;  %v3143_v2 = vmax.f32 %v8222_v48, %v3115_v0  ;;  %v3017_v38 = vmax.f32 %v2953_v22, %v3001_v33  ;;  %vm1015_vm8 = vcmp.eq.s32.totalorder %v7247_v19, 0  ;;  %v9083_v33 = vld [vmem:[#allocation118_spill] sm:$0xff] }
 0x2a8   : > { %v1017_v9 = vsel %vm1016_vm7, %v993_v16, %v1014_v18  ;;  %v2383_v21 = vmax.f32 %v8232_v54, %v2355_v37  ;;  %v2257_v31 = vmax.f32 %v2193_v25, %v2241_v5  ;;  %v3985_v17 = vunpack.i.h.bf16 %v3983_v60 }
 0x2a9   : > { %v968_v50 = vadd.f32 %v967_v63, %v966_v6  ;;  %vm1019_vm9 = vcmask 1042432   ;;  %v3159_v39 = vmax.f32 %v8160_v23, %v3143_v2  ;;  %v8291_v51 = vmax.f32 %v9081_v29, %v3017_v38 }
 0x2aa   : > { %v3984_v4 = vunpack.i.l.bf16 %v3983_v60  ;;  %v2399_v48 = vmax.f32 %v8189_v40, %v2383_v21  ;;  %v8295_v12 = vmax.f32 %v9082_v32, %v2257_v31  ;;  %v3002_v47 = vsel %vm229_vm13, %v3985_v17, 0.0  ;;  %v3988_v25 = vpop.permute.xlu0 %3987  ;;  %v9085_v31 = vld [vmem:[#allocation107_spill] sm:$0xff] }
 0x2ab   : > { %v3980_v62 = vunpack.i.h.bf16 %v3978_v56  ;;  %v969_v54 = vrot.slane %v968_v50, 2  ;;  %v3223_v8 = vmul.f32 %v9083_v33, %v3159_v39  ;;  %v3280_v52 = vadd.f32 %v8234_v1, %v3159_v39 }
 0x2ac   : > { %v3049_v23 = vrot.slane %v8291_v51, 7  ;;  %v2463_v45 = vmul.f32 %v9084_v61, %v2399_v48  ;;  %v2520_v58 = vadd.f32 %v2519_v24, %v2399_v48  ;;  %v3097_v20 = vrot.slane %v8291_v51, 1  ;;  %v4003_v61 = vpop.permute.xlu1 %4002 }
 0x2ad   : > { %v2289_v40 = vrot.slane %v8295_v12, 7  ;;  %v970_v14 = vadd.f32 %v969_v54, %v968_v50  ;;  %v3259_v18 = vadd.f32 %v8237_v28, %v3223_v8  ;;  %v2337_v5 = vrot.slane %v8295_v12, 1  ;;  %v9088_v54 = vld [vmem:[#allocation106_spill] sm:$0xff] }
 0x2ae   : > { %v3066_v3 = vsel %vm774_vm14, %v3048_v41, %v3049_v23  ;;  %v2499_v6 = vadd.f32 %v2498_v53, %v2463_v45  ;;  %v3114_v24 = vsel %vm823_vm0, %v3096_v13, %v3097_v20  ;;  %v2242_v22 = vsel %vm229_vm13, %v3984_v4, 0.0  ;;  %v9087_v4 = vld [vmem:[#allocation122_spill] sm:$0xff] }
 0x2af   : > { %v2306_v1 = vsel %vm774_vm14, %v2288_v44, %v2289_v40  ;;  %v971_v60 = vrot.slane %v970_v14, 1  ;;  %v2354_v28 = vsel %vm823_vm0, %v2336_v36, %v2337_v5  ;;  %v3144_v16 = vmax.f32 %v3067_v7, %v3114_v24 }
 0x2b0   : > { %v2954_v41 = vsel %vm228_vm2, %v3980_v62, 0.0  ;;  %v2384_v0 = vmax.f32 %v2307_v15, %v2354_v28  ;;  %v3979_v63 = vunpack.i.l.bf16 %v3978_v56  ;;  %v3995_v37 = vunpack.i.h.bf16 %v3993_v35  ;;  %v9086_v56 = vld [vmem:[#allocation121_spill] sm:$0xff] }
 0x2b1   : > { %v3018_v53 = vmax.f32 %v2954_v41, %v3002_v47  ;;  %v972_v44 = vadd.f32 %v971_v60, %v970_v14  ;;  %v3160_v2 = vmax.f32 %v8252_v55, %v3144_v16  ;;  %v3994_v13 = vunpack.i.l.bf16 %v3993_v35 }
 0x2b2   : > { %v3990_v38 = vunpack.i.h.bf16 %v3988_v25  ;;  %v2400_v21 = vmax.f32 %v8255_v10, %v2384_v0  ;;  %v2194_v36 = vsel %vm228_vm2, %v3979_v63, 0.0  ;;  %v3003_v7 = vsel %vm229_vm13, %v3995_v37, 0.0 }
 0x2b3   : > { %v3034_v17 = vmax.f32 %v9085_v31, %v3018_v53  ;;  %v1018_v15 = vsel %vm1015_vm8, %v972_v44, %v1017_v9  ;;  %v3224_v50 = vmul.f32 %v9086_v56, %v3160_v2  ;;  %v3281_v39 = vadd.f32 %v3280_v52, %v3160_v2  ;;  %v9090_v2 = vld [vmem:[#allocation109_spill] sm:$0xff] }
 0x2b4   : > { %v2258_v29 = vmax.f32 %v2194_v36, %v2242_v22  ;;  %v1020_v55 = vsel %vm1019_vm9, %v1018_v15, 0.0  ;;  %v2464_v48 = vmul.f32 %v9087_v4, %v2400_v21  ;;  %v2521_v10 = vadd.f32 %v2520_v58, %v2400_v21  ;;  %v9091_v21 = vld [vmem:[#allocation125_spill] sm:$0xff] }
 0x2b5   : > { %v3050_v32 = vrot.slane %v3034_v17, 7  ;;  %1021 = vadd.xlane.f32.xlu0 %v1020_v55  ;;  %v3260_v47 = vadd.f32 %v3259_v18, %v3224_v50  ;;  %v3098_v62 = vrot.slane %v3034_v17, 1  ;;  %v2243_v8 = vsel %vm229_vm13, %v3994_v13, 0.0  ;;  %v4013_v50 = vpop.permute.xlu1 %4012 }
 0x2b6   : > { %v2274_v33 = vmax.f32 %v9088_v54, %v2258_v29  ;;  %v2500_v9 = vadd.f32 %v2499_v6, %v2464_v48  ;;  %v2955_v45 = vsel %vm228_vm2, %v3990_v38, 0.0  ;;  %v3989_v14 = vunpack.i.l.bf16 %v3988_v25  ;;  %v3998_v6 = vpop.permute.xlu0 %3997  ;;  %v9089_v25 = vld [vmem:[#allocation110_spill] sm:$0xff] }
 0x2b7   : > { %v3065_v52 = vsel %vm774_vm14, %v3049_v23, %v3050_v32  ;;  %v3113_v18 = vsel %vm823_vm0, %v3097_v20, %v3098_v62  ;;  %v3019_v24 = vmax.f32 %v2955_v45, %v3003_v7  ;;  %v4005_v28 = vunpack.i.h.bf16 %v4003_v61  ;;  %v9092_v29 = vld [vmem:[#allocation126_spill] sm:$0xff] }
 0x2b8   : > { %v2290_v35 = vrot.slane %v2274_v33, 7  ;;  %v2338_v58 = vrot.slane %v2274_v33, 1  ;;  %v3145_v22 = vmax.f32 %v3066_v3, %v3113_v18  ;;  %v2195_v60 = vsel %vm228_vm2, %v3989_v14, 0.0 }
 0x2b9   : > { %v4004_v16 = vunpack.i.l.bf16 %v4003_v61  ;;  %v8347_v0 = vmax.f32 %v9089_v25, %v3019_v24  ;;  %v2259_v53 = vmax.f32 %v2195_v60, %v2243_v8  ;;  %v3004_v3 = vsel %vm229_vm13, %v4005_v28, 0.0  ;;  %v9093_v60 = vld [vmem:[#allocation127_spill] sm:$0xff] }
 0x2ba   : > { %v2305_v23 = vsel %vm774_vm14, %v2289_v40, %v2290_v35  ;;  %v2353_v41 = vsel %vm823_vm0, %v2337_v5, %v2338_v58  ;;  %v3161_v20 = vmax.f32 %v8291_v51, %v3145_v22  ;;  %v4000_v5 = vunpack.i.h.bf16 %v3998_v6  ;;  %v4008_v8 = vpop.permute.xlu0 %4007 }
 0x2bb   : > { %v2385_v63 = vmax.f32 %v2306_v1, %v2353_v41  ;;  %v2244_v37 = vsel %vm229_vm13, %v4004_v16, 0.0  ;;  %v3051_v44 = vrot.slane %v8347_v0, 7  ;;  %v3099_v40 = vrot.slane %v8347_v0, 1  ;;  %v9094_v16 = vld [vmem:[#allocation116_spill] sm:$0xff] }
 0x2bc   : > { %v2275_v13 = vmax.f32 %v9090_v2, %v2259_v53  ;;  %v3225_v31 = vmul.f32 %v9091_v21, %v3161_v20  ;;  %v3282_v1 = vadd.f32 %v3281_v39, %v3161_v20  ;;  %v3999_v36 = vunpack.i.l.bf16 %v3998_v6  ;;  %v9095_v6 = vld [vmem:[#allocation115_spill] sm:$0xff]  ;;  %v9096_v53 = vld [vmem:[#allocation128_spill] sm:$0xff] }
 0x2bd   : > { %v2401_v38 = vmax.f32 %v8295_v12, %v2385_v63  ;;  %v3064_v15 = vsel %vm774_vm14, %v3050_v32, %v3051_v44  ;;  %v3112_v56 = vsel %vm823_vm0, %v3098_v62, %v3099_v40  ;;  %v2956_v61 = vsel %vm228_vm2, %v4000_v5, 0.0 }
 0x2be   : > { %v2291_v51 = vrot.slane %v2275_v13, 7  ;;  %v2339_v7 = vrot.slane %v2275_v13, 1  ;;  %v3261_v48 = vadd.f32 %v3260_v47, %v3225_v31  ;;  %v3146_v54 = vmax.f32 %v3065_v52, %v3112_v56 }
 0x2bf   : > { %v2465_v55 = vmul.f32 %v9092_v29, %v2401_v38  ;;  %v2522_v4 = vadd.f32 %v2521_v10, %v2401_v38  ;;  %v2196_v32 = vsel %vm228_vm2, %v3999_v36, 0.0  ;;  %v3020_v18 = vmax.f32 %v2956_v61, %v3004_v3 }
 0x2c0   : > { %v2304_v12 = vsel %vm774_vm14, %v2290_v35, %v2291_v51  ;;  %v2352_v39 = vsel %vm823_vm0, %v2338_v58, %v2339_v7  ;;  %v3162_v14 = vmax.f32 %v3034_v17, %v3146_v54  ;;  %v2260_v10 = vmax.f32 %v2196_v32, %v2244_v37 }
 0x2c1   : > { %v2501_v62 = vadd.f32 %v2500_v9, %v2465_v55  ;;  %v2386_v45 = vmax.f32 %v2305_v23, %v2352_v39  ;;  %v4015_v47 = vunpack.i.h.bf16 %v4013_v50  ;;  %v4014_v52 = vunpack.i.l.bf16 %v4013_v50  ;;  %v4023_v23 = vpop.permute.xlu1 %4022  ;;  %v9097_v55 = vld [vmem:[#allocation120_spill] sm:$0xff] }
 0x2c2   : > { %v4010_v24 = vunpack.i.h.bf16 %v4008_v8  ;;  %v3226_v35 = vmul.f32 %v9093_v60, %v3162_v14  ;;  %v3283_v28 = vadd.f32 %v3282_v1, %v3162_v14  ;;  %v3036_v58 = vmax.f32 %v9094_v16, %v3020_v18  ;;  %v9098_v18 = vld [vmem:[#allocation117_spill] sm:$0xff]  ;;  %v9100_v60 = vld [vmem:[#allocation131_spill] sm:$0xff] }
 0x2c3   : > { %v2402_v22 = vmax.f32 %v2274_v33, %v2386_v45  ;;  %v8375_v41 = vmax.f32 %v9095_v6, %v2260_v10  ;;  %v3005_v25 = vsel %vm229_vm13, %v4015_v47, 0.0  ;;  %v2245_v17 = vsel %vm229_vm13, %v4014_v52, 0.0  ;;  %v9099_v52 = vld [vmem:[#allocation133_spill] sm:$0xff] }
 0x2c4   : > { %v2957_v9 = vsel %vm228_vm2, %v4010_v24, 0.0  ;;  %v3262_v20 = vadd.f32 %v3261_v48, %v3226_v35  ;;  %v3052_v3 = vrot.slane %v3036_v58, 7  ;;  %v3100_v37 = vrot.slane %v3036_v58, 1  ;;  %v4018_v48 = vpop.permute.xlu0 %4017 }
 0x2c5   : > { %v2466_v33 = vmul.f32 %v9096_v53, %v2402_v22  ;;  %v2523_v63 = vadd.f32 %v2522_v4, %v2402_v22  ;;  %v2292_v2 = vrot.slane %v8375_v41, 7  ;;  %v2340_v5 = vrot.slane %v8375_v41, 1 }
 0x2c6   : > { %v3021_v38 = vmax.f32 %v2957_v9, %v3005_v25  ;;  %v3063_v31 = vsel %vm774_vm14, %v3051_v44, %v3052_v3  ;;  %v4009_v1 = vunpack.i.l.bf16 %v4008_v8  ;;  %v4025_v36 = vunpack.i.h.bf16 %v4023_v23 }
 0x2c7   : > { %v2502_v21 = vadd.f32 %v2501_v62, %v2466_v33  ;;  %v2303_v56 = vsel %vm774_vm14, %v2291_v51, %v2292_v2  ;;  %v2351_v50 = vsel %vm823_vm0, %v2339_v7, %v2340_v5  ;;  %v3111_v29 = vsel %vm823_vm0, %v3099_v40, %v3100_v37 }
 0x2c8   : > { %v8395_v4 = vmax.f32 %v9097_v55, %v3021_v38  ;;  %v2387_v54 = vmax.f32 %v2304_v12, %v2351_v50  ;;  %v3147_v39 = vmax.f32 %v3064_v15, %v3111_v29  ;;  %v2197_v44 = vsel %vm228_vm2, %v4009_v1, 0.0  ;;  %v9101_v1 = vld [vmem:[#allocation124_spill] sm:$0xff] }
 0x2c9   : > { %v3006_v8 = vsel %vm229_vm13, %v4025_v36, 0.0  ;;  %v2261_v7 = vmax.f32 %v2197_v44, %v2245_v17  ;;  %v4024_v32 = vunpack.i.l.bf16 %v4023_v23  ;;  %v4020_v45 = vunpack.i.h.bf16 %v4018_v48  ;;  %v4033_v17 = vpop.permute.xlu1 %4032 }
 0x2ca   : > { %v3053_v51 = vrot.slane %v8395_v4, 7  ;;  %v3101_v61 = vrot.slane %v8395_v4, 1  ;;  %v2403_v62 = vmax.f32 %v2275_v13, %v2387_v54  ;;  %v3163_v40 = vmax.f32 %v8347_v0, %v3147_v39 }
 0x2cb   : > { %v4019_v14 = vunpack.i.l.bf16 %v4018_v48  ;;  %v2277_v12 = vmax.f32 %v9098_v18, %v2261_v7  ;;  %v2246_v47 = vsel %vm229_vm13, %v4024_v32, 0.0  ;;  %v2958_v25 = vsel %vm228_vm2, %v4020_v45, 0.0  ;;  %v9103_v48 = vld [vmem:[#allocation123_spill] sm:$0xff] }
 0x2cc   : > { %v3062_v15 = vsel %vm774_vm14, %v3052_v3, %v3053_v51  ;;  %v3110_v10 = vsel %vm823_vm0, %v3100_v37, %v3101_v61  ;;  %v2467_v24 = vmul.f32 %v9099_v52, %v2403_v62  ;;  %v2524_v22 = vadd.f32 %v2523_v63, %v2403_v62  ;;  %v4028_v3 = vpop.permute.xlu0 %4027  ;;  %v9104_v62 = vld [vmem:[#allocation137_spill] sm:$0xff] }
 0x2cd   : > { %v3227_v13 = vmul.f32 %v9100_v60, %v3163_v40  ;;  %v3284_v35 = vadd.f32 %v3283_v28, %v3163_v40  ;;  %v2293_v0 = vrot.slane %v2277_v12, 7  ;;  %v2341_v16 = vrot.slane %v2277_v12, 1  ;;  %v4043_v18 = vpop.permute.xlu1 %4042 }
 0x2ce   : > { %v3148_v6 = vmax.f32 %v3063_v31, %v3110_v10  ;;  %v2503_v9 = vadd.f32 %v2502_v21, %v2467_v24  ;;  %v3022_v53 = vmax.f32 %v2958_v25, %v3006_v8  ;;  %v2198_v33 = vsel %vm228_vm2, %v4019_v14, 0.0 }
 0x2cf   : > { %v3263_v23 = vadd.f32 %v3262_v20, %v3227_v13  ;;  %v2302_v63 = vsel %vm774_vm14, %v2292_v2, %v2293_v0  ;;  %v2350_v28 = vsel %vm823_vm0, %v2340_v5, %v2341_v16  ;;  %v2262_v38 = vmax.f32 %v2198_v33, %v2246_v47  ;;  %v9102_v20 = vld [vmem:[#allocation136_spill] sm:$0xff] }
 0x2d0   : > { %v3164_v37 = vmax.f32 %v3036_v58, %v3148_v6  ;;  %v2388_v31 = vmax.f32 %v2303_v56, %v2350_v28  ;;  %v8422_v36 = vmax.f32 %v9101_v1, %v3022_v53  ;;  %v4035_v50 = vunpack.i.h.bf16 %v4033_v17  ;;  %v4038_v10 = vpop.permute.xlu0 %4037  ;;  %v9105_v53 = vld [vmem:[#allocation130_spill] sm:$0xff]  ;;  %v9108_v1 = vld [vmem:[#allocation129_spill] sm:$0xff] }
 0x2d1   : > { %v4034_v21 = vunpack.i.l.bf16 %v4033_v17  ;;  %v8426_v54 = vmax.f32 %v9103_v48, %v2262_v38  ;;  %v4030_v39 = vunpack.i.h.bf16 %v4028_v3  ;;  %v4029_v6 = vunpack.i.l.bf16 %v4028_v3 }
 0x2d2   : > { %v3228_v29 = vmul.f32 %v9102_v20, %v3164_v37  ;;  %v3285_v55 = vadd.f32 %v3284_v35, %v3164_v37  ;;  %v2404_v2 = vmax.f32 %v8375_v41, %v2388_v31  ;;  %v3054_v44 = vrot.slane %v8422_v36, 7 }
 0x2d3   : > { %v3102_v58 = vrot.slane %v8422_v36, 1  ;;  %v3007_v5 = vsel %vm229_vm13, %v4035_v50, 0.0  ;;  %v2294_v8 = vrot.slane %v8426_v54, 7  ;;  %v2342_v7 = vrot.slane %v8426_v54, 1 }
 0x2d4   : > { %v3264_v56 = vadd.f32 %v3263_v23, %v3228_v29  ;;  %v2247_v32 = vsel %vm229_vm13, %v4034_v21, 0.0  ;;  %v2468_v40 = vmul.f32 %v9104_v62, %v2404_v2  ;;  %v2525_v45 = vadd.f32 %v2524_v22, %v2404_v2 }
 0x2d5   : > { %v3061_v41 = vsel %vm774_vm14, %v3053_v51, %v3054_v44  ;;  %v3109_v14 = vsel %vm823_vm0, %v3101_v61, %v3102_v58  ;;  %v2301_v47 = vsel %vm774_vm14, %v2293_v0, %v2294_v8  ;;  %v2349_v52 = vsel %vm823_vm0, %v2341_v16, %v2342_v7 }
 0x2d6   : > { %v3149_v24 = vmax.f32 %v3062_v15, %v3109_v14  ;;  %v2959_v60 = vsel %vm228_vm2, %v4030_v39, 0.0  ;;  %v2504_v13 = vadd.f32 %v2503_v9, %v2468_v40  ;;  %v2389_v22 = vmax.f32 %v2302_v63, %v2349_v52  ;;  %v9106_v15 = vld [vmem:[#allocation139_spill] sm:$0xff]  ;;  %v9109_v14 = vld [vmem:[#allocation134_spill] sm:$0xff] }
 0x2d7   : > { %v3023_v35 = vmax.f32 %v2959_v60, %v3007_v5  ;;  %v4045_v25 = vunpack.i.h.bf16 %v4043_v18  ;;  %v4044_v61 = vunpack.i.l.bf16 %v4043_v18  ;;  %v4040_v17 = vunpack.i.h.bf16 %v4038_v10 }
 0x2d8   : > { %v3165_v51 = vmax.f32 %v8395_v4, %v3149_v24  ;;  %v2405_v23 = vmax.f32 %v2277_v12, %v2389_v22  ;;  %v2199_v0 = vsel %vm228_vm2, %v4029_v6, 0.0  ;;  %v4039_v16 = vunpack.i.l.bf16 %v4038_v10  ;;  %v9107_v4 = vld [vmem:[#allocation17_spill] sm:$0xff]  ;;  %v9110_v10 = vld [vmem:[#allocation132_spill] sm:$0xff] }
 0x2d9   : > { %v3039_v33 = vmax.f32 %v9105_v53, %v3023_v35  ;;  %v2263_v37 = vmax.f32 %v2199_v0, %v2247_v32  ;;  %v3008_v9 = vsel %vm229_vm13, %v4045_v25, 0.0  ;;  %v2248_v3 = vsel %vm229_vm13, %v4044_v61, 0.0 }
 0x2da   : > { %v3229_v28 = vmul.f32 %v9106_v15, %v3165_v51  ;;  %v2469_v63 = vmul.f32 %v9107_v4, %v2405_v23  ;;  %v2960_v12 = vsel %vm228_vm2, %v4040_v17, 0.0  ;;  %v2200_v20 = vsel %vm228_vm2, %v4039_v16, 0.0 }
 0x2db   : > { %v3055_v38 = vrot.slane %v3039_v33, 7  ;;  %v3103_v31 = vrot.slane %v3039_v33, 1  ;;  %v2279_v50 = vmax.f32 %v9108_v1, %v2263_v37  ;;  %v3024_v21 = vmax.f32 %v2960_v12, %v3008_v9 }
 0x2dc   : > { %v2526_v29 = vadd.f32 %v2525_v45, %v2405_v23  ;;  %v2264_v2 = vmax.f32 %v2200_v20, %v2248_v3  ;;  %v2505_v5 = vadd.f32 %v2504_v13, %v2469_v63  ;;  %v3265_v24 = vadd.f32 %v3264_v56, %v3229_v28 }
 0x2dd   : > { %v3060_v48 = vsel %vm774_vm14, %v3054_v44, %v3055_v38  ;;  %v3108_v39 = vsel %vm823_vm0, %v3102_v58, %v3103_v31  ;;  %v2295_v32 = vrot.slane %v2279_v50, 7  ;;  %v2343_v62 = vrot.slane %v2279_v50, 1 }
 0x2de   : > { %v3150_v40 = vmax.f32 %v3061_v41, %v3108_v39  ;;  %v3040_v18 = vmax.f32 %v9109_v14, %v3024_v21  ;;  %v2280_v52 = vmax.f32 %v9110_v10, %v2264_v2  ;;  %v3286_v60 = vadd.f32 %v3285_v55, %v3165_v51  ;;  %v9116_v21 = vld [vmem:[#allocation73_spill] sm:$0xff]  ;;  %v9120_v10 = vld [vmem:[#allocation8_spill] sm:$0xff] }
 0x2df   : > { %4552 = vlog2.f32 %v9111_v42  ;;  %v2300_v45 = vsel %vm774_vm14, %v2294_v8, %v2295_v32  ;;  %v2348_v44 = vsel %vm823_vm0, %v2342_v7, %v2343_v62  ;;  %v9112_v56 = vrot.slane %v7846_v46, 7  ;;  %v9124_v42 = vld [vmem:[#allocation21_spill] sm:$0xff] }
 0x2e0   : > { %v3166_v58 = vmax.f32 %v8422_v36, %v3150_v40  ;;  %v3056_v13 = vrot.slane %v3040_v18, 7  ;;  %v2390_v22 = vmax.f32 %v2301_v47, %v2348_v44  ;;  %v3104_v35 = vrot.slane %v3040_v18, 1  ;;  %v9119_v40 = vld [vmem:[#allocation9_spill] sm:$0xff] }
 0x2e1   : > { %v2296_v41 = vrot.slane %v2280_v52, 7  ;;  %v2344_v6 = vrot.slane %v2280_v52, 1  ;;  %v9113_v36 = vrot.slane %v7724_v11, 7  ;;  %v1712_v20 = vmul.f32 %v9116_v21, %v8163_v43 }
 0x2e2   : > { %v3230_v25 = vmul.f32 %v7328_v30, %v3166_v58  ;;  %v3058_v55 = vsel %vm774_vm14, %v3056_v13, %v9112_v56  ;;  %v3059_v8 = vsel %vm774_vm14, %v3055_v38, %v3056_v13  ;;  %v3287_v51 = vadd.f32 %v3286_v60, %v3166_v58  ;;  %v9123_v60 = vld [vmem:[#allocation70_spill] sm:$0xff] }
 0x2e3   : > { %v2406_v7 = vmax.f32 %v8426_v54, %v2390_v22  ;;  %v2298_v47 = vsel %vm774_vm14, %v2296_v41, %v9113_v36  ;;  %v2299_v61 = vsel %vm774_vm14, %v2295_v32, %v2296_v41  ;;  %v9114_v30 = vrot.slane %v7724_v11, 1  ;;  %v9117_v32 = vld [vmem:[#allocation92_spill] sm:$0xff] }
 0x2e4   : > { %v2347_v23 = vsel %vm823_vm0, %v2343_v62, %v2344_v6  ;;  %v2393_v0 = vmax.f32 %v2298_v47, %v7774_v26  ;;  %v9115_v54 = vrot.slane %v7846_v46, 1  ;;  %v3107_v9 = vsel %vm823_vm0, %v3103_v31, %v3104_v35 }
 0x2e5   : > { %v2346_v17 = vsel %vm823_vm0, %v2344_v6, %v9114_v30  ;;  %v2470_v15 = vmul.f32 %v7345_v57, %v2406_v7  ;;  %v2391_v28 = vmax.f32 %v2300_v45, %v2347_v23  ;;  %v2527_v37 = vadd.f32 %v2526_v29, %v2406_v7  ;;  %v9118_v29 = vld [vmem:[#allocation87_spill] sm:$0xff] }
 0x2e6   : > { %v2392_v53 = vmax.f32 %v2299_v61, %v2346_v17  ;;  %v3106_v16 = vsel %vm823_vm0, %v3104_v35, %v9115_v54  ;;  %v3151_v4 = vmax.f32 %v3060_v48, %v3107_v9  ;;  %v3153_v38 = vmax.f32 %v3058_v55, %v7969_v49  ;;  %v9125_v35 = vld [vmem:[#allocation80_spill] sm:$0xff]  ;;  %v9126_v55 = vld [vmem:[#allocation103_spill] sm:$0xff]  ;;  %v9129_v61 = vld [vmem:[#allocation69_spill] sm:$0xff] }
 0x2e7   : > { %v3152_v63 = vmax.f32 %v3059_v8, %v3106_v16  ;;  %v2407_v12 = vmax.f32 %v2279_v50, %v2391_v28  ;;  %v2506_v1 = vadd.f32 %v2505_v5, %v2470_v15  ;;  %v3266_v26 = vadd.f32 %v3265_v24, %v3230_v25  ;;  %v9121_v50 = vld [vmem:[#allocation14_spill] sm:$0xff]  ;;  %v9128_v7 = vld [vmem:[#allocation135_spill] sm:$0xff]  ;;  %v9131_v54 = vld [vmem:[#allocation12_spill] sm:$0xff] }
 0x2e8   : > { %v2408_v3 = vmax.f32 %v2280_v52, %v2392_v53  ;;  %v3167_v2 = vmax.f32 %v3039_v33, %v3151_v4  ;;  %v1726_v62 = vadd.f32 %v9118_v29, %v9117_v32  ;;  %v1748_v48 = vadd.f32 %v8174_v27, %v1712_v20  ;;  %v9122_v52 = vld [vmem:[#allocation36_spill] sm:$0xff]  ;;  %v9130_v53 = vld [vmem:[#allocation55_spill] sm:$0xff] }
 0x2e9   : > { %v3168_v57 = vmax.f32 %v3040_v18, %v3152_v63  ;;  %v2471_v31 = vmul.f32 %v9119_v40, %v2407_v12  ;;  %v2528_v14 = vadd.f32 %v2527_v37, %v2407_v12  ;;  %v1770_v49 = vadd.f32 %v8178_v34, %v9120_v10  ;;  %v9132_v4 = vld [vmem:[#allocation11_spill] sm:$0xff]  ;;  %v9133_v63 = vld [vmem:[#allocation138_spill] sm:$0xff] }
 0x2ea   : > { %v2472_v39 = vmul.f32 %v7568_v59, %v2408_v3  ;;  %v3231_v5 = vmul.f32 %v9121_v50, %v3167_v2  ;;  %v3288_v43 = vadd.f32 %v3287_v51, %v3167_v2  ;;  %v1727_v59 = vadd.f32 %v1726_v62, %v9123_v60  ;;  %v9127_v51 = vld [vmem:[#allocation18_spill] sm:$0xff]  ;;  %v9135_v32 = vld [vmem:[#allocation15_spill] sm:$0xff] }
 0x2eb   : > { %v3232_v24 = vmul.f32 %v9122_v52, %v3168_v57  ;;  %v2507_v33 = vadd.f32 %v2506_v1, %v2471_v31  ;;  %v2529_v18 = vadd.f32 %v2528_v14, %v2408_v3  ;;  %v1749_v45 = vadd.f32 %v1748_v48, %v9124_v42  ;;  %v4560_v31 = vld [vmem:[%s4808_s26 + $0x178] sm:$0xff] }
 0x2ec   : > { %v1771_v44 = vrot.slane %v1770_v49, 4  ;;  %v4553_v58 = vpop.eup %4552  ;;  %v3267_v13 = vadd.f32 %v3266_v26, %v3231_v5  ;;  %v3289_v22 = vadd.f32 %v3288_v43, %v3168_v57  ;;  %4554 = vlog2.f32 %v9125_v35  ;;  %v9134_v26 = vld [vmem:[#allocation78_spill] sm:$0xff]  ;;  %v9136_v48 = vld [vmem:[#allocation43_spill] sm:$0xff] }
 0x2ed   : > { %v3169_v27 = vmax.f32 %v7846_v46, %v3153_v38  ;;  %v2508_v34 = vadd.f32 %v2507_v33, %v2472_v39  ;;  %v1233_v41 = vmul.f32 0.6931472, %v4553_v58  ;;  %v1750_v6 = vrot.slane %v1749_v45, 4  ;;  %v9139_v33 = vld [vmem:[#allocation76_spill] sm:$0xff] }
 0x2ee   : > { %v1772_v25 = vadd.f32 %v1771_v44, %v1770_v49  ;;  %v3268_v56 = vadd.f32 %v3267_v13, %v3232_v24  ;;  %v3246_v36 = vadd.f32 %v9128_v7, %v9127_v51  ;;  %4556 = vlog2.f32 %v9130_v53 }
 0x2ef   : > { %v3233_v8 = vmul.f32 %v9126_v55, %v3169_v27  ;;  %v3290_v47 = vadd.f32 %v3289_v22, %v3169_v27  ;;  %v1249_v30 = vadd.f32 %v1233_v41, %v9129_v61  ;;  %v1751_v17 = vadd.f32 %v1750_v6, %v1749_v45 }
 0x2f0   : > { %v1773_v23 = vrot.slane %v1772_v25, 2  ;;  %v3247_v16 = vadd.f32 %v3246_v36, %v9131_v54  ;;  %v2409_v28 = vmax.f32 %v7724_v11, %v2393_v0  ;;  %v2486_v38 = vadd.f32 %v9133_v63, %v9132_v4 }
 0x2f1   : > { %v3269_v46 = vadd.f32 %v3268_v56, %v3233_v8  ;;  %v3291_v15 = vrot.slane %v3290_v47, 4  ;;  %v1728_v37 = vadd.f32 %v1727_v59, %v1249_v30  ;;  %v1752_v9 = vrot.slane %v1751_v17, 2  ;;  %v9138_v59 = vld [vmem:[#allocation85_spill] sm:$0xff] }
 0x2f2   : > { %v1774_v3 = vadd.f32 %v1773_v23, %v1772_v25  ;;  %v2473_v21 = vmul.f32 %v9134_v26, %v2409_v28  ;;  %v2530_v20 = vadd.f32 %v2529_v18, %v2409_v28  ;;  %v2487_v29 = vadd.f32 %v2486_v38, %v9135_v32 }
 0x2f3   : > { %v3270_v12 = vrot.slane %v3269_v46, 4  ;;  %v3292_v1 = vadd.f32 %v3291_v15, %v3290_v47  ;;  %v1729_v39 = vrot.slane %v1728_v37, 4  ;;  %v1753_v2 = vadd.f32 %v1752_v9, %v1751_v17 }
 0x2f4   : > { %v1775_v57 = vrot.slane %v1774_v3, 1  ;;  %v2509_v11 = vadd.f32 %v2508_v34, %v2473_v21  ;;  %v2531_v0 = vrot.slane %v2530_v20, 4  ;;  %v1929_v14 = vmax.f32 %v4560_v31, 0.0 }
 0x2f5   : > { %v3271_v62 = vadd.f32 %v3270_v12, %v3269_v46  ;;  %v3293_v40 = vrot.slane %v3292_v1, 2  ;;  %v9137_v10 = vunpack.c.h.bf16 %v9136_v48  ;;  %v1730_v50 = vadd.f32 %v1729_v39, %v1728_v37 }
 0x2f6   : > { %v1754_v5 = vrot.slane %v1753_v2, 1  ;;  %v2510_v43 = vrot.slane %v2509_v11, 4  ;;  %v2532_v60 = vadd.f32 %v2531_v0, %v2530_v20  ;;  %v9140_v18 = vmax.f32 %v9139_v33, 0.0 }
 0x2f7   : > { %v1945_v49 = vmul.f32 %v4560_v31, %v9137_v10  ;;  %v3272_v52 = vrot.slane %v3271_v62, 2  ;;  %v3294_v24 = vadd.f32 %v3293_v40, %v3292_v1  ;;  %v1731_v45 = vrot.slane %v1730_v50, 2 }
 0x2f8   : > { %v2721_v42 = vsub.f32 %v9140_v18, %v9138_v59  ;;  %v1755_v44 = vadd.f32 %v1754_v5, %v1753_v2  ;;  %v1776_v58 = vadd.f32 %v1775_v57, %v1774_v3  ;;  %v2511_v35 = vadd.f32 %v2510_v43, %v2509_v11 }
 0x2f9   : > { %v3273_v13 = vadd.f32 %v3272_v52, %v3271_v62  ;;  %v3295_v22 = vrot.slane %v3294_v24, 1  ;;  %v2533_v27 = vrot.slane %v2532_v60, 2  ;;  %v4555_v34 = vpop.eup %4554  ;;  %v1732_v41 = vadd.f32 %v1731_v45, %v1730_v50 }
 0x2fa   : > { %v1777_v6 = vsel %vm1016_vm7, %v1755_v44, %v1776_v58  ;;  %v2753_v25 = vmul.f32 0.6931472, %v4555_v34  ;;  %v2512_v55 = vrot.slane %v2511_v35, 2  ;;  %v1961_v8 = vsub.f32 %v1929_v14, %v1945_v49 }
 0x2fb   : > { %v3274_v56 = vrot.slane %v3273_v13, 1  ;;  %v1733_v51 = vrot.slane %v1732_v41, 1  ;;  %v2534_v7 = vadd.f32 %v2533_v27, %v2532_v60  ;;  %v4557_v36 = vpop.eup %4556  ;;  %v3296_v30 = vadd.f32 %v3295_v22, %v3294_v24 }
 0x2fc   : > { %v2769_v47 = vadd.f32 %v2753_v25, %v2721_v42  ;;  %v2513_v17 = vadd.f32 %v2512_v55, %v2511_v35  ;;  %v1993_v53 = vmul.f32 0.6931472, %v4557_v36 }
 0x2fd   : > { %v3275_v61 = vadd.f32 %v3274_v56, %v3273_v13  ;;  %v1734_v23 = vadd.f32 %v1733_v51, %v1732_v41  ;;  %v2535_v54 = vrot.slane %v2534_v7, 1 }
 0x2fe   : > { %v3248_v46 = vadd.f32 %v3247_v16, %v2769_v47  ;;  %v2514_v28 = vrot.slane %v2513_v17, 1  ;;  %v2009_v9 = vadd.f32 %v1993_v53, %v1961_v8 }
 0x2ff   : > { %v3297_v15 = vsel %vm1016_vm7, %v3275_v61, %v3296_v30  ;;  %v1778_v37 = vsel %vm1015_vm8, %v1734_v23, %v1777_v6  ;;  %v2536_v38 = vadd.f32 %v2535_v54, %v2534_v7 }
 0x300   : > { %v1779_v3 = vsel %vm1019_vm9, %v1778_v37, 0.0  ;;  %v3249_v4 = vrot.slane %v3248_v46, 4  ;;  %v2515_v63 = vadd.f32 %v2514_v28, %v2513_v17  ;;  %v2488_v12 = vadd.f32 %v2487_v29, %v2009_v9 }
 0x301   : > { %1780 = vadd.xlane.f32.xlu1 %v1779_v3 }
 0x302   : > { %v3250_v1 = vadd.f32 %v3249_v4, %v3248_v46  ;;  %v2537_v26 = vsel %vm1016_vm7, %v2515_v63, %v2536_v38  ;;  %v2489_v16 = vrot.slane %v2488_v12, 4 }
 0x304   : > { %v3251_v21 = vrot.slane %v3250_v1, 2  ;;  %v2490_v20 = vadd.f32 %v2489_v16, %v2488_v12 }
 0x306   : > { %v3252_v39 = vadd.f32 %v3251_v21, %v3250_v1  ;;  %v2491_v2 = vrot.slane %v2490_v20, 2 }
 0x308   : > { %v3253_v57 = vrot.slane %v3252_v39, 1  ;;  %v2492_v32 = vadd.f32 %v2491_v2, %v2490_v20 }
 0x30a   : > { %v3254_v62 = vadd.f32 %v3253_v57, %v3252_v39  ;;  %v2493_v40 = vrot.slane %v2492_v32, 1 }
 0x30c   : > { %v3298_v11 = vsel %vm1015_vm8, %v3254_v62, %v3297_v15  ;;  %v2494_v29 = vadd.f32 %v2493_v40, %v2492_v32 }
 0x30d   : > { %v3299_v0 = vsel %vm1019_vm9, %v3298_v11, 0.0 }
 0x30e   : > { %3300 = vadd.xlane.f32.xlu1 %v3299_v0  ;;  %v2538_v31 = vsel %vm1015_vm8, %v2494_v29, %v2537_v26 }
 0x30f   : > { %v2539_v14 = vsel %vm1019_vm9, %v2538_v31, 0.0 }
 0x310   : > { %2540 = vadd.xlane.f32.xlu0 %v2539_v14 }
 0x33e   : > { %v1022_v48 = vpop.xlane.xlu0 %1021 }
 0x33f   : > { %1023 = vst [vmem:[%s207_s6] sm:$0x7] %v1022_v48 }
 0x38a   : > { %v1781_v10 = vpop.xlane.xlu1 %1780 }
 0x38b   : > { %3443 = vst [vmem:[%s207_s6 + $0x4] sm:$0x7] %v1781_v10 }
 0x397   : > { %v3301_v49 = vpop.xlane.xlu1 %3300 }
 0x398   : > { %3509 = vst [vmem:[%s207_s6 + $0xc] sm:$0x7] %v3301_v49 }
 0x399   : > { %v2541_v50 = vpop.xlane.xlu0 %2540 }
 0x39a   : > { %3476 = vst [vmem:[%s207_s6 + $0x8] sm:$0x7] %v2541_v50 }
 0x39b PF: > { %p15_p11 = scmp.ge.s32.totalorder %s4701_s14, 4   ;;  %s9141_s9 = smov %s4647_s10 }
 0x39c   : > { %s9142_s10 = smov %s4651_s11  ;;  %s9143_s11 = smov %s4711_s17 }
 0x39d   : > { %s9144_s12 = smov %s4701_s14  ;;  %17 = sbr.rel (!%p15_p11) target bundleno = 5 (0x5), region = 90 }
 0x3a2   :  { %3326 = vsyncpa [#allocation3], 1 }
 0x3a3   :  { %3328 = vsyncpa [#allocation3 + $0x1], 1 }
 0x3a4   :  { %3329 = vsyncpa [#allocation5], 1 }
 0x3a5   :  { %3331 = vsyncpa [#allocation5 + $0x1], 1 }

</bundles_post_ra>
